<compile_context>
chip_gen: v5e
topology: v5e:2x2
jax: 0.10.0
libtpu: 0.0.40
codegen_flags: <defaults>
</compile_context>

<pallas_src>
import math

import jax
import jax.numpy as jnp
from jax.experimental import pallas as pl
from jax.experimental.pallas import tpu as pltpu

TIME_DIM = 64          # Absolute_attention default -> 2*TIME_DIM = 128 (lane width)
LN_EPS = 1e-5          # torch.nn.LayerNorm default eps

_BUFFERED_ONE_OK = None


# ----------------------- Buffered(1) capability probe ----------------------- #

def _probe_kernel(x_ref, o_ref):
    o_ref[...] = x_ref[...] + 1.0


def _supports_buffered_one():
    """One-time probe: does pipeline_mode=pl.Buffered(1) lower & run correctly?"""
    global _BUFFERED_ONE_OK
    if _BUFFERED_ONE_OK is None:
        try:
            spec = pl.BlockSpec((8, 128), lambda i: (0, 0),
                                pipeline_mode=pl.Buffered(1))
            fn = pl.pallas_call(
                _probe_kernel,
                out_shape=jax.ShapeDtypeStruct((8, 128), jnp.float32),
                grid=(2,),
                in_specs=[spec],
                out_specs=pl.BlockSpec((8, 128), lambda i: (0, 0)),
            )
            res = jax.block_until_ready(fn(jnp.zeros((8, 128), jnp.float32)))
            _BUFFERED_ONE_OK = bool(jnp.all(res == 1.0))
        except Exception:
            _BUFFERED_ONE_OK = False
    return _BUFFERED_ONE_OK


# ----------------------------- Pallas kernel ------------------------------- #

def _attn_chunk_kernel(x_ref, wq_ref, wv_ref, wo_ref, time_lr_ref, time_rl_ref,
                       smask_ref, qexpand_ref, gamma_ref, beta_ref,
                       out_ref, acc_ref):
    """One (batch b, head-chunk c) grid step of an Absolute_attention layer.

    Shapes for the chunk (G heads, cw = G*hd columns, g2t = G*2*TIME_DIM rows):
      x        : (1, L, D) f32   (resident across the chunk axis)
      Wq / Wv  : (D, cw)   bf16  (chunk's output columns)
      Wo       : (cw, D)   bf16  (chunk's input rows)
      time_lr  : (L, g2t)  bf16  time[l, h, t] for the chunk's heads
      time_rl  : (g2t, L)  bf16  transpose of the above (precomputed)
      smask    : (g2t, cw) bf16  [head(time row) == head(col)]  block-diag mask
      qexpand  : (cw, cw)  bf16  [head(i)==head(j)] / hd  (per-head sum + bcast)
      gamma/b  : (1, D)    f32   LayerNorm affine
      acc_ref  : (L, D)    f32   output-projection accumulator (scratch)
    """
    c = pl.program_id(1)

    @pl.when(c == 0)
    def _init():
        acc_ref[...] = jnp.zeros_like(acc_ref)

    xb = x_ref[0].astype(jnp.bfloat16)                               # (L, D)

    # --- Q path: sigmoid of the chunk's Q columns, then per-head sum (with the
    #     1/hd fold) broadcast across that head's columns via one small matmul.
    q_sig = jax.nn.sigmoid(
        jnp.dot(xb, wq_ref[...], preferred_element_type=jnp.float32))       # (L, cw)
    qscale = jnp.dot(q_sig.astype(jnp.bfloat16), qexpand_ref[...],
                     preferred_element_type=jnp.float32)                    # (L, cw)

    # --- V path, reassociated over the sequence (no (L, L) attention matrix):
    #     S[(g,t), j] = sum_l time[l, g, t] * V[l, j];  mask keeps head(j)==g.
    v_chunk = jnp.dot(xb, wv_ref[...], preferred_element_type=jnp.float32)  # (L, cw)
    s_chunk = jnp.dot(time_rl_ref[...], v_chunk.astype(jnp.bfloat16),
                      preferred_element_type=jnp.float32)                   # (g2t, cw)
    # bf16 multiply is exact (0/1 mask) and is the operand dtype the next
    # matmul needs anyway -> halves the live intermediate.
    s_masked = s_chunk.astype(jnp.bfloat16) * smask_ref[...]                # (g2t, cw)

    raw = jnp.dot(time_lr_ref[...], s_masked,
                  preferred_element_type=jnp.float32)                       # (L, cw)
    comb = (qscale * raw).astype(jnp.bfloat16)                              # (L, cw)

    # Output projection distributed over chunks: acc += comb_chunk @ Wo[chunk, :].
    acc_ref[...] += jnp.dot(comb, wo_ref[...],
                            preferred_element_type=jnp.float32)             # (L, D)

    @pl.when(c == pl.num_programs(1) - 1)
    def _finalize():
        o = acc_ref[...]
        mean = jnp.mean(o, axis=-1, keepdims=True)
        var = jnp.mean(jnp.square(o - mean), axis=-1, keepdims=True)
        normed = (o - mean) * jax.lax.rsqrt(var + LN_EPS) * gamma_ref[...] + beta_ref[...]
        # Dropout(p=0.5) is identity in eval mode; residual add from Absolute_bert.
        out_ref[0] = x_ref[0] + normed


# ------------------------------- glue (JAX) -------------------------------- #

def _make_time(time_angle, head_time_delta, seq_len, hidden_dim):
    # time_angles = (arange(L)[:,None,None] + delta[None,:,None]) * time_angle
    pos = jnp.arange(seq_len, dtype=jnp.float32)
    ta = (pos[:, None, None] + head_time_delta[None, :, None]) * time_angle[None, :, :]
    c, s = jnp.cos(ta), jnp.sin(ta)
    return jnp.concatenate([c + s, c - s], axis=-1) / math.sqrt(hidden_dim)  # (L,H,2T)


def _chunking(D, H, hd):
    """Heads per chunk G, chosen so the chunk column width G*hd is lane-dense (128)."""
    if hd >= 128:
        g = 1                              # one head per chunk; cw = hd (mult of 128)
    elif D % 128 == 0 and 128 % hd == 0 and H % (128 // hd) == 0:
        g = 128 // hd                      # cw == 128 exactly
    else:
        g = H                              # dense single-chunk fallback (tiny dims)
    return g, H // g


def _vmem_limit_bytes(L, D, cw, g2t, single_buffer_invariants):
    bf, f4 = 2, 4
    inv = 1 if single_buffer_invariants else 2
    est = 0
    est += 2 * L * D * f4                       # x block (double-buffered)
    est += 2 * L * D * f4                       # out block
    est += 2 * 3 * D * cw * bf                  # Wq / Wv / Wo chunks
    est += 2 * 2 * L * g2t * bf                 # time_lr / time_rl chunks
    est += inv * (g2t * cw + cw * cw) * bf      # smask / qexpand
    est += inv * 2 * D * f4                     # gamma / beta
    est += L * D * f4                           # acc scratch
    # live intermediates: q_sig/qscale/v/raw/comb (L,cw) + s (g2t,cw) + LN temps
    est += 5 * L * cw * f4 + g2t * cw * (f4 + bf) + 2 * L * D * f4
    try:
        phys = int(getattr(pltpu.get_tpu_info(), "vmem_capacity_bytes", 64 << 20))
    except Exception:
        phys = 64 << 20                          # conservative (v7x) if query fails
    cap = max(32 << 20, int(0.75 * phys))
    return int(min(max(int(1.5 * est) + (8 << 20), 32 << 20), cap))


def absolute_attention_layer(x, p):
    B, L, D = x.shape
    H, hd = p["num_heads"], p["hidden_dim"]
    two_t = 2 * TIME_DIM
    R = H * two_t
    G, C = _chunking(D, H, hd)
    cw = G * hd                # chunk column width (== 128 whenever C > 1)
    g2t = G * two_t            # chunk "time" row count

    # Per-layer constants (plain XLA, computed once per call).
    time = _make_time(p["time_angle"], p["head_time_delta"], L, hd)          # (L,H,2T) f32
    time_lr = time.reshape(L, R).astype(jnp.bfloat16)                        # (L, R)
    time_rl = jnp.transpose(time.reshape(L, R)).astype(jnp.bfloat16)         # (R, L)

    head_of_col = jnp.arange(cw, dtype=jnp.int32) // hd                      # (cw,)
    head_of_row = jnp.arange(g2t, dtype=jnp.int32) // two_t                  # (g2t,)
    smask = (head_of_row[:, None] == head_of_col[None, :]).astype(jnp.bfloat16)   # (g2t, cw)
    # 1/hd folded in here (exact in bf16: hd is a power of two in this model).
    qexpand = ((head_of_col[:, None] == head_of_col[None, :]).astype(jnp.float32)
               / hd).astype(jnp.bfloat16)                                    # (cw, cw)

    wq = p["Wq"].astype(jnp.bfloat16)
    wv = p["Wv"].astype(jnp.bfloat16)
    wo = p["Wo"].astype(jnp.bfloat16)
    gamma = p["ln_gamma"].reshape(1, D)
    beta = p["ln_beta"].reshape(1, D)

    single_buf = _supports_buffered_one()
    if single_buf:
        def inv_spec(shape):
            return pl.BlockSpec(shape, lambda b, c: (0, 0),
                                pipeline_mode=pl.Buffered(1))
    else:
        def inv_spec(shape):
            return pl.BlockSpec(shape, lambda b, c: (0, 0))

    flops = B * (3 * 2 * L * D * D            # Q, V, O projections (over all chunks)
                 + C * 2 * 2 * L * g2t * cw   # S and raw contractions
                 + C * 2 * L * cw * cw)       # per-head sum/broadcast matmul
    bytes_accessed = (B * 2 * L * D * 4 + 3 * D * D * 2 + 2 * L * R * 2
                      + (g2t * cw + cw * cw) * 2 + 2 * D * 4)
    cost = pl.CostEstimate(flops=int(flops), transcendentals=int(B * L * D),
                           bytes_accessed=int(bytes_accessed))

    return pl.pallas_call(
        _attn_chunk_kernel,
        out_shape=jax.ShapeDtypeStruct((B, L, D), jnp.float32),
        grid_spec=pltpu.PrefetchScalarGridSpec(
            num_scalar_prefetch=0,
            grid=(B, C),
            in_specs=[
                pl.BlockSpec((1, L, D), lambda b, c: (b, 0, 0)),     # x (resident across c)
                pl.BlockSpec((D, cw), lambda b, c: (0, c)),          # Wq chunk columns
                pl.BlockSpec((D, cw), lambda b, c: (0, c)),          # Wv chunk columns
                pl.BlockSpec((cw, D), lambda b, c: (c, 0)),          # Wo chunk rows
                pl.BlockSpec((L, g2t), lambda b, c: (0, c)),         # time (L, R) chunk
                pl.BlockSpec((g2t, L), lambda b, c: (c, 0)),         # time (R, L) chunk
                inv_spec((g2t, cw)),                                 # block-diag head mask
                inv_spec((cw, cw)),                                  # per-head sum + bcast (/hd)
                inv_spec((1, D)),                                    # LN gamma
                inv_spec((1, D)),                                    # LN beta
            ],
            out_specs=pl.BlockSpec((1, L, D), lambda b, c: (b, 0, 0)),
            scratch_shapes=[pltpu.VMEM((L, D), jnp.float32)],
        ),
        compiler_params=pltpu.CompilerParams(
            dimension_semantics=("parallel", "arbitrary"),
            vmem_limit_bytes=_vmem_limit_bytes(L, D, cw, g2t, single_buf),
        ),
        cost_estimate=cost,
    )(x, wq, wv, wo, time_lr, time_rl, smask, qexpand, gamma, beta)


def absolute_bert_forward(params, input_ids, attention_mask):
    # NOTE: in the reference module attention_mask only multiplies `k`, which is
    # dead code (never consumed downstream), so it cannot affect the output.
    del attention_mask
    x = jnp.take(params["embedding"], input_ids, axis=0)            # (B, L, D)
    for layer_params in params["layers"]:
        x = absolute_attention_layer(x, layer_params)                # includes residual
    return x


# --------------------------- deterministic init ----------------------------- #

def init_params(key, vocab_size, dim, log_granularity, time_dim=TIME_DIM):
    n_layers = len(log_granularity)
    keys = jax.random.split(key, n_layers + 1)
    std = math.sqrt(2.0 / (vocab_size + dim))                        # xavier_normal_
    embedding = std * jax.random.normal(keys[0], (vocab_size, dim), dtype=jnp.float32)

    def u(k, shape, lo, hi):
        return jax.random.uniform(k, shape, jnp.float32, lo, hi)

    layers = []
    for i, gran in enumerate(log_granularity):
        hd = 2 ** gran
        H = dim // hd
        lk = jax.random.split(keys[i + 1], 5)
        bound = 1.0 / math.sqrt(dim)
        layers.append({
            "num_heads": H,
            "hidden_dim": hd,
            "Wq": u(lk[0], (dim, dim), -bound, bound),
            # K projection is dead code in the reference forward -> not materialized.
            "Wv": u(lk[1], (dim, dim), -bound, bound),
            "Wo": u(lk[2], (dim, dim), -bound, bound),
            "time_angle": u(lk[3], (H, time_dim), 0.0, 1.0),
            "head_time_delta": u(lk[4], (H,), 0.0, 1.0),
            "ln_gamma": jnp.ones((dim,), jnp.float32),
            "ln_beta": jnp.zeros((dim,), jnp.float32),
        })
    return {"embedding": embedding, "layers": layers}


# ------------------------- pure-JAX reference check ------------------------- #

def _reference_forward(params, input_ids):
    """f32 reference matching the PyTorch module (eval mode)."""
    x = jnp.take(params["embedding"], input_ids, axis=0)
    B, L, D = x.shape
    for p in params["layers"]:
        H, hd = p["num_heads"], p["hidden_dim"]
        q = jax.nn.sigmoid(x @ p["Wq"]).reshape(B, L, H, hd) / hd
        pos = jnp.arange(L, dtype=jnp.float32)
        ta = (pos[:, None, None] + p["head_time_delta"][None, :, None]) * p["time_angle"][None]
        c, s = jnp.cos(ta), jnp.sin(ta)
        time = jnp.concatenate([c + s, c - s], axis=-1) / math.sqrt(hd)   # (L, H, 2T)
        qq = q.sum(-1)[..., None] * time[None]                            # (B, L, H, 2T)
        att = jnp.einsum("blhd,thd->blth", qq, time)
        v = (x @ p["Wv"]).reshape(B, L, H, hd)
        comb = jnp.einsum("blth,bthd->blhd", att, v).reshape(B, L, D)
        o = comb @ p["Wo"]
        mean = o.mean(-1, keepdims=True)
        var = ((o - mean) ** 2).mean(-1, keepdims=True)
        ln = (o - mean) / jnp.sqrt(var + LN_EPS) * p["ln_gamma"] + p["ln_beta"]
        x = x + ln
    return x


if __name__ == "__main__":
    # Two small configs: the first exercises the dense single-chunk (C == 1)
    # path, the second exercises the multi-head-chunk grid (C == 2).
    test_cases = [
        # (vocab, dim, log_granularity, B, L)
        (50, 32, [1, 2], 2, 8),
        (64, 256, [5, 6], 2, 8),
    ]
    for idx, (vocab_size, dim, log_granularity, B, L) in enumerate(test_cases):
        root = jax.random.PRNGKey(0)
        pkey, ikey = jax.random.split(root)
        params = init_params(pkey, vocab_size, dim, log_granularity)
        input_ids = jax.random.randint(ikey, (B, L), 0, vocab_size, dtype=jnp.int32)
        attention_mask = jnp.ones((B, L), dtype=jnp.float32)

        out = absolute_bert_forward(params, input_ids, attention_mask)
        out = jax.block_until_ready(out)

        ref = _reference_forward(params, input_ids)
        assert out.shape == (B, L, dim)
        assert out.dtype == jnp.float32
        # Tolerance accounts for bf16 matmul operands (f32 accumulation) in the
        # kernel vs. the pure-f32 reference.
        max_err = float(jnp.max(jnp.abs(out - ref)))
        assert jnp.allclose(out, ref, atol=7.5e-2, rtol=5e-2), (idx, max_err)
    print("KERNEL_OK")
</pallas_src>

<mosaic_0001>
module attributes {stable_mosaic.version = 11 : i64} {
  func.func @_probe_kernel(%arg0: i32, %arg1: memref<8x128xf32, #tpu.memory_space<vmem>>, %arg2: memref<8x128xf32, #tpu.memory_space<vmem>>) attributes {dimension_semantics = [#tpu.dimension_semantics<arbitrary>], iteration_bounds = array<i64: 2>, scalar_prefetch = 0 : i64, scratch_operands = 0 : i64, tpu.core_type = #tpu.core_type<tc>, window_params = [{pipeline_mode = #tpu.pipeline_mode<synchronous>, transform_indices = @transform_0, window_bounds = array<i64: 8, 128>}, {pipeline_mode = #tpu.pipeline_mode<synchronous>, transform_indices = @transform_1, window_bounds = array<i64: 8, 128>}]} {
    %c0 = arith.constant 0 : index
    %c0_0 = arith.constant 0 : index
    %0 = vector.load %arg1[%c0, %c0_0] : memref<8x128xf32, #tpu.memory_space<vmem>>, vector<8x128xf32>
    %cst = arith.constant 1.000000e+00 : f32
    %1 = vector.broadcast %cst : f32 to vector<8x128xf32>
    %2 = arith.addf %0, %1 : vector<8x128xf32>
    %c0_1 = arith.constant 0 : index
    %c0_2 = arith.constant 0 : index
    %3 = vector.load %arg2[%c0_1, %c0_2] : memref<8x128xf32, #tpu.memory_space<vmem>>, vector<8x128xf32>
    tpu.vector_store %arg2[%c0_1, %c0_2], %2 {strides = array<i32>} : memref<8x128xf32, #tpu.memory_space<vmem>>, vector<8x128xf32>,
    return
  }
  func.func @transform_0(%arg0: i32) -> (i32, i32) {
    %c0_i32 = arith.constant 0 : i32
    %c0_i32_0 = arith.constant 0 : i32
    %c0_i32_1 = arith.constant 0 : i32
    return %c0_i32, %c0_i32_0 : i32, i32
  }
  func.func @transform_1(%arg0: i32) -> (i32, i32) {
    %c0_i32 = arith.constant 0 : i32
    %c0_i32_0 = arith.constant 0 : i32
    %c0_i32_1 = arith.constant 0 : i32
    return %c0_i32, %c0_i32_0 : i32, i32
  }
}

module attributes {stable_mosaic.version = 11 : i64} {
  func.func @_attn_chunk_kernel(%arg0: i32, %arg1: i32, %arg2: memref<1x8x32xf32, #tpu.memory_space<vmem>>, %arg3: memref<32x32xbf16, #tpu.memory_space<vmem>>, %arg4: memref<32x32xbf16, #tpu.memory_space<vmem>>, %arg5: memref<32x32xbf16, #tpu.memory_space<vmem>>, %arg6: memref<8x2048xbf16, #tpu.memory_space<vmem>>, %arg7: memref<2048x8xbf16, #tpu.memory_space<vmem>>, %arg8: memref<2048x32xbf16, #tpu.memory_space<vmem>>, %arg9: memref<32x32xbf16, #tpu.memory_space<vmem>>, %arg10: memref<1x32xf32, #tpu.memory_space<vmem>>, %arg11: memref<1x32xf32, #tpu.memory_space<vmem>>, %arg12: memref<1x8x32xf32, #tpu.memory_space<vmem>>, %arg13: memref<8x32xf32, #tpu.memory_space<vmem>>) attributes {dimension_semantics = [#tpu.dimension_semantics<parallel>, #tpu.dimension_semantics<arbitrary>], iteration_bounds = array<i64: 2, 1>, scalar_prefetch = 0 : i64, scratch_operands = 1 : i64, tpu.core_type = #tpu.core_type<tc>, window_params = [{transform_indices = @transform_0, window_bounds = array<i64: 1, 8, 32>}, {transform_indices = @transform_1, window_bounds = array<i64: 32, 32>}, {transform_indices = @transform_2, window_bounds = array<i64: 32, 32>}, {transform_indices = @transform_3, window_bounds = array<i64: 32, 32>}, {transform_indices = @transform_4, window_bounds = array<i64: 8, 2048>}, {transform_indices = @transform_5, window_bounds = array<i64: 2048, 8>}, {pipeline_mode = #tpu.pipeline_mode<synchronous>, transform_indices = @transform_6, window_bounds = array<i64: 2048, 32>}, {pipeline_mode = #tpu.pipeline_mode<synchronous>, transform_indices = @transform_7, window_bounds = array<i64: 32, 32>}, {pipeline_mode = #tpu.pipeline_mode<synchronous>, transform_indices = @transform_8, window_bounds = array<i64: 1, 32>}, {pipeline_mode = #tpu.pipeline_mode<synchronous>, transform_indices = @transform_9, window_bounds = array<i64: 1, 32>}, {transform_indices = @transform_10, window_bounds = array<i64: 1, 8, 32>}]} {
    %c0_i32 = arith.constant 0 : i32
    %0 = arith.cmpi eq, %arg1, %c0_i32 : i32
    %1 = arith.extui %0 : i1 to i32
    %c0_i32_0 = arith.constant 0 : i32
    %2 = arith.cmpi ne, %1, %c0_i32_0 : i32
    scf.if %2 {
      %cst_29 = arith.constant 0.000000e+00 : f32
      %36 = vector.broadcast %cst_29 : f32 to vector<8x32xf32>
      %c0_30 = arith.constant 0 : index
      %c0_31 = arith.constant 0 : index
      %37 = vector.load %arg13[%c0_30, %c0_31] : memref<8x32xf32, #tpu.memory_space<vmem>>, vector<8x32xf32>
      tpu.vector_store %arg13[%c0_30, %c0_31], %36 {strides = array<i32>} : memref<8x32xf32, #tpu.memory_space<vmem>>, vector<8x32xf32>,
    } else {
    }
    %c0 = arith.constant 0 : index
    %c0_1 = arith.constant 0 : index
    %c0_2 = arith.constant 0 : index
    %3 = vector.load %arg2[%c0, %c0_1, %c0_2] : memref<1x8x32xf32, #tpu.memory_space<vmem>>, vector<1x8x32xf32>
    %4 = vector.shape_cast %3 : vector<1x8x32xf32> to vector<8x32xf32>
    %5 = arith.truncf %4 : vector<8x32xf32> to vector<8x32xbf16>
    %c0_3 = arith.constant 0 : index
    %c0_4 = arith.constant 0 : index
    %6 = vector.load %arg3[%c0_3, %c0_4] : memref<32x32xbf16, #tpu.memory_space<vmem>>, vector<32x32xbf16>
    %cst = arith.constant dense<0.000000e+00> : vector<8x32xf32>
    %7 = tpu.matmul %5, %6, %cst {dimension_numbers = #tpu.dot_dimension_numbers<[1], [0], [0], [1], [0, 0, 1, 1], [], []>} : vector<8x32xbf16>, vector<32x32xbf16>, vector<8x32xf32> -> vector<8x32xf32>
    %8 = arith.negf %7 : vector<8x32xf32>
    %9 = math.exp %8 : vector<8x32xf32>
    %cst_5 = arith.constant 1.000000e+00 : f32
    %10 = vector.broadcast %cst_5 : f32 to vector<8x32xf32>
    %11 = arith.addf %10, %9 : vector<8x32xf32>
    %12 = arith.divf %10, %11 : vector<8x32xf32>
    %13 = arith.truncf %12 : vector<8x32xf32> to vector<8x32xbf16>
    %c0_6 = arith.constant 0 : index
    %c0_7 = arith.constant 0 : index
    %14 = vector.load %arg9[%c0_6, %c0_7] : memref<32x32xbf16, #tpu.memory_space<vmem>>, vector<32x32xbf16>
    %cst_8 = arith.constant dense<0.000000e+00> : vector<8x32xf32>
    %15 = tpu.matmul %13, %14, %cst_8 {dimension_numbers = #tpu.dot_dimension_numbers<[1], [0], [0], [1], [0, 0, 1, 1], [], []>} : vector<8x32xbf16>, vector<32x32xbf16>, vector<8x32xf32> -> vector<8x32xf32>
    %c0_9 = arith.constant 0 : index
    %c0_10 = arith.constant 0 : index
    %16 = vector.load %arg4[%c0_9, %c0_10] : memref<32x32xbf16, #tpu.memory_space<vmem>>, vector<32x32xbf16>
    %cst_11 = arith.constant dense<0.000000e+00> : vector<8x32xf32>
    %17 = tpu.matmul %5, %16, %cst_11 {dimension_numbers = #tpu.dot_dimension_numbers<[1], [0], [0], [1], [0, 0, 1, 1], [], []>} : vector<8x32xbf16>, vector<32x32xbf16>, vector<8x32xf32> -> vector<8x32xf32>
    %c0_12 = arith.constant 0 : index
    %c0_13 = arith.constant 0 : index
    %18 = vector.load %arg7[%c0_12, %c0_13] : memref<2048x8xbf16, #tpu.memory_space<vmem>>, vector<2048x8xbf16>
    %19 = arith.truncf %17 : vector<8x32xf32> to vector<8x32xbf16>
    %cst_14 = arith.constant dense<0.000000e+00> : vector<2048x32xf32>
    %20 = tpu.matmul %18, %19, %cst_14 {dimension_numbers = #tpu.dot_dimension_numbers<[1], [0], [0], [1], [0, 0, 1, 1], [], []>} : vector<2048x8xbf16>, vector<8x32xbf16>, vector<2048x32xf32> -> vector<2048x32xf32>
    %21 = arith.truncf %20 : vector<2048x32xf32> to vector<2048x32xbf16>
    %c0_15 = arith.constant 0 : index
    %c0_16 = arith.constant 0 : index
    %22 = vector.load %arg8[%c0_15, %c0_16] : memref<2048x32xbf16, #tpu.memory_space<vmem>>, vector<2048x32xbf16>
    %23 = arith.mulf %21, %22 : vector<2048x32xbf16>
    %c0_17 = arith.constant 0 : index
    %c0_18 = arith.constant 0 : index
    %24 = vector.load %arg6[%c0_17, %c0_18] : memref<8x2048xbf16, #tpu.memory_space<vmem>>, vector<8x2048xbf16>
    %cst_19 = arith.constant dense<0.000000e+00> : vector<8x32xf32>
    %25 = tpu.matmul %24, %23, %cst_19 {dimension_numbers = #tpu.dot_dimension_numbers<[1], [0], [0], [1], [0, 0, 1, 1], [], []>} : vector<8x2048xbf16>, vector<2048x32xbf16>, vector<8x32xf32> -> vector<8x32xf32>
    %26 = arith.mulf %15, %25 : vector<8x32xf32>
    %27 = arith.truncf %26 : vector<8x32xf32> to vector<8x32xbf16>
    %c0_20 = arith.constant 0 : index
    %c0_21 = arith.constant 0 : index
    %28 = vector.load %arg13[%c0_20, %c0_21] : memref<8x32xf32, #tpu.memory_space<vmem>>, vector<8x32xf32>
    %c0_22 = arith.constant 0 : index
    %c0_23 = arith.constant 0 : index
    %29 = vector.load %arg5[%c0_22, %c0_23] : memref<32x32xbf16, #tpu.memory_space<vmem>>, vector<32x32xbf16>
    %cst_24 = arith.constant dense<0.000000e+00> : vector<8x32xf32>
    %30 = tpu.matmul %27, %29, %cst_24 {dimension_numbers = #tpu.dot_dimension_numbers<[1], [0], [0], [1], [0, 0, 1, 1], [], []>} : vector<8x32xbf16>, vector<32x32xbf16>, vector<8x32xf32> -> vector<8x32xf32>
    %31 = arith.addf %28, %30 : vector<8x32xf32>
    %c0_25 = arith.constant 0 : index
    %c0_26 = arith.constant 0 : index
    %32 = vector.load %arg13[%c0_25, %c0_26] : memref<8x32xf32, #tpu.memory_space<vmem>>, vector<8x32xf32>
    tpu.vector_store %arg13[%c0_25, %c0_26], %31 {strides = array<i32>} : memref<8x32xf32, #tpu.memory_space<vmem>>, vector<8x32xf32>,
    %c0_i32_27 = arith.constant 0 : i32
    %33 = arith.cmpi eq, %arg1, %c0_i32_27 : i32
    %34 = arith.extui %33 : i1 to i32
    %c0_i32_28 = arith.constant 0 : i32
    %35 = arith.cmpi ne, %34, %c0_i32_28 : i32
    scf.if %35 {
      %c0_29 = arith.constant 0 : index
      %c0_30 = arith.constant 0 : index
      %36 = vector.load %arg13[%c0_29, %c0_30] : memref<8x32xf32, #tpu.memory_space<vmem>>, vector<8x32xf32>
      %cst_31 = arith.constant dense<0.000000e+00> : vector<8xf32>
      %37 = vector.multi_reduction <add>, %36, %cst_31 [1] : vector<8x32xf32> to vector<8xf32>
      %38 = vector.shape_cast %37 : vector<8xf32> to vector<8x1xf32>
      %cst_32 = arith.constant 3.200000e+01 : f32
      %39 = vector.broadcast %cst_32 : f32 to vector<8x1xf32>
      %40 = arith.divf %38, %39 : vector<8x1xf32>
      %41 = vector.broadcast %40 : vector<8x1xf32> to vector<8x32xf32>
      %42 = arith.subf %36, %41 : vector<8x32xf32>
      %43 = arith.mulf %42, %42 : vector<8x32xf32>
      %cst_33 = arith.constant dense<0.000000e+00> : vector<8xf32>
      %44 = vector.multi_reduction <add>, %43, %cst_33 [1] : vector<8x32xf32> to vector<8xf32>
      %45 = vector.shape_cast %44 : vector<8xf32> to vector<8x1xf32>
      %cst_34 = arith.constant 3.200000e+01 : f32
      %46 = vector.broadcast %cst_34 : f32 to vector<8x1xf32>
      %47 = arith.divf %45, %46 : vector<8x1xf32>
      %48 = vector.broadcast %40 : vector<8x1xf32> to vector<8x32xf32>
      %49 = arith.subf %36, %48 : vector<8x32xf32>
      %cst_35 = arith.constant 9.99999974E-6 : f32
      %50 = vector.broadcast %cst_35 : f32 to vector<8x1xf32>
      %51 = arith.addf %47, %50 : vector<8x1xf32>
      %52 = math.rsqrt %51 : vector<8x1xf32>
      %53 = vector.broadcast %52 : vector<8x1xf32> to vector<8x32xf32>
      %54 = arith.mulf %49, %53 : vector<8x32xf32>
      %c0_36 = arith.constant 0 : index
      %c0_37 = arith.constant 0 : index
      %55 = vector.load %arg10[%c0_36, %c0_37] : memref<1x32xf32, #tpu.memory_space<vmem>>, vector<1x32xf32>
      %56 = vector.broadcast %55 : vector<1x32xf32> to vector<8x32xf32>
      %57 = arith.mulf %54, %56 : vector<8x32xf32>
      %c0_38 = arith.constant 0 : index
      %c0_39 = arith.constant 0 : index
      %58 = vector.load %arg11[%c0_38, %c0_39] : memref<1x32xf32, #tpu.memory_space<vmem>>, vector<1x32xf32>
      %59 = vector.broadcast %58 : vector<1x32xf32> to vector<8x32xf32>
      %60 = arith.addf %57, %59 : vector<8x32xf32>
      %c0_40 = arith.constant 0 : index
      %c0_41 = arith.constant 0 : index
      %c0_42 = arith.constant 0 : index
      %61 = vector.load %arg2[%c0_40, %c0_41, %c0_42] : memref<1x8x32xf32, #tpu.memory_space<vmem>>, vector<1x8x32xf32>
      %62 = vector.shape_cast %61 : vector<1x8x32xf32> to vector<8x32xf32>
      %63 = arith.addf %62, %60 : vector<8x32xf32>
      %c0_43 = arith.constant 0 : index
      %c0_44 = arith.constant 0 : index
      %c0_45 = arith.constant 0 : index
      %64 = vector.load %arg12[%c0_43, %c0_44, %c0_45] : memref<1x8x32xf32, #tpu.memory_space<vmem>>, vector<1x8x32xf32>
      %65 = vector.shape_cast %64 : vector<1x8x32xf32> to vector<8x32xf32>
      %66 = vector.shape_cast %63 : vector<8x32xf32> to vector<1x8x32xf32>
      tpu.vector_store %arg12[%c0_43, %c0_44, %c0_45], %66 {strides = array<i32>} : memref<1x8x32xf32, #tpu.memory_space<vmem>>, vector<1x8x32xf32>,
    } else {
    }
    return
  }
  func.func @transform_0(%arg0: i32, %arg1: i32) -> (i32, i32, i32) {
    %c0_i32 = arith.constant 0 : i32
    %c0_i32_0 = arith.constant 0 : i32
    %c0_i32_1 = arith.constant 0 : i32
    return %arg0, %c0_i32, %c0_i32_0 : i32, i32, i32
  }
  func.func @transform_1(%arg0: i32, %arg1: i32) -> (i32, i32) {
    %c0_i32 = arith.constant 0 : i32
    %c0_i32_0 = arith.constant 0 : i32
    return %c0_i32, %arg1 : i32, i32
  }
  func.func @transform_2(%arg0: i32, %arg1: i32) -> (i32, i32) {
    %c0_i32 = arith.constant 0 : i32
    %c0_i32_0 = arith.constant 0 : i32
    return %c0_i32, %arg1 : i32, i32
  }
  func.func @transform_3(%arg0: i32, %arg1: i32) -> (i32, i32) {
    %c0_i32 = arith.constant 0 : i32
    %c0_i32_0 = arith.constant 0 : i32
    return %arg1, %c0_i32 : i32, i32
  }
  func.func @transform_4(%arg0: i32, %arg1: i32) -> (i32, i32) {
    %c0_i32 = arith.constant 0 : i32
    %c0_i32_0 = arith.constant 0 : i32
    return %c0_i32, %arg1 : i32, i32
  }
  func.func @transform_5(%arg0: i32, %arg1: i32) -> (i32, i32) {
    %c0_i32 = arith.constant 0 : i32
    %c0_i32_0 = arith.constant 0 : i32
    return %arg1, %c0_i32 : i32, i32
  }
  func.func @transform_6(%arg0: i32, %arg1: i32) -> (i32, i32) {
    %c0_i32 = arith.constant 0 : i32
    %c0_i32_0 = arith.constant 0 : i32
    %c0_i32_1 = arith.constant 0 : i32
    return %c0_i32, %c0_i32_0 : i32, i32
  }
  func.func @transform_7(%arg0: i32, %arg1: i32) -> (i32, i32) {
    %c0_i32 = arith.constant 0 : i32
    %c0_i32_0 = arith.constant 0 : i32
    %c0_i32_1 = arith.constant 0 : i32
    return %c0_i32, %c0_i32_0 : i32, i32
  }
  func.func @transform_8(%arg0: i32, %arg1: i32) -> (i32, i32) {
    %c0_i32 = arith.constant 0 : i32
    %c0_i32_0 = arith.constant 0 : i32
    %c0_i32_1 = arith.constant 0 : i32
    return %c0_i32, %c0_i32_0 : i32, i32
  }
  func.func @transform_9(%arg0: i32, %arg1: i32) -> (i32, i32) {
    %c0_i32 = arith.constant 0 : i32
    %c0_i32_0 = arith.constant 0 : i32
    %c0_i32_1 = arith.constant 0 : i32
    return %c0_i32, %c0_i32_0 : i32, i32
  }
  func.func @transform_10(%arg0: i32, %arg1: i32) -> (i32, i32, i32) {
    %c0_i32 = arith.constant 0 : i32
    %c0_i32_0 = arith.constant 0 : i32
    %c0_i32_1 = arith.constant 0 : i32
    return %arg0, %c0_i32, %c0_i32_0 : i32, i32, i32
  }
}

</mosaic_0001>

<bundles_post_ra>
// kernel: tpu_custom_call.1
= control target key start
LH: loop header
LB: loop body
LE: loop exit
PB: predicated region body
PF: predicated region fallthrough
CT: control target
= control target key end

     0   :  { %6 = vsyncpa [#allocation3], 0  ;;  %s287_s0 = inlined_call_operand.hbm [shape: f32[8,128], index: 0, kind: input, shape index: {}]   ;;  %s288_s1 = inlined_call_operand.hbm [shape: f32[8,128], index: 1, kind: output, shape index: {}]  }
   0x1   :  { %7 = vsyncpa [#allocation4], 0  ;;  %s270_s6 = smov 0  }
   0x2 LB: > { %s149_s7 = sadd.s32 4294967295, %s256_s6   ;;  %p150_p0 = scmp.ge.s32.totalorder %s256_s6, 1  ;;  %s256_s6 = sphi %s270_s6, %s13_s6  }
   0x3   : > { %p60_p1 = scmp.lt.s32.totalorder %s256_s6, 3  ;;  %s72_s10 = sshll.u32 %s287_s0, 4  ;;  %s73_s10 = int_to_ptr.hbm [resolvable:$true] %s72_s10 }
   0x4   : > { %p170_p3 = scmp.eq.s32.totalorder %s149_s7, 0  ;;  %s258_s11 = smov [#allocation2]  }
   0x5   : > { %p61_p2 = pnand %p150_p0, %p60_p1  ;;  %s74_s12 = sshll.u32 %s258_s11, 4  ;;  %s75_s12 = int_to_ptr.vmem [resolvable:$true] %s74_s12 }
   0x7   : > { %p166_p4 = pneg %p61_p2  ;;  %87 = sbr.rel (%p61_p2) target bundleno = 20 (0x14), region = 24 }
   0x9   : > { %p167_p5 = pnand %p170_p3, %p166_p4 }
   0xb   : > { %169 = dma.hbm_to_vmem [thread:$0]  (!%p167_p5), %s73_s10, 128, %s75_s12, [#allocation3]  }
   0xc   : > { %247 = dma.done.wait (%p170_p3), [#allocation3], 128  }
   0xd   : > { %249 = vsyncadd (%p170_p3), [#allocation3], 4294967168  ;;  %s259_s13 = smov [#allocation5]   ;;  %s109_s17 = sshll.u32 %s288_s1, 4  ;;  %v98_v0 = vld [vmem:[#allocation2] sm:$0xff]  ;;  %s110_s17 = int_to_ptr.hbm [resolvable:$true] %s109_s17 }
   0xe   : > { %s107_s14 = sshll.u32 %s259_s13, 4  ;;  %p172_p6 = scmp.eq.s32.totalorder %s149_s7, 1  ;;  %v99_v1 = vadd.f32 1.0, %v98_v0  ;;  %s108_s14 = int_to_ptr.vmem [resolvable:$true] %s107_s14 }
  0x10   : > { %100 = vst [vmem:[#allocation5] sm:$0xff] %v99_v1 }
  0x11   : > { %163 = dma.vmem_to_hbm [thread:$0]  (%p172_p6), %s108_s14, 128, %s110_s17, [#allocation4]  }
  0x12   : > { %251 = dma.done.wait (%p172_p6), [#allocation4], 128  }
  0x13   : > { %253 = vsyncadd (%p172_p6), [#allocation4], 4294967168 }
  0x14 PF: > { %s13_s6 = sadd.s32 1, %s256_s6  }
  0x15   : > { %p10_p7 = scmp.ge.s32.totalorder %s13_s6, 4  }
  0x17   :  { %12 = sbr.rel (!%p10_p7) target bundleno = 2 (0x2), region = 53 }
  0x1c   :  { %123 = vsyncpa [#allocation3], 1 }
  0x1d   :  { %125 = vsyncpa [#allocation3 + $0x1], 1 }
  0x1e   :  { %126 = vsyncpa [#allocation4], 1 }
  0x1f   :  { %128 = vsyncpa [#allocation4 + $0x1], 1 }

// kernel: tpu_custom_call.1
= control target key start
LH: loop header
LB: loop body
LE: loop exit
PB: predicated region body
PF: predicated region fallthrough
CT: control target
= control target key end

     0   :  { %s8698_s0 = inlined_call_operand.vmem [shape: f32[2,8,32], index: 0, kind: input, shape index: {}]   ;;  %s8699_s1 = inlined_call_operand.vmem [shape: bf16[32,32], index: 1, kind: input, shape index: {}]   ;;  %s8700_s2 = inlined_call_operand.vmem [shape: bf16[32,32], index: 2, kind: input, shape index: {}]   ;;  %s8701_s3 = inlined_call_operand.vmem [shape: bf16[32,32], index: 3, kind: input, shape index: {}]   ;;  %s8702_s4 = inlined_call_operand.vmem [shape: bf16[8,2048], index: 4, kind: input, shape index: {}]   ;;  %s8703_s5 = inlined_call_operand.vmem [shape: bf16[2048,8], index: 5, kind: input, shape index: {}]   ;;  %s8704_s6 = inlined_call_operand.vmem [shape: bf16[2048,32], index: 6, kind: input, shape index: {}]   ;;  %s8705_s7 = inlined_call_operand.vmem [shape: bf16[32,32], index: 7, kind: input, shape index: {}]   ;;  %s8706_s8 = inlined_call_operand.vmem [shape: f32[1,32], index: 8, kind: input, shape index: {}]   ;;  %s8707_s9 = inlined_call_operand.vmem [shape: f32[1,32], index: 9, kind: input, shape index: {}]   ;;  %s8708_s10 = inlined_call_operand.hbm [shape: f32[2,8,32], index: 10, kind: output, shape index: {}]  }
   0x1   :  { %8805 = sst [smem:[#allocation87_spill]] %s8698_s0 }
   0x2   :  { %8806 = sst [smem:[#allocation88_spill]] %s8699_s1 }
   0x3   :  { %8807 = sst [smem:[#allocation89_spill]] %s8700_s2 }
   0x4   :  { %15 = vsyncpa [#allocation4], 0 }
   0x5   :  { %17 = vsyncpa [#allocation4 + $0x1], 0  ;;  %s6122_s13 = smov 0   ;;  %s6124_s14 = smov 0  }
   0x6   :  { %s6126_s15 = smov 0   ;;  %s6128_s16 = smov 0  }
   0x7   :  { %s6130_s17 = smov 0   ;;  %s6132_s18 = smov 0  }
   0x8 LB: > { %s4446_s19 = sadd.s32 4294967295, %s6063_s18   ;;  %s4447_s20 = sadd.s32 4294967294, %s6063_s18   ;;  %s6063_s18 = sphi %s6132_s18, %s23_s18   ;;  %s6059_s17 = sphi %s6130_s17, %s9139_s17   ;;  %s6055_s16 = sphi %s6128_s16, %s9138_s16   ;;  %s6051_s15 = sphi %s6126_s15, %s9137_s15   ;;  %s6047_s14 = sphi %s6124_s14, %s9136_s14   ;;  %s6043_s13 = sphi %s6122_s13, %s9135_s13  }
   0x9   : > { %s35_s21 = sadd.s32 1, %s6059_s17  ;;  %s282_s22 = sadd.s32 1, %s6051_s15 }
   0xa   : > { %p37_p0 = scmp.ge.s32.totalorder %s35_s21, 2  ;;  %p292_p1 = scmp.ne.s32.totalorder %s6051_s15, %s6047_s14 }
   0xb   : > { %p293_p2 = scmp.eq.s32.totalorder %s4446_s19, 1  ;;  %p298_p3 = scmp.ne.s32.totalorder %s6047_s14, %s6043_s13 }
   0xc   : > { %s9141_s21 = smov (%p37_p0, %s35_s21), 0  ;;  %p299_p5 = scmp.eq.s32.totalorder %s4447_s20, 1 }
   0xd   : > { %p6162_p4 = por %p293_p2, %p292_p1  ;;  %s279_s24 = ssub.s32 %s6059_s17, %s9141_s21 }
   0xe   : > { %p4455_p6 = scmp.ge.s32.totalorder %s6063_s18, 1  ;;  %p280_p7 = scmp.eq.s32.totalorder %s279_s24, 0 }
   0xf   : > { %p6169_p8 = por %p299_p5, %p298_p3  ;;  %p377_p9 = scmp.lt.s32.totalorder %s6063_s18, 3 }
  0x10   : > { %s6175_s26 = scalar_select %p280_p7, %s6051_s15, %s282_s22  }
  0x11   : > { %p378_p10 = pnand %p4455_p6, %p377_p9 }
  0x13   : > { %381 = sbr.rel (%p378_p10) target bundleno = 1705 (0x6a9), region = 60 }
  0x18   : > { %s8810_s1 = sld [smem:[#allocation88_spill]]  ;;  %p437_p11 = scmp.lt.s32.totalorder %s6055_s16, 1  ;;  %vm472_vm0 = vcmask 261120   ;;  %v5142_v4 = vld [vmem:[%s8705_s7 + $0x8] sm:$0xff]  ;;  %v5141_v5 = vld [vmem:[%s8705_s7] sm:$0xff]  ;;  %vm1872_vm5 = vcmask 1043456  }
  0x19   : > { %s8811_s0 = sld [smem:[#allocation87_spill]]  ;;  %v5145_v29 = vld [vmem:[%s8703_s5] sm:$0xff]  ;;  %v5171_v30 = vld [vmem:[%s8703_s5 + $0xd0] sm:$0xff]  ;;  %vm1487_vm6 = vcmask 64512   ;;  %v5232_v32 = vld [vmem:[%s8703_s5 + $0x2b8] sm:$0xff]  ;;  %s434_s24 = sand.u32 1, %s6047_s14  }
  0x1a   : > { %s438_s11 = scalar_select %p437_p11, %s6055_s16, 1  ;;  %v5201_v31 = vld [vmem:[%s8703_s5 + $0x1c0] sm:$0xff]  ;;  %v5146_v34 = vld [vmem:[%s8703_s5 + $0x8] sm:$0xff]  ;;  %v5172_v35 = vld [vmem:[%s8703_s5 + $0xd8] sm:$0xff] }
  0x1b   : > { %s8812_s2 = sld [smem:[#allocation89_spill]]  ;;  %v5202_v36 = vld [vmem:[%s8703_s5 + $0x1c8] sm:$0xff]  ;;  %v5233_v37 = vld [vmem:[%s8703_s5 + $0x2c0] sm:$0xff]  ;;  %v5147_v38 = vld [vmem:[%s8703_s5 + $0x10] sm:$0xff]  ;;  %s4456_s27 = sshll.u32 %s434_s24, 3 }
  0x1c   : > { %s4457_s12 = sshll.u32 %s438_s11, 3  ;;  %v5173_v39 = vld [vmem:[%s8703_s5 + $0xe0] sm:$0xff]  ;;  %v5203_v40 = vld [vmem:[%s8703_s5 + $0x1d0] sm:$0xff]  ;;  %v5234_v41 = vld [vmem:[%s8703_s5 + $0x2c8] sm:$0xff]  ;;  %s5136_s28 = sshll.u32 %s6055_s16, 3 }
  0x1d   : > { %v5148_v42 = vld [vmem:[%s8703_s5 + $0x18] sm:$0xff]  ;;  %v5174_v43 = vld [vmem:[%s8703_s5 + $0xe8] sm:$0xff]  ;;  %v5235_v45 = vld [vmem:[%s8703_s5 + $0x2d0] sm:$0xff]  ;;  %s4289_s29 = scalar_lea.sflag [#allocation4], %s434_s24 }
  0x1e   : > { %v5140_v0 = vld [vmem:[%s8810_s1 + $0x8] sm:$0xff]  ;;  %v5139_v1 = vld [vmem:[%s8810_s1] sm:$0xff]  ;;  %v5204_v44 = vld [vmem:[%s8703_s5 + $0x1d8] sm:$0xff]  ;;  %s436_s1 = scalar_lea.vmem [#allocation3], %s4456_s27  ;;  %s6005_s27 = scalar_lea.hbm %s8708_s10, 16 }
  0x1f   : > { %502 = vmatpush.bf16.msra.mxu0 %v5140_v0  ;;  %s6188_s22 = scalar_lea.vmem %s8811_s0, %s4457_s12  ;;  %v5149_v46 = vld [vmem:[%s8703_s5 + $0x20] sm:$0xff]  ;;  %v5175_v47 = vld [vmem:[%s8703_s5 + $0xf0] sm:$0xff]  ;;  %v5236_v49 = vld [vmem:[%s8703_s5 + $0x2d8] sm:$0xff]  ;;  %s4299_s0 = scalar_lea.hbm %s8708_s10, %s5136_s28 }
  0x20   : > { %v474_v2 = vld [vmem:[%s6188_s22] sm:$0xff]  ;;  %v5150_v50 = vld [vmem:[%s8703_s5 + $0x28] sm:$0xff]  ;;  %v5176_v51 = vld [vmem:[%s8703_s5 + $0xf8] sm:$0xff]  ;;  %s4303_s16 = sshll.u32 %s4299_s0, 4  ;;  %s4304_s16 = int_to_ptr.hbm [resolvable:$true] %s4303_s16 }
  0x21   : > { %v475_v3 = vpack.c.bf16 %v474_v2, %v474_v2  ;;  %v5144_v6 = vld [vmem:[%s8812_s2 + $0x8] sm:$0xff]  ;;  %v5143_v9 = vld [vmem:[%s8812_s2] sm:$0xff]  ;;  %v5151_v54 = vld [vmem:[%s8703_s5 + $0x30] sm:$0xff]  ;;  %s4301_s2 = sshll.u32 %s436_s1, 4  ;;  %s5999_s30 = sshra.s32 %s4304_s16, 4  ;;  %s4302_s2 = int_to_ptr.vmem [resolvable:$true] %s4301_s2  ;;  %s6000_s30 = int_to_ptr.hbm [resolvable:$true] %s5999_s30 }
  0x22   : > { %v5205_v48 = vld [vmem:[%s8703_s5 + $0x1e0] sm:$0xff]  ;;  %v5206_v52 = vld [vmem:[%s8703_s5 + $0x1e8] sm:$0xff]  ;;  %v5207_v56 = vld [vmem:[%s8703_s5 + $0x1f0] sm:$0xff]  ;;  %s6001_s11 = scalar_lea.hbm %s6000_s30, 8  ;;  %p6006_p1 = scmp.lt.s32.totalorder %s6000_s30, %s8708_s10 }
  0x23   : > { %503 = vmatpush.bf16.msra.mxu0 %v5139_v1  ;;  %v5237_v53 = vld [vmem:[%s8703_s5 + $0x2e0] sm:$0xff]  ;;  %v5238_v57 = vld [vmem:[%s8703_s5 + $0x2e8] sm:$0xff]  ;;  %v5152_v58 = vld [vmem:[%s8703_s5 + $0x38] sm:$0xff]  ;;  %p6002_p12 = scmp.ne.s32.totalorder %s6000_s30, %s6001_s11  ;;  %p6007_p2 = scmp.lt.s32.totalorder %s6005_s27, %s6001_s11 }
  0x24   : > { %v5177_v55 = vld [vmem:[%s8703_s5 + $0x100] sm:$0xff]  ;;  %v5178_v59 = vld [vmem:[%s8703_s5 + $0x108] sm:$0xff]  ;;  %v5208_v60 = vld [vmem:[%s8703_s5 + $0x1f8] sm:$0xff] }
  0x25   : > { %v5239_v61 = vld [vmem:[%s8703_s5 + $0x2f0] sm:$0xff]  ;;  %v5153_v62 = vld [vmem:[%s8703_s5 + $0x40] sm:$0xff]  ;;  %p6003_p13 = pnand %p6002_p12, %p6162_p4  ;;  %p6008_p3 = por %p6007_p2, %p6006_p1 }
  0x26   : > { %4466 = vmatmul.msk.bf16.vlgmr.msra.gmra.mxu0 %vm472_vm0, %v475_v3  ;;  %v5179_v63 = vld [vmem:[%s8703_s5 + $0x110] sm:$0xff]  ;;  %v5209_v2 = vld [vmem:[%s8703_s5 + $0x200] sm:$0xff] }
  0x27   : > { %554 = vmatpush.bf16.msrb.mxu0 %v5142_v4  ;;  %p6004_p0 = pneg %p6003_p13 }
  0x29   : > { %p6009_p5 = pnand %p6008_p3, %p6004_p0 }
  0x2b   : > { %555 = vmatpush.bf16.msrb.mxu0 %v5141_v5 }
  0x2f   : > { %583 = vmatpush.bf16.msra.mxu0 %v5144_v6 }
  0x33   : > { %584 = vmatpush.bf16.msra.mxu0 %v5143_v9  ;;  %v5873_v9 = vld [vmem:[%s8704_s6 + $0x2b8] sm:$0xff]  }
  0xa3   : > { %v505_v7 = vpop.f32.mrf.mxu0 }
  0xa4   : > { %v4467_v8 = vmul.f32 -1.442695, %v505_v7 }
  0xa6   : > { %5976 = vpow2.f32 %v4467_v8 }
  0xab   : > { %v507_v10 = vpop.f32.mrf.mxu0 }
  0xac   : > { %v5977_v11 = vpop.eup %5976 }
  0xad   : > { %v512_v12 = vadd.f32 1.0, %v5977_v11 }
  0xaf   : > { %5978 = vrcp.f32 %v512_v12  ;;  %v524_v16 = vand.u32 2147483648, %v512_v12  ;;  %v522_v18 = vand.u32 2147483647, %v512_v12  ;;  %vm518_vm2 = vweird.f32 %v512_v12 }
  0xb1   : > { %v525_v20 = vor.u32 1.1754944e-38, %v524_v16  ;;  %vm523_vm4 = vcmp.eq.f32.partialorder %v522_v18, 8.507059e+37 }
  0xb5   : > { %v5979_v13 = vpop.eup %5978 }
  0xb6   : > { %v514_v14 = vmul.f32 %v5979_v13, %v512_v12  ;;  %vm519_vm1 = vweird.f32 %v5979_v13  ;;  %v5154_v12 = vld [vmem:[%s8703_s5 + $0x48] sm:$0xff] }
  0xb7   : > { %vm520_vm3 = vmor %vm518_vm2, %vm519_vm1 }
  0xb8   : > { %v515_v15 = vsub.f32 1.0, %v514_v14  ;;  %v5625_v14 = vunpack.c.l.bf16 %v5873_v9 }
  0xba   : > { %v516_v17 = vmul.f32 %v5979_v13, %v515_v15 }
  0xbc   : > { %v517_v19 = vadd.f32 %v5979_v13, %v516_v17  ;;  %v5626_v17 = vunpack.c.h.bf16 %v5873_v9 }
  0xbe   : > { %v521_v21 = vsel %vm520_vm3, %v5979_v13, %v517_v19  ;;  %v5180_v13 = vld [vmem:[%s8703_s5 + $0x118] sm:$0xff] }
  0xbf   : > { %v526_v22 = vsel %vm523_vm4, %v525_v20, %v521_v21  ;;  %v5210_v20 = vld [vmem:[%s8703_s5 + $0x208] sm:$0xff]  ;;  %v5241_v21 = vld [vmem:[%s8703_s5 + $0x300] sm:$0xff] }
  0xc0   : > { %v528_v23 = vpack.c.bf16 %v526_v22, %v526_v22 }
  0xc2   : > { %4476 = vmatmul.msk.bf16.vlgmr.msrb.gmra.mxu0 %vm472_vm0, %v528_v23 }
  0xd2   : > { %4485 = vmatmul.msk.bf16.vlgmr.msra.gmra.mxu0 %vm472_vm0, %v475_v3  ;;  %v5240_v3 = vld [vmem:[%s8703_s5 + $0x2f8] sm:$0xff] }
 0x13f   : > { %v6206_v24 = vpop.f32.mrf.mxu0 }
 0x140   : > { %8813 = vst [vmem:[#allocation6_spill] sm:$0xff] %v6206_v24 }
 0x147   : > { %v559_v25 = vpop.f32.mrf.mxu0 }
 0x14f   : > { %v586_v26 = vpop.f32.mrf.mxu0 }
 0x150   : > { %v846_v27 = vpack.c.bf16 %v586_v26, %v586_v26 }
 0x152   : > { %v1874_v28 = vsel %vm1872_vm5, %v846_v27, 0 }
 0x153   : > { %1883 = vmatpush.bf16.msrb.mxu0 %v1874_v28  ;;  %5914 = vmatpush.bf16.msra.mxu1 %v1874_v28 }
 0x154   : > { %5915 = vmatpush.bf16.msra.mxu2 %v1874_v28  ;;  %5916 = vmatpush.bf16.msra.mxu3 %v1874_v28 }
 0x156   : > { %4998 = vmatmul.msk.bf16.vlgmr.msrb.gmra.mxu0 %vm1487_vm6, %v5145_v29  ;;  %5024 = vmatmul.msk.bf16.vlgmr.msra.gmra.mxu1 %vm1487_vm6, %v5171_v30 }
 0x157   : > { %5054 = vmatmul.msk.bf16.vlgmr.msra.gmra.mxu2 %vm1487_vm6, %v5201_v31  ;;  %5085 = vmatmul.msk.bf16.vlgmr.msra.gmra.mxu3 %vm1487_vm6, %v5232_v32  ;;  %v588_v33 = vpop.f32.mrf.mxu0  ;;  %v5874_v32 = vld [vmem:[%s8704_s6 + $0x2c0] sm:$0xff]  }
 0x166   : > { %4999 = vmatmul.msk.bf16.gmra.mxu0 %vm1487_vm6, %v5146_v34  ;;  %5025 = vmatmul.msk.bf16.gmra.mxu1 %vm1487_vm6, %v5172_v35  ;;  %v5155_v35 = vld [vmem:[%s8703_s5 + $0x50] sm:$0xff] }
 0x167   : > { %5055 = vmatmul.msk.bf16.gmra.mxu2 %vm1487_vm6, %v5202_v36  ;;  %5086 = vmatmul.msk.bf16.gmra.mxu3 %vm1487_vm6, %v5233_v37  ;;  %v5181_v36 = vld [vmem:[%s8703_s5 + $0x120] sm:$0xff]  ;;  %v5629_v37 = vunpack.c.l.bf16 %v5874_v32 }
 0x176   : > { %5000 = vmatmul.msk.bf16.gmra.mxu0 %vm1487_vm6, %v5147_v38  ;;  %5026 = vmatmul.msk.bf16.gmra.mxu1 %vm1487_vm6, %v5173_v39 }
 0x177   : > { %5056 = vmatmul.msk.bf16.gmra.mxu2 %vm1487_vm6, %v5203_v40  ;;  %5087 = vmatmul.msk.bf16.gmra.mxu3 %vm1487_vm6, %v5234_v41  ;;  %v5630_v40 = vunpack.c.h.bf16 %v5874_v32 }
 0x186   : > { %5001 = vmatmul.msk.bf16.gmra.mxu0 %vm1487_vm6, %v5148_v42  ;;  %5027 = vmatmul.msk.bf16.gmra.mxu1 %vm1487_vm6, %v5174_v43  ;;  %v5211_v43 = vld [vmem:[%s8703_s5 + $0x210] sm:$0xff] }
 0x187   : > { %5057 = vmatmul.msk.bf16.gmra.mxu2 %vm1487_vm6, %v5204_v44  ;;  %5088 = vmatmul.msk.bf16.gmra.mxu3 %vm1487_vm6, %v5235_v45  ;;  %v5242_v44 = vld [vmem:[%s8703_s5 + $0x308] sm:$0xff] }
 0x196   : > { %5002 = vmatmul.msk.bf16.gmra.mxu0 %vm1487_vm6, %v5149_v46  ;;  %5028 = vmatmul.msk.bf16.gmra.mxu1 %vm1487_vm6, %v5175_v47 }
 0x197   : > { %5058 = vmatmul.msk.bf16.gmra.mxu2 %vm1487_vm6, %v5205_v48  ;;  %5089 = vmatmul.msk.bf16.gmra.mxu3 %vm1487_vm6, %v5236_v49 }
 0x1a6   : > { %5003 = vmatmul.msk.bf16.gmra.mxu0 %vm1487_vm6, %v5150_v50  ;;  %5029 = vmatmul.msk.bf16.gmra.mxu1 %vm1487_vm6, %v5176_v51 }
 0x1a7   : > { %5059 = vmatmul.msk.bf16.gmra.mxu2 %vm1487_vm6, %v5206_v52  ;;  %5090 = vmatmul.msk.bf16.gmra.mxu3 %vm1487_vm6, %v5237_v53 }
 0x1b6   : > { %5004 = vmatmul.msk.bf16.gmra.mxu0 %vm1487_vm6, %v5151_v54  ;;  %5030 = vmatmul.msk.bf16.gmra.mxu1 %vm1487_vm6, %v5177_v55  ;;  %v5875_v54 = vld [vmem:[%s8704_s6 + $0x2c8] sm:$0xff]  }
 0x1b7   : > { %5060 = vmatmul.msk.bf16.gmra.mxu2 %vm1487_vm6, %v5207_v56  ;;  %5091 = vmatmul.msk.bf16.gmra.mxu3 %vm1487_vm6, %v5238_v57  ;;  %v5156_v57 = vld [vmem:[%s8703_s5 + $0x58] sm:$0xff] }
 0x1c6   : > { %5005 = vmatmul.msk.bf16.gmra.mxu0 %vm1487_vm6, %v5152_v58  ;;  %5031 = vmatmul.msk.bf16.gmra.mxu1 %vm1487_vm6, %v5178_v59  ;;  %v5182_v58 = vld [vmem:[%s8703_s5 + $0x128] sm:$0xff]  ;;  %v5633_v59 = vunpack.c.l.bf16 %v5875_v54 }
 0x1c7   : > { %5061 = vmatmul.msk.bf16.gmra.mxu2 %vm1487_vm6, %v5208_v60  ;;  %5092 = vmatmul.msk.bf16.gmra.mxu3 %vm1487_vm6, %v5239_v61 }
 0x1d3   : > { %v6342_v0 = vpop.f32.mrf.mxu0  ;;  %v6344_v1 = vpop.f32.mrf.mxu1 }
 0x1d6   : > { %5006 = vmatmul.msk.bf16.gmra.mxu0 %vm1487_vm6, %v5153_v62  ;;  %5032 = vmatmul.msk.bf16.gmra.mxu1 %vm1487_vm6, %v5179_v63  ;;  %v5634_v62 = vunpack.c.h.bf16 %v5875_v54 }
 0x1d7   : > { %5062 = vmatmul.msk.bf16.gmra.mxu2 %vm1487_vm6, %v5209_v2  ;;  %5093 = vmatmul.msk.bf16.gmra.mxu3 %vm1487_vm6, %v5240_v3  ;;  %v5212_v3 = vld [vmem:[%s8703_s5 + $0x218] sm:$0xff] }
 0x1da   : > { %v6356_v4 = vpop.f32.mrf.mxu2  ;;  %v2320_v5 = vpop.f32.mrf.mxu3 }
 0x1db   : > { %v6358_v6 = vpop.f32.mrf.mxu0  ;;  %v6360_v7 = vpop.f32.mrf.mxu1  ;;  %v2699_v8 = vpack.c.bf16 %v2320_v5, %v2320_v5  ;;  %v5243_v5 = vld [vmem:[%s8703_s5 + $0x310] sm:$0xff] }
 0x1dd   : > { %v3211_v15 = vunpack.c.l.bf16 %v2699_v8 }
 0x1df   : > { %v6385_v23 = vmul.f32 %v5625_v14, %v3211_v15 }
 0x1e1   : > { %8814 = vst [vmem:[#allocation7_spill] sm:$0xff] %v6385_v23 }
 0x1e2   : > { %v6365_v10 = vpop.f32.mrf.mxu2  ;;  %v2322_v11 = vpop.f32.mrf.mxu3 }
 0x1e3   : > { %v2700_v16 = vpack.c.bf16 %v2322_v11, %v2322_v11  ;;  %v6373_v18 = vpop.f32.mrf.mxu0  ;;  %v6375_v19 = vpop.f32.mrf.mxu1 }
 0x1e5   : > { %v3212_v22 = vunpack.c.l.bf16 %v2700_v16 }
 0x1e6   : > { %5007 = vmatmul.msk.bf16.gmra.mxu0 %vm1487_vm6, %v5154_v12  ;;  %5033 = vmatmul.msk.bf16.gmra.mxu1 %vm1487_vm6, %v5180_v13  ;;  %v5185_v12 = vld [vmem:[%s8703_s5 + $0x140] sm:$0xff] }
 0x1e7   : > { %v6387_v25 = vmul.f32 %v5626_v17, %v3212_v22  ;;  %5063 = vmatmul.msk.bf16.gmra.mxu2 %vm1487_vm6, %v5210_v20  ;;  %5094 = vmatmul.msk.bf16.gmra.mxu3 %vm1487_vm6, %v5241_v21  ;;  %v2577_v17 = vpack.c.bf16 %v6344_v1, %v6344_v1  ;;  %v2578_v20 = vpack.c.bf16 %v6360_v7, %v6360_v7  ;;  %v5812_v21 = vld [vmem:[%s8704_s6 + $0xd0] sm:$0xff]   ;;  %v5157_v1 = vld [vmem:[%s8703_s5 + $0x60] sm:$0xff] }
 0x1e8   : > { %v5183_v7 = vld [vmem:[%s8703_s5 + $0x130] sm:$0xff] }
 0x1e9   : > { %8815 = vst [vmem:[#allocation8_spill] sm:$0xff] %v6387_v25  ;;  %v3089_v32 = vunpack.c.l.bf16 %v2577_v17 }
 0x1ea   : > { %v6393_v27 = vpop.f32.mrf.mxu2  ;;  %v2325_v28 = vpop.f32.mrf.mxu3 }
 0x1eb   : > { %v6395_v29 = vpop.f32.mrf.mxu0  ;;  %v6397_v30 = vpop.f32.mrf.mxu1  ;;  %v2701_v31 = vpack.c.bf16 %v2325_v28, %v2325_v28  ;;  %v5876_v28 = vld [vmem:[%s8704_s6 + $0x2d0] sm:$0xff]  }
 0x1ec   : > { %v2580_v17 = vpack.c.bf16 %v6397_v30, %v6397_v30  ;;  %v5184_v30 = vld [vmem:[%s8703_s5 + $0x138] sm:$0xff] }
 0x1ed   : > { %v3213_v38 = vunpack.c.l.bf16 %v2701_v31  ;;  %v5381_v31 = vunpack.c.l.bf16 %v5812_v21 }
 0x1ef   : > { %v6422_v46 = vmul.f32 %v5629_v37, %v3213_v38  ;;  %v5637_v38 = vunpack.c.l.bf16 %v5876_v28 }
 0x1f1   : > { %8816 = vst [vmem:[#allocation9_spill] sm:$0xff] %v6422_v46 }
 0x1f2   : > { %v6402_v33 = vpop.f32.mrf.mxu2  ;;  %v2327_v34 = vpop.f32.mrf.mxu3 }
 0x1f3   : > { %v2702_v39 = vpack.c.bf16 %v2327_v34, %v2327_v34  ;;  %v6410_v41 = vpop.f32.mrf.mxu0  ;;  %v6412_v42 = vpop.f32.mrf.mxu1  ;;  %v5382_v34 = vunpack.c.h.bf16 %v5812_v21 }
 0x1f5   : > { %v3214_v45 = vunpack.c.l.bf16 %v2702_v39 }
 0x1f6   : > { %5008 = vmatmul.msk.bf16.gmra.mxu0 %vm1487_vm6, %v5155_v35  ;;  %5034 = vmatmul.msk.bf16.gmra.mxu1 %vm1487_vm6, %v5181_v36  ;;  %v3090_v35 = vunpack.c.l.bf16 %v2578_v20  ;;  %v5813_v20 = vld [vmem:[%s8704_s6 + $0xd8] sm:$0xff]  }
 0x1f7   : > { %v6424_v47 = vmul.f32 %v5630_v40, %v3214_v45  ;;  %5064 = vmatmul.msk.bf16.gmra.mxu2 %vm1487_vm6, %v5211_v43  ;;  %5095 = vmatmul.msk.bf16.gmra.mxu3 %vm1487_vm6, %v5242_v44  ;;  %v5638_v43 = vunpack.c.h.bf16 %v5876_v28  ;;  %v5385_v28 = vunpack.c.l.bf16 %v5813_v20 }
 0x1f9   : > { %8817 = vst [vmem:[#allocation10_spill] sm:$0xff] %v6424_v47 }
 0x1fa   : > { %v6430_v49 = vpop.f32.mrf.mxu2  ;;  %v2330_v50 = vpop.f32.mrf.mxu3 }
 0x1fb   : > { %v6432_v51 = vpop.f32.mrf.mxu0  ;;  %v6434_v52 = vpop.f32.mrf.mxu1  ;;  %v2703_v53 = vpack.c.bf16 %v2330_v50, %v2330_v50  ;;  %v5213_v50 = vld [vmem:[%s8703_s5 + $0x220] sm:$0xff] }
 0x1fd   : > { %v3215_v60 = vunpack.c.l.bf16 %v2703_v53  ;;  %v5244_v53 = vld [vmem:[%s8703_s5 + $0x318] sm:$0xff] }
 0x1ff   : > { %v6459_v9 = vmul.f32 %v5633_v59, %v3215_v60 }
 0x201   : > { %8818 = vst [vmem:[#allocation11_spill] sm:$0xff] %v6459_v9  ;;  %v6627_v9 = vld [vmem:[%s8704_s6 + $0x1c8] sm:$0xff]  }
 0x202   : > { %v6439_v55 = vpop.f32.mrf.mxu2  ;;  %v2332_v56 = vpop.f32.mrf.mxu3 }
 0x203   : > { %v2704_v61 = vpack.c.bf16 %v2332_v56, %v2332_v56  ;;  %v6447_v63 = vpop.f32.mrf.mxu0  ;;  %v6449_v2 = vpop.f32.mrf.mxu1  ;;  %v6501_v56 = vmul.f32 %v5381_v31, %v3089_v32  ;;  %v5386_v32 = vunpack.c.h.bf16 %v5813_v20 }
 0x205   : > { %v3216_v8 = vunpack.c.l.bf16 %v2704_v61  ;;  %8820 = vst [vmem:[#allocation13_spill] sm:$0xff] %v6501_v56 }
 0x206   : > { %5009 = vmatmul.msk.bf16.gmra.mxu0 %vm1487_vm6, %v5156_v57  ;;  %5035 = vmatmul.msk.bf16.gmra.mxu1 %vm1487_vm6, %v5182_v58  ;;  %v6505_v57 = vmul.f32 %v5382_v34, %v3090_v35  ;;  %v3092_v34 = vunpack.c.l.bf16 %v2580_v17 }
 0x207   : > { %v6461_v11 = vmul.f32 %v5634_v62, %v3216_v8  ;;  %5065 = vmatmul.msk.bf16.gmra.mxu2 %vm1487_vm6, %v5212_v3  ;;  %5096 = vmatmul.msk.bf16.gmra.mxu3 %vm1487_vm6, %v5243_v5 }
 0x208   : > { %8821 = vst [vmem:[#allocation14_spill] sm:$0xff] %v6505_v57  ;;  %v5161_v57 = vld [vmem:[%s8703_s5 + $0x80] sm:$0xff] }
 0x209   : > { %8819 = vst [vmem:[#allocation12_spill] sm:$0xff] %v6461_v11 }
 0x20a   : > { %v6467_v13 = vpop.f32.mrf.mxu2  ;;  %v2335_v14 = vpop.f32.mrf.mxu3 }
 0x20b   : > { %v6469_v15 = vpop.f32.mrf.mxu0  ;;  %v6471_v16 = vpop.f32.mrf.mxu1  ;;  %v2705_v22 = vpack.c.bf16 %v2335_v14, %v2335_v14  ;;  %v2579_v14 = vpack.c.bf16 %v6375_v19, %v6375_v19  ;;  %v5158_v19 = vld [vmem:[%s8703_s5 + $0x68] sm:$0xff] }
 0x20d   : > { %v3217_v39 = vunpack.c.l.bf16 %v2705_v22  ;;  %v5877_v22 = vld [vmem:[%s8704_s6 + $0x2d8] sm:$0xff]   ;;  %v3091_v31 = vunpack.c.l.bf16 %v2579_v14  ;;  %v6555_v14 = vmul.f32 %v5386_v32, %v3092_v34  ;;  %v2581_v34 = vpack.c.bf16 %v6412_v42, %v6412_v42  ;;  %v6593_v42 = vld [vmem:[%s8704_s6 + $0x1c0] sm:$0xff]  }
 0x20e   : > { %v5501_v46 = vunpack.c.l.bf16 %v6593_v42 }
 0x20f   : > { %v6507_v58 = vmul.f32 %v5637_v38, %v3217_v39  ;;  %v5642_v39 = vunpack.c.h.bf16 %v5877_v22 }
 0x211   : > { %8822 = vst [vmem:[#allocation15_spill] sm:$0xff] %v6507_v58 }
 0x212   : > { %v6483_v36 = vpop.f32.mrf.mxu2  ;;  %v2337_v37 = vpop.f32.mrf.mxu3 }
 0x213   : > { %v2706_v40 = vpack.c.bf16 %v2337_v37, %v2337_v37  ;;  %v6491_v44 = vpop.f32.mrf.mxu0  ;;  %v6493_v45 = vpop.f32.mrf.mxu1 }
 0x215   : > { %v3218_v54 = vunpack.c.l.bf16 %v2706_v40 }
 0x216   : > { %5010 = vmatmul.msk.bf16.gmra.mxu0 %vm1487_vm6, %v5157_v1  ;;  %5036 = vmatmul.msk.bf16.gmra.mxu1 %vm1487_vm6, %v5183_v7  ;;  %v5641_v1 = vunpack.c.l.bf16 %v5877_v22 }
 0x217   : > { %v6509_v59 = vmul.f32 %v5638_v43, %v3218_v54  ;;  %5066 = vmatmul.msk.bf16.gmra.mxu2 %vm1487_vm6, %v5213_v50  ;;  %5097 = vmatmul.msk.bf16.gmra.mxu3 %vm1487_vm6, %v5244_v53  ;;  %v5214_v50 = vld [vmem:[%s8703_s5 + $0x228] sm:$0xff]  ;;  %v5245_v53 = vld [vmem:[%s8703_s5 + $0x320] sm:$0xff] }
 0x219   : > { %8823 = vst [vmem:[#allocation16_spill] sm:$0xff] %v6509_v59 }
 0x21a   : > { %v6515_v61 = vpop.f32.mrf.mxu2  ;;  %v2340_v62 = vpop.f32.mrf.mxu3 }
 0x21b   : > { %v6517_v3 = vpop.f32.mrf.mxu0  ;;  %v6519_v5 = vpop.f32.mrf.mxu1  ;;  %v2707_v21 = vpack.c.bf16 %v2340_v62, %v2340_v62  ;;  %v6551_v62 = vmul.f32 %v5385_v28, %v3091_v31 }
 0x21d   : > { %v3219_v7 = vunpack.c.l.bf16 %v2707_v21 }
 0x21f   : > { %v6557_v17 = vmul.f32 %v5641_v1, %v3219_v7  ;;  %v5878_v7 = vld [vmem:[%s8704_s6 + $0x2e0] sm:$0xff]  }
 0x220   : > { %v5645_v60 = vunpack.c.l.bf16 %v5878_v7  ;;  %v5646_v8 = vunpack.c.h.bf16 %v5878_v7  ;;  %v6622_v7 = vld [vmem:[%s8704_s6 + $0x8] sm:$0xff]  }
 0x221   : > { %8824 = vst [vmem:[#allocation17_spill] sm:$0xff] %v6557_v17  ;;  %v2532_v17 = vpack.c.bf16 %v6469_v15, %v6469_v15  ;;  %v5789_v15 = vld [vmem:[%s8704_s6 + $0x18] sm:$0xff]  }
 0x222   : > { %v6533_v35 = vpop.f32.mrf.mxu2  ;;  %v2342_v37 = vpop.f32.mrf.mxu3 }
 0x223   : > { %v2708_v38 = vpack.c.bf16 %v2342_v37, %v2342_v37  ;;  %v6541_v40 = vpop.f32.mrf.mxu0  ;;  %v6543_v43 = vpop.f32.mrf.mxu1 }
 0x225   : > { %v3220_v54 = vunpack.c.l.bf16 %v2708_v38  ;;  %v2525_v38 = vpack.c.bf16 %v6342_v0, %v6342_v0  ;;  %v5159_v0 = vld [vmem:[%s8703_s5 + $0x70] sm:$0xff] }
 0x226   : > { %5011 = vmatmul.msk.bf16.gmra.mxu0 %vm1487_vm6, %v5158_v19  ;;  %5037 = vmatmul.msk.bf16.gmra.mxu1 %vm1487_vm6, %v5184_v30  ;;  %v2582_v19 = vpack.c.bf16 %v6434_v52, %v6434_v52  ;;  %v5814_v30 = vld [vmem:[%s8704_s6 + $0xe0] sm:$0xff]  }
 0x227   : > { %v6559_v20 = vmul.f32 %v5642_v39, %v3220_v54  ;;  %5067 = vmatmul.msk.bf16.gmra.mxu2 %vm1487_vm6, %v5214_v50  ;;  %5098 = vmatmul.msk.bf16.gmra.mxu3 %vm1487_vm6, %v5245_v53  ;;  %v6588_v39 = vld [vmem:[%s8704_s6] sm:$0xff]   ;;  %v5389_v52 = vunpack.c.l.bf16 %v5814_v30  ;;  %v3093_v50 = vunpack.c.l.bf16 %v2581_v34  ;;  %v5390_v53 = vunpack.c.h.bf16 %v5814_v30  ;;  %v5246_v30 = vld [vmem:[%s8703_s5 + $0x328] sm:$0xff] }
 0x228   : > { %v3094_v54 = vunpack.c.l.bf16 %v2582_v19  ;;  %v5215_v19 = vld [vmem:[%s8703_s5 + $0x230] sm:$0xff]  ;;  %v5277_v24 = vunpack.c.l.bf16 %v6588_v39  ;;  %v3037_v47 = vunpack.c.l.bf16 %v2525_v38  ;;  %v5278_v58 = vunpack.c.h.bf16 %v6588_v39 }
 0x229   : > { %8825 = vst [vmem:[#allocation18_spill] sm:$0xff] %v6559_v20  ;;  %v6630_v38 = vmul.f32 %v5389_v52, %v3093_v50  ;;  %v2529_v50 = vpack.c.bf16 %v6410_v41, %v6410_v41 }
 0x22a   : > { %v6565_v22 = vpop.f32.mrf.mxu2  ;;  %v2345_v28 = vpop.f32.mrf.mxu3  ;;  %v6632_v59 = vmul.f32 %v5390_v53, %v3094_v54  ;;  %v5788_v53 = vld [vmem:[%s8704_s6 + $0x10] sm:$0xff]   ;;  %v2530_v54 = vpack.c.bf16 %v6432_v51, %v6432_v51  ;;  %v2639_v51 = vpack.c.bf16 %v6393_v27, %v6393_v27  ;;  %v2584_v27 = vpack.c.bf16 %v6471_v16, %v6471_v16 }
 0x22b   : > { %8826 = vst [vmem:[#allocation19_spill] sm:$0xff] %v6565_v22  ;;  %v6567_v31 = vpop.f32.mrf.mxu0  ;;  %v6569_v37 = vpop.f32.mrf.mxu1  ;;  %v2709_v1 = vpack.c.bf16 %v2345_v28, %v2345_v28  ;;  %v5286_v39 = vunpack.c.h.bf16 %v5788_v53 }
 0x22d   : > { %v3221_v21 = vunpack.c.l.bf16 %v2709_v1  ;;  %v2526_v1 = vpack.c.bf16 %v6358_v6, %v6358_v6  ;;  %v5502_v6 = vunpack.c.h.bf16 %v6593_v42 }
 0x22f   : > { %v6641_v20 = vmul.f32 %v5645_v60, %v3221_v21  ;;  %v6654_v60 = vmul.f32 %v5277_v24, %v3037_v47  ;;  %v3038_v42 = vunpack.c.l.bf16 %v2526_v1  ;;  %v2527_v21 = vpack.c.bf16 %v6373_v18, %v6373_v18  ;;  %v5815_v18 = vld [vmem:[%s8704_s6 + $0xe8] sm:$0xff]  }
 0x230   : > { %v5393_v23 = vunpack.c.l.bf16 %v5815_v18  ;;  %v5394_v16 = vunpack.c.h.bf16 %v5815_v18  ;;  %v8835_v18 = vunpack.c.l.bf16 %v6627_v9 }
 0x231   : > { %8828 = vst [vmem:[#allocation21_spill] sm:$0xff] %v6641_v20  ;;  %v3042_v20 = vunpack.c.l.bf16 %v2530_v54 }
 0x232   : > { %v6595_v28 = vpop.f32.mrf.mxu2  ;;  %v2347_v48 = vpop.f32.mrf.mxu3 }
 0x233   : > { %8827 = vst [vmem:[#allocation20_spill] sm:$0xff] %v6595_v28  ;;  %v2710_v26 = vpack.c.bf16 %v2347_v48, %v2347_v48  ;;  %v6603_v32 = vpop.f32.mrf.mxu0  ;;  %v6605_v34 = vpop.f32.mrf.mxu1  ;;  %v2637_v48 = vpack.c.bf16 %v6356_v4, %v6356_v4  ;;  %v2531_v4 = vpack.c.bf16 %v6447_v63, %v6447_v63  ;;  %v3041_v63 = vunpack.c.l.bf16 %v2529_v50 }
 0x234   : > { %v3151_v50 = vunpack.c.l.bf16 %v2639_v51 }
 0x235   : > { %v3222_v11 = vunpack.c.l.bf16 %v2710_v26 }
 0x236   : > { %5012 = vmatmul.msk.bf16.gmra.mxu0 %vm1487_vm6, %v5159_v0  ;;  %5038 = vmatmul.msk.bf16.gmra.mxu1 %vm1487_vm6, %v5185_v12  ;;  %v5289_v0 = vunpack.c.l.bf16 %v5789_v15  ;;  %v2528_v12 = vpack.c.bf16 %v6395_v29, %v6395_v29  ;;  %v6692_v29 = vmul.f32 %v5278_v58, %v3038_v42  ;;  %v6705_v42 = vmul.f32 %v5286_v39, %v3042_v20  ;;  %v5216_v20 = vld [vmem:[%s8703_s5 + $0x238] sm:$0xff]  ;;  %v5247_v39 = vld [vmem:[%s8703_s5 + $0x330] sm:$0xff] }
 0x237   : > { %v6643_v26 = vmul.f32 %v5646_v8, %v3222_v11  ;;  %5068 = vmatmul.msk.bf16.gmra.mxu2 %vm1487_vm6, %v5215_v19  ;;  %5099 = vmatmul.msk.bf16.gmra.mxu3 %vm1487_vm6, %v5246_v30  ;;  %v3149_v11 = vunpack.c.l.bf16 %v2637_v48  ;;  %v2638_v8 = vpack.c.bf16 %v6365_v10, %v6365_v10  ;;  %v3043_v19 = vunpack.c.l.bf16 %v2531_v4 }
 0x238   : > { %v5290_v30 = vunpack.c.h.bf16 %v5789_v15  ;;  %v3044_v48 = vunpack.c.l.bf16 %v2532_v17  ;;  %v2640_v10 = vpack.c.bf16 %v6402_v33, %v6402_v33  ;;  %v5285_v17 = vunpack.c.l.bf16 %v5788_v53 }
 0x239   : > { %8829 = vst [vmem:[#allocation22_spill] sm:$0xff] %v6643_v26  ;;  %v6683_v52 = vmul.f32 %v5501_v46, %v3149_v11  ;;  %v3150_v4 = vunpack.c.l.bf16 %v2638_v8  ;;  %v2583_v15 = vpack.c.bf16 %v6449_v2, %v6449_v2  ;;  %v6694_v33 = vmul.f32 %v5289_v0, %v3043_v19  ;;  %v5879_v2 = vld [vmem:[%s8704_s6 + $0x2e8] sm:$0xff]  }
 0x23a   : > { %v6667_v24 = vpop.f32.mrf.mxu2  ;;  %v2350_v47 = vpop.f32.mrf.mxu3  ;;  %v6696_v46 = vmul.f32 %v5290_v30, %v3044_v48  ;;  %v3039_v8 = vunpack.c.l.bf16 %v2527_v21  ;;  %v3040_v53 = vunpack.c.l.bf16 %v2528_v12  ;;  %v3152_v54 = vunpack.c.l.bf16 %v2640_v10  ;;  %v5160_v21 = vld [vmem:[%s8703_s5 + $0x78] sm:$0xff] }
 0x23b   : > { %8830 = vst [vmem:[#allocation23_spill] sm:$0xff] %v6667_v24  ;;  %v6671_v1 = vpop.f32.mrf.mxu0  ;;  %v6673_v41 = vpop.f32.mrf.mxu1  ;;  %v2711_v11 = vpack.c.bf16 %v2350_v47, %v2350_v47  ;;  %v6701_v26 = vmul.f32 %v5502_v6, %v3150_v4  ;;  %v3095_v25 = vunpack.c.l.bf16 %v2583_v15  ;;  %v6703_v58 = vmul.f32 %v5285_v17, %v3041_v63  ;;  %v5186_v6 = vld [vmem:[%s8703_s5 + $0x148] sm:$0xff]  ;;  %v6746_v4 = vld [vmem:[%s8704_s6 + $0x20] sm:$0xff]  }
 0x23c   : > { %8831 = vst [vmem:[#allocation24_spill] sm:$0xff] %v6683_v52  ;;  %v3096_v0 = vunpack.c.l.bf16 %v2584_v27  ;;  %v5649_v19 = vunpack.c.l.bf16 %v5879_v2  ;;  %v5650_v48 = vunpack.c.h.bf16 %v5879_v2  ;;  %v8834_v17 = vunpack.c.l.bf16 %v6622_v7 }
 0x23d   : > { %8832 = vst [vmem:[#allocation25_spill] sm:$0xff] %v6701_v26  ;;  %v3223_v12 = vunpack.c.l.bf16 %v2711_v11  ;;  %v6731_v27 = vmul.f32 %v8835_v18, %v3151_v50  ;;  %v8837_v11 = vunpack.c.h.bf16 %v6622_v7  ;;  %v6741_v24 = vmul.f32 %v5393_v23, %v3095_v25  ;;  %v5816_v7 = vld [vmem:[%s8704_s6 + $0xf0] sm:$0xff]  }
 0x23e   : > { %v6727_v15 = vmul.f32 %v8834_v17, %v3039_v8  ;;  %v2585_v8 = vpack.c.bf16 %v6493_v45, %v6493_v45  ;;  %v2586_v23 = vpack.c.bf16 %v6519_v5, %v6519_v5  ;;  %v5792_v25 = vld [vmem:[%s8704_s6 + $0x30] sm:$0xff]  }
 0x23f   : > { %8836 = vst [vmem:[#allocation27_spill] sm:$0xff] %v6731_v27  ;;  %v6735_v2 = vmul.f32 %v8837_v11, %v3040_v53  ;;  %v6755_v53 = vmul.f32 %v5394_v16, %v3096_v0  ;;  %v6764_v45 = vmul.f32 %v5649_v19, %v3223_v12  ;;  %v5793_v16 = vld [vmem:[%s8704_s6 + $0x38] sm:$0xff]   ;;  %v2537_v19 = vpack.c.bf16 %v6603_v32, %v6603_v32 }
 0x240   : > { %v3097_v12 = vunpack.c.l.bf16 %v2585_v8  ;;  %v3098_v17 = vunpack.c.l.bf16 %v2586_v23  ;;  %v5305_v18 = vunpack.c.l.bf16 %v5793_v16  ;;  %v2536_v8 = vpack.c.bf16 %v6567_v31, %v6567_v31 }
 0x241   : > { %8840 = vst [vmem:[#allocation29_spill] sm:$0xff] %v6764_v45  ;;  %v3049_v5 = vunpack.c.l.bf16 %v2537_v19  ;;  %v5306_v45 = vunpack.c.h.bf16 %v5793_v16  ;;  %v2533_v32 = vpack.c.bf16 %v6491_v44, %v6491_v44  ;;  %v2534_v31 = vpack.c.bf16 %v6517_v3, %v6517_v3  ;;  %v5880_v44 = vld [vmem:[%s8704_s6 + $0x2f0] sm:$0xff]  }
 0x242   : > { %v6707_v47 = vpop.f32.mrf.mxu2  ;;  %v2352_v30 = vpop.f32.mrf.mxu3 }
 0x243   : > { %8833 = vst [vmem:[#allocation26_spill] sm:$0xff] %v6707_v47  ;;  %v2712_v10 = vpack.c.bf16 %v2352_v30, %v2352_v30  ;;  %v1920_v63 = vpop.f32.mrf.mxu0  ;;  %v6715_v51 = vpop.f32.mrf.mxu1  ;;  %v8838_v30 = vunpack.c.h.bf16 %v6627_v9  ;;  %v5849_v9 = vld [vmem:[%s8704_s6 + $0x1f8] sm:$0xff]  }
 0x244   : > { %v5529_v28 = vunpack.c.l.bf16 %v5849_v9  ;;  %v5530_v22 = vunpack.c.h.bf16 %v5849_v9  ;;  %v5217_v9 = vld [vmem:[%s8703_s5 + $0x240] sm:$0xff] }
 0x245   : > { %v6739_v47 = vmul.f32 %v8838_v30, %v3152_v54  ;;  %v3224_v50 = vunpack.c.l.bf16 %v2712_v10  ;;  %v2539_v54 = vpack.c.bf16 %v1920_v63, %v1920_v63  ;;  %v5301_v63 = vunpack.c.l.bf16 %v5792_v25 }
 0x246   : > { %5013 = vmatmul.msk.bf16.gmra.mxu0 %vm1487_vm6, %v5160_v21  ;;  %5039 = vmatmul.msk.bf16.gmra.mxu1 %vm1487_vm6, %v5186_v6  ;;  %v5397_v21 = vunpack.c.l.bf16 %v5816_v7  ;;  %v2538_v6 = vpack.c.bf16 %v6671_v1, %v6671_v1  ;;  %v2535_v1 = vpack.c.bf16 %v6541_v40, %v6541_v40 }
 0x247   : > { %8839 = vst [vmem:[#allocation28_spill] sm:$0xff] %v6739_v47  ;;  %v6766_v10 = vmul.f32 %v5650_v48, %v3224_v50  ;;  %5069 = vmatmul.msk.bf16.gmra.mxu2 %vm1487_vm6, %v5216_v20  ;;  %5100 = vmatmul.msk.bf16.gmra.mxu3 %vm1487_vm6, %v5247_v39  ;;  %v5398_v48 = vunpack.c.h.bf16 %v5816_v7  ;;  %v5791_v39 = vld [vmem:[%s8704_s6 + $0x28] sm:$0xff]   ;;  %v3051_v11 = vunpack.c.l.bf16 %v2539_v54  ;;  %v5302_v7 = vunpack.c.h.bf16 %v5792_v25 }
 0x248   : > { %v3050_v54 = vunpack.c.l.bf16 %v2538_v6  ;;  %v5298_v52 = vunpack.c.h.bf16 %v5791_v39  ;;  %v6797_v26 = vmul.f32 %v5397_v21, %v3097_v12  ;;  %v3047_v16 = vunpack.c.l.bf16 %v2535_v1 }
 0x249   : > { %8841 = vst [vmem:[#allocation30_spill] sm:$0xff] %v6766_v10  ;;  %v5297_v10 = vunpack.c.l.bf16 %v5791_v39  ;;  %v3563_v25 = vmul.f32 %v5305_v18, %v3051_v11  ;;  %v6804_v6 = vmul.f32 %v5398_v48, %v3098_v17  ;;  %v3048_v12 = vunpack.c.l.bf16 %v2536_v8 }
 0x24a   : > { %v2200_v30 = vpop.f32.mrf.mxu2  ;;  %v2355_v50 = vpop.f32.mrf.mxu3  ;;  %v3561_v39 = vmul.f32 %v5301_v63, %v3049_v5  ;;  %v3562_v3 = vmul.f32 %v5302_v7, %v3050_v54  ;;  %v3045_v11 = vunpack.c.l.bf16 %v2533_v32  ;;  %v3046_v48 = vunpack.c.l.bf16 %v2534_v31  ;;  %v5187_v5 = vld [vmem:[%s8703_s5 + $0x150] sm:$0xff] }
 0x24b   : > { %v1922_v20 = vpop.f32.mrf.mxu0  ;;  %v6791_v23 = vpop.f32.mrf.mxu1  ;;  %v2651_v40 = vpack.c.bf16 %v2200_v30, %v2200_v30  ;;  %v5294_v30 = vunpack.c.h.bf16 %v6746_v4  ;;  %v5653_v17 = vunpack.c.l.bf16 %v5880_v44  ;;  %v5654_v8 = vunpack.c.h.bf16 %v5880_v44 }
 0x24c   : > { %v2540_v0 = vpack.c.bf16 %v1922_v20, %v1922_v20  ;;  %v2713_v20 = vpack.c.bf16 %v2355_v50, %v2355_v50  ;;  %v3559_v31 = vmul.f32 %v5297_v10, %v3047_v16 }
 0x24e   : > { %v3052_v19 = vunpack.c.l.bf16 %v2540_v0  ;;  %v3163_v0 = vunpack.c.l.bf16 %v2651_v40  ;;  %v5248_v40 = vld [vmem:[%s8703_s5 + $0x338] sm:$0xff] }
 0x250   : > { %v3564_v18 = vmul.f32 %v5306_v45, %v3052_v19  ;;  %v3225_v45 = vunpack.c.l.bf16 %v2713_v20  ;;  %v3811_v19 = vpack.c.bf16 %v3562_v3, %v3561_v39  ;;  %v6830_v20 = vmul.f32 %v5529_v28, %v3163_v0 }
 0x251   : > { %v8846_v28 = vunpack.c.l.bf16 %v6746_v4  ;;  %v2642_v3 = vpack.c.bf16 %v6439_v55, %v6439_v55  ;;  %v5844_v4 = vld [vmem:[%s8704_s6 + $0x1d0] sm:$0xff]  }
 0x252   : > { %v3812_v1 = vpack.c.bf16 %v3564_v18, %v3563_v25  ;;  %v2202_v50 = vpop.f32.mrf.mxu2  ;;  %v2357_v56 = vpop.f32.mrf.mxu3  ;;  %v3560_v25 = vmul.f32 %v5298_v52, %v3048_v12  ;;  %8842 = vst [vmem:[#allocation31_spill] sm:$0xff] %v6830_v20  ;;  %v6836_v21 = vmul.f32 %v5653_v17, %v3225_v45  ;;  %v3558_v12 = vmul.f32 %v5294_v30, %v3046_v48 }
 0x253   : > { %v2652_v63 = vpack.c.bf16 %v2202_v50, %v2202_v50  ;;  %v2714_v32 = vpack.c.bf16 %v2357_v56, %v2357_v56  ;;  %v6818_v7 = vpop.f32.mrf.mxu0  ;;  %v6820_v54 = vpop.f32.mrf.mxu1  ;;  %v3835_v56 = vpack.c.bf16 %v6804_v6, %v6797_v26  ;;  %v3557_v16 = vmul.f32 %v8846_v28, %v3045_v11  ;;  %v5188_v28 = vld [vmem:[%s8703_s5 + $0x158] sm:$0xff]  ;;  %v5884_v50 = vld [vmem:[%s8704_s6 + $0x310] sm:$0xff]  }
 0x254   : > { %3997 = vmatpush.bf16.msra.mxu0 %v3812_v1  ;;  %8843 = vst [vmem:[#allocation32_spill] sm:$0xff] %v6836_v21  ;;  %v3810_v39 = vpack.c.bf16 %v3560_v25, %v3559_v31  ;;  %v5509_v55 = vunpack.c.l.bf16 %v5844_v4  ;;  %v3154_v45 = vunpack.c.l.bf16 %v2642_v3  ;;  %v5817_v31 = vld [vmem:[%s8704_s6 + $0xf8] sm:$0xff]   ;;  %v2588_v25 = vpack.c.bf16 %v6569_v37, %v6569_v37  ;;  %v5218_v37 = vld [vmem:[%s8703_s5 + $0x248] sm:$0xff] }
 0x255   : > { %v3164_v44 = vunpack.c.l.bf16 %v2652_v63  ;;  %v3226_v18 = vunpack.c.l.bf16 %v2714_v32  ;;  %v5881_v32 = vld [vmem:[%s8704_s6 + $0x2f8] sm:$0xff]   ;;  %v2645_v26 = vpack.c.bf16 %v6515_v61, %v6515_v61  ;;  %v2646_v6 = vpack.c.bf16 %v6533_v35, %v6533_v35 }
 0x256   : > { %5014 = vmatmul.msk.bf16.gmra.mxu0 %vm1487_vm6, %v5161_v57  ;;  %5040 = vmatmul.msk.bf16.gmra.mxu1 %vm1487_vm6, %v5187_v5  ;;  %v2641_v57 = vpack.c.bf16 %v6430_v49, %v6430_v49  ;;  %v3809_v49 = vpack.c.bf16 %v3558_v12, %v3557_v16  ;;  %v5510_v5 = vunpack.c.h.bf16 %v5844_v4  ;;  %v5657_v16 = vunpack.c.l.bf16 %v5881_v32  ;;  %v5249_v4 = vld [vmem:[%s8703_s5 + $0x340] sm:$0xff] }
 0x257   : > { %v6838_v10 = vmul.f32 %v5530_v22, %v3164_v44  ;;  %v6840_v52 = vmul.f32 %v5654_v8, %v3226_v18  ;;  %5070 = vmatmul.msk.bf16.gmra.mxu2 %vm1487_vm6, %v5217_v9  ;;  %5101 = vmatmul.msk.bf16.gmra.mxu3 %vm1487_vm6, %v5248_v40  ;;  %v2587_v40 = vpack.c.bf16 %v6543_v43, %v6543_v43  ;;  %v5162_v18 = vld [vmem:[%s8703_s5 + $0x88] sm:$0xff]  ;;  %v5165_v22 = vld [vmem:[%s8703_s5 + $0xa0] sm:$0xff]  ;;  %v5669_v61 = vunpack.c.l.bf16 %v5884_v50 }
 0x258   : > { %3998 = vmatpush.bf16.msra.mxu0 %v3811_v19  ;;  %v3153_v1 = vunpack.c.l.bf16 %v2641_v57  ;;  %v6868_v9 = vmul.f32 %v5510_v5, %v3154_v45  ;;  %v3100_v5 = vunpack.c.l.bf16 %v2588_v25 }
 0x259   : > { %8844 = vst [vmem:[#allocation33_spill] sm:$0xff] %v6838_v10 }
 0x25a   : > { %8845 = vst [vmem:[#allocation34_spill] sm:$0xff] %v6840_v52  ;;  %v6857_v11 = vpop.f32.mrf.mxu2  ;;  %v2360_v30 = vpop.f32.mrf.mxu3  ;;  %v6866_v8 = vmul.f32 %v5509_v55, %v3153_v1  ;;  %v8849_v55 = vpack.c.bf16 %v6696_v46, %v6694_v33  ;;  %v3099_v1 = vunpack.c.l.bf16 %v2587_v40  ;;  %v2643_v33 = vpack.c.bf16 %v6467_v13, %v6467_v13  ;;  %v5845_v40 = vld [vmem:[%s8704_s6 + $0x1d8] sm:$0xff]   ;;  %v5166_v52 = vld [vmem:[%s8703_s5 + $0xa8] sm:$0xff] }
 0x25b   : > { %v6859_v48 = vpop.f32.mrf.mxu0  ;;  %v6861_v17 = vpop.f32.mrf.mxu1  ;;  %v2715_v63 = vpack.c.bf16 %v2360_v30, %v2360_v30  ;;  %8848 = vst [vmem:[#allocation36_spill] sm:$0xff] %v6868_v9  ;;  %v5401_v30 = vunpack.c.l.bf16 %v5817_v31  ;;  %v8852_v46 = vpack.c.bf16 %v6705_v42, %v6703_v58  ;;  %v5513_v58 = vunpack.c.l.bf16 %v5845_v40 }
 0x25c   : > { %3999 = vmatpush.bf16.msra.mxu0 %v3810_v39  ;;  %8847 = vst [vmem:[#allocation35_spill] sm:$0xff] %v6866_v8  ;;  %v5658_v39 = vunpack.c.h.bf16 %v5881_v32  ;;  %v8853_v42 = vpack.c.bf16 %v6735_v2, %v6727_v15  ;;  %v5882_v15 = vld [vmem:[%s8704_s6 + $0x300] sm:$0xff]   ;;  %v8854_v2 = vpack.c.bf16 %v6692_v29, %v6654_v60 }
 0x25d   : > { %v3227_v43 = vunpack.c.l.bf16 %v2715_v63  ;;  %v3611_v25 = vmul.f32 %v5401_v30, %v3099_v1  ;;  %v2589_v30 = vpack.c.bf16 %v6605_v34, %v6605_v34  ;;  %v5189_v60 = vld [vmem:[%s8703_s5 + $0x160] sm:$0xff]  ;;  %v5661_v29 = vunpack.c.l.bf16 %v5882_v15 }
 0x25f   : > { %v6902_v32 = vmul.f32 %v5657_v16, %v3227_v43 }
 0x260   : > { %4000 = vmatpush.bf16.msra.mxu0 %v3809_v49  ;;  %v5402_v49 = vunpack.c.h.bf16 %v5817_v31  ;;  %v2644_v31 = vpack.c.bf16 %v6483_v36, %v6483_v36 }
 0x261   : > { %8850 = vst [vmem:[#allocation37_spill] sm:$0xff] %v6902_v32 }
 0x262   : > { %v6877_v19 = vpop.f32.mrf.mxu2  ;;  %v2362_v44 = vpop.f32.mrf.mxu3  ;;  %v3156_v36 = vunpack.c.l.bf16 %v2644_v31 }
 0x263   : > { %v2716_v12 = vpack.c.bf16 %v2362_v44, %v2362_v44  ;;  %v6885_v57 = vpop.f32.mrf.mxu0  ;;  %v6887_v3 = vpop.f32.mrf.mxu1 }
 0x264   : > { %4001 = vmatpush.bf16.msra.mxu0 %v8849_v55  ;;  %v5818_v55 = vld [vmem:[%s8704_s6 + $0x100] sm:$0xff]  }
 0x265   : > { %v3228_v45 = vunpack.c.l.bf16 %v2716_v12  ;;  %v5405_v34 = vunpack.c.l.bf16 %v5818_v55 }
 0x266   : > { %5015 = vmatmul.msk.bf16.gmra.mxu0 %vm1487_vm6, %v5162_v18  ;;  %5041 = vmatmul.msk.bf16.gmra.mxu1 %vm1487_vm6, %v5188_v28  ;;  %v3612_v18 = vmul.f32 %v5402_v49, %v3100_v5  ;;  %v2590_v49 = vpack.c.bf16 %v6673_v41, %v6673_v41  ;;  %v3101_v41 = vunpack.c.l.bf16 %v2589_v30 }
 0x267   : > { %v6904_v44 = vmul.f32 %v5658_v39, %v3228_v45  ;;  %5071 = vmatmul.msk.bf16.gmra.mxu2 %vm1487_vm6, %v5218_v37  ;;  %5102 = vmatmul.msk.bf16.gmra.mxu3 %vm1487_vm6, %v5249_v4  ;;  %v3155_v39 = vunpack.c.l.bf16 %v2643_v33  ;;  %v5514_v37 = vunpack.c.h.bf16 %v5845_v40  ;;  %v5406_v33 = vunpack.c.h.bf16 %v5818_v55 }
 0x268   : > { %4002 = vmatpush.bf16.msra.mxu0 %v8852_v46  ;;  %v3836_v4 = vpack.c.bf16 %v3612_v18, %v3611_v25  ;;  %v3102_v46 = vunpack.c.l.bf16 %v2590_v49  ;;  %v5163_v25 = vld [vmem:[%s8703_s5 + $0x90] sm:$0xff]  ;;  %v6969_v49 = vmul.f32 %v5405_v34, %v3101_v41  ;;  %v5846_v34 = vld [vmem:[%s8704_s6 + $0x1e0] sm:$0xff]  }
 0x269   : > { %8851 = vst [vmem:[#allocation38_spill] sm:$0xff] %v6904_v44  ;;  %v6942_v5 = vmul.f32 %v5513_v58, %v3155_v39  ;;  %v6944_v45 = vmul.f32 %v5514_v37, %v3156_v36  ;;  %v5662_v58 = vunpack.c.h.bf16 %v5882_v15  ;;  %v5219_v37 = vld [vmem:[%s8703_s5 + $0x250] sm:$0xff]  ;;  %v5250_v36 = vld [vmem:[%s8703_s5 + $0x348] sm:$0xff] }
 0x26a   : > { %v6920_v16 = vpop.f32.mrf.mxu2  ;;  %v2365_v43 = vpop.f32.mrf.mxu3  ;;  %8857 = vst [vmem:[#allocation41_spill] sm:$0xff] %v6969_v49  ;;  %v6971_v55 = vmul.f32 %v5406_v33, %v3102_v46  ;;  %v2543_v49 = vpack.c.bf16 %v6885_v57, %v6885_v57 }
 0x26b   : > { %v6922_v13 = vpop.f32.mrf.mxu0  ;;  %v6924_v12 = vpop.f32.mrf.mxu1  ;;  %v2717_v1 = vpack.c.bf16 %v2365_v43, %v2365_v43  ;;  %8855 = vst [vmem:[#allocation39_spill] sm:$0xff] %v6942_v5 }
 0x26c   : > { %4003 = vmatpush.bf16.msra.mxu0 %v8853_v42  ;;  %8856 = vst [vmem:[#allocation40_spill] sm:$0xff] %v6944_v45 }
 0x26d   : > { %v3229_v18 = vunpack.c.l.bf16 %v2717_v1  ;;  %8858 = vst [vmem:[#allocation42_spill] sm:$0xff] %v6971_v55 }
 0x26f   : > { %v6975_v1 = vmul.f32 %v5661_v29, %v3229_v18  ;;  %v2591_v29 = vpack.c.bf16 %v6715_v51, %v6715_v51  ;;  %v2592_v18 = vpack.c.bf16 %v6791_v23, %v6791_v23 }
 0x270   : > { %4004 = vmatpush.bf16.msra.mxu0 %v8854_v2 }
 0x271   : > { %8859 = vst [vmem:[#allocation43_spill] sm:$0xff] %v6975_v1  ;;  %v3103_v51 = vunpack.c.l.bf16 %v2591_v29  ;;  %v5251_v29 = vld [vmem:[%s8703_s5 + $0x350] sm:$0xff]  ;;  %v8882_v1 = vld [vmem:[#allocation26_spill] sm:$0xff] }
 0x272   : > { %v6946_v40 = vpop.f32.mrf.mxu2  ;;  %v2367_v31 = vpop.f32.mrf.mxu3 }
 0x273   : > { %v2718_v43 = vpack.c.bf16 %v2367_v31, %v2367_v31  ;;  %v6954_v42 = vpop.f32.mrf.mxu0  ;;  %v6956_v39 = vpop.f32.mrf.mxu1  ;;  %v5517_v31 = vunpack.c.l.bf16 %v5846_v34  ;;  %v2656_v57 = vpack.c.bf16 %v6946_v40, %v6946_v40  ;;  %v5823_v40 = vld [vmem:[%s8704_s6 + $0x128] sm:$0xff]  }
 0x274   : > { %4036 = vmatpush.bf16.msrb.mxu0 %v3836_v4 }
 0x275   : > { %v3230_v4 = vunpack.c.l.bf16 %v2718_v43  ;;  %v5819_v43 = vld [vmem:[%s8704_s6 + $0x108] sm:$0xff]  }
 0x276   : > { %5016 = vmatmul.msk.bf16.gmra.mxu0 %vm1487_vm6, %v5163_v25  ;;  %5042 = vmatmul.msk.bf16.gmra.mxu1 %vm1487_vm6, %v5189_v60  ;;  %v3158_v25 = vunpack.c.l.bf16 %v2646_v6  ;;  %v8862_v60 = vpack.c.bf16 %v6632_v59, %v6630_v38  ;;  %v8865_v59 = vpack.c.bf16 %v6555_v14, %v6551_v62  ;;  %v5409_v38 = vunpack.c.l.bf16 %v5819_v43 }
 0x277   : > { %v6977_v15 = vmul.f32 %v5662_v58, %v3230_v4  ;;  %5072 = vmatmul.msk.bf16.gmra.mxu2 %vm1487_vm6, %v5219_v37  ;;  %5103 = vmatmul.msk.bf16.gmra.mxu3 %vm1487_vm6, %v5250_v36  ;;  %v5883_v37 = vld [vmem:[%s8704_s6 + $0x308] sm:$0xff]   ;;  %v5410_v23 = vunpack.c.h.bf16 %v5819_v43  ;;  %v8866_v43 = vld [vmem:[#allocation14_spill] sm:$0xff] }
 0x278   : > { %4037 = vmatpush.bf16.msrb.mxu0 %v3835_v56  ;;  %v8861_v56 = vpack.c.bf16 %v6755_v53, %v6741_v24  ;;  %v3157_v24 = vunpack.c.l.bf16 %v2645_v26  ;;  %v5518_v53 = vunpack.c.h.bf16 %v5846_v34  ;;  %v3104_v26 = vunpack.c.l.bf16 %v2592_v18  ;;  %v5164_v34 = vld [vmem:[%s8703_s5 + $0x98] sm:$0xff] }
 0x279   : > { %8860 = vst [vmem:[#allocation44_spill] sm:$0xff] %v6977_v15  ;;  %v5666_v62 = vunpack.c.h.bf16 %v5883_v37 }
 0x27a   : > { %v6993_v41 = vpop.f32.mrf.mxu2  ;;  %v2370_v33 = vpop.f32.mrf.mxu3  ;;  %v7014_v36 = vmul.f32 %v5517_v31, %v3157_v24  ;;  %v7016_v4 = vmul.f32 %v5518_v53, %v3158_v25  ;;  %v5665_v31 = vunpack.c.l.bf16 %v5883_v37  ;;  %v7044_v37 = vmul.f32 %v5409_v38, %v3103_v51 }
 0x27b   : > { %v6997_v46 = vpop.f32.mrf.mxu0  ;;  %v6999_v35 = vpop.f32.mrf.mxu1  ;;  %v2719_v58 = vpack.c.bf16 %v2370_v33, %v2370_v33  ;;  %v5190_v33 = vld [vmem:[%s8703_s5 + $0x168] sm:$0xff] }
 0x27c   : > { %4038 = vmatpush.bf16.msrb.mxu0 %v8861_v56  ;;  %8863 = vst [vmem:[#allocation45_spill] sm:$0xff] %v7014_v36 }
 0x27d   : > { %8864 = vst [vmem:[#allocation46_spill] sm:$0xff] %v7016_v4  ;;  %v3231_v24 = vunpack.c.l.bf16 %v2719_v58 }
 0x27e   : > { %8869 = vst [vmem:[#allocation14_spill] sm:$0xff] %v7044_v37 }
 0x27f   : > { %v7050_v0 = vmul.f32 %v5665_v31, %v3231_v24 }
 0x280   : > { %4039 = vmatpush.bf16.msrb.mxu0 %v8862_v60  ;;  %v5220_v60 = vld [vmem:[%s8703_s5 + $0x258] sm:$0xff] }
 0x281   : > { %8871 = vst [vmem:[#allocation47_spill] sm:$0xff] %v7050_v0 }
 0x282   : > { %v7021_v6 = vpop.f32.mrf.mxu2  ;;  %v2372_v56 = vpop.f32.mrf.mxu3 }
 0x283   : > { %v2720_v53 = vpack.c.bf16 %v2372_v56, %v2372_v56  ;;  %v7029_v14 = vpop.f32.mrf.mxu0  ;;  %v7031_v25 = vpop.f32.mrf.mxu1  ;;  %v7046_v56 = vmul.f32 %v5410_v23, %v3104_v26  ;;  %v5847_v23 = vld [vmem:[%s8704_s6 + $0x1e8] sm:$0xff]  }
 0x284   : > { %4040 = vmatpush.bf16.msrb.mxu0 %v8865_v59  ;;  %v8867_v59 = vld [vmem:[#allocation13_spill] sm:$0xff] }
 0x285   : > { %v3232_v18 = vunpack.c.l.bf16 %v2720_v53  ;;  %v8868_v2 = vpack.c.bf16 %v8866_v43, %v8867_v59  ;;  %8870 = vst [vmem:[#allocation13_spill] sm:$0xff] %v7046_v56  ;;  %v8874_v43 = vld [vmem:[#allocation20_spill] sm:$0xff]  ;;  %v2593_v59 = vpack.c.bf16 %v6820_v54, %v6820_v54 }
 0x286   : > { %5017 = vmatmul.msk.bf16.gmra.mxu0 %vm1487_vm6, %v5164_v34  ;;  %5043 = vmatmul.msk.bf16.gmra.mxu1 %vm1487_vm6, %v5190_v33  ;;  %v2648_v38 = vpack.c.bf16 %v8874_v43, %v8874_v43  ;;  %v5820_v43 = vld [vmem:[%s8704_s6 + $0x110] sm:$0xff]  }
 0x287   : > { %v7052_v28 = vmul.f32 %v5666_v62, %v3232_v18  ;;  %5073 = vmatmul.msk.bf16.gmra.mxu2 %vm1487_vm6, %v5220_v60  ;;  %5104 = vmatmul.msk.bf16.gmra.mxu3 %vm1487_vm6, %v5251_v29  ;;  %v5521_v62 = vunpack.c.l.bf16 %v5847_v23  ;;  %v5522_v29 = vunpack.c.h.bf16 %v5847_v23  ;;  %v3105_v23 = vunpack.c.l.bf16 %v2593_v59 }
 0x288   : > { %4041 = vmatpush.bf16.msrb.mxu0 %v8868_v2  ;;  %v8873_v2 = vld [vmem:[#allocation19_spill] sm:$0xff]  ;;  %v3160_v18 = vunpack.c.l.bf16 %v2648_v38  ;;  %v5413_v38 = vunpack.c.l.bf16 %v5820_v43  ;;  %v5414_v30 = vunpack.c.h.bf16 %v5820_v43  ;;  %v5252_v43 = vld [vmem:[%s8703_s5 + $0x358] sm:$0xff] }
 0x289   : > { %8872 = vst [vmem:[#allocation48_spill] sm:$0xff] %v7052_v28  ;;  %v2647_v53 = vpack.c.bf16 %v8873_v2, %v8873_v2  ;;  %v2594_v2 = vpack.c.bf16 %v6861_v17, %v6861_v17 }
 0x28a   : > { %v7065_v26 = vpop.f32.mrf.mxu2  ;;  %v2375_v34 = vpop.f32.mrf.mxu3  ;;  %v7107_v15 = vmul.f32 %v5413_v38, %v3105_v23  ;;  %v2650_v38 = vpack.c.bf16 %v8882_v1, %v8882_v1  ;;  %v5885_v23 = vld [vmem:[%s8704_s6 + $0x318] sm:$0xff]  }
 0x28b   : > { %v7069_v31 = vpop.f32.mrf.mxu0  ;;  %v7071_v24 = vpop.f32.mrf.mxu1  ;;  %v3159_v60 = vunpack.c.l.bf16 %v2647_v53  ;;  %v2721_v51 = vpack.c.bf16 %v2375_v34, %v2375_v34  ;;  %v7085_v53 = vmul.f32 %v5522_v29, %v3160_v18  ;;  %v3106_v54 = vunpack.c.l.bf16 %v2594_v2  ;;  %v5191_v34 = vld [vmem:[%s8703_s5 + $0x170] sm:$0xff]  ;;  %v5221_v2 = vld [vmem:[%s8703_s5 + $0x260] sm:$0xff] }
 0x28c   : > { %v5670_v29 = vunpack.c.h.bf16 %v5884_v50  ;;  %8877 = vst [vmem:[#allocation49_spill] sm:$0xff] %v7107_v15  ;;  %v5673_v32 = vunpack.c.l.bf16 %v5885_v23 }
 0x28d   : > { %v7083_v63 = vmul.f32 %v5521_v62, %v3159_v60  ;;  %8876 = vst [vmem:[#allocation20_spill] sm:$0xff] %v7085_v53  ;;  %v3233_v62 = vunpack.c.l.bf16 %v2721_v51  ;;  %v7109_v51 = vmul.f32 %v5414_v30, %v3106_v54  ;;  %v5821_v30 = vld [vmem:[%s8704_s6 + $0x118] sm:$0xff]  }
 0x28f   : > { %8875 = vst [vmem:[#allocation19_spill] sm:$0xff] %v7083_v63  ;;  %v7113_v50 = vmul.f32 %v5669_v61, %v3233_v62  ;;  %v2653_v63 = vpack.c.bf16 %v6857_v11, %v6857_v11 }
 0x290   : > { %8878 = vst [vmem:[#allocation50_spill] sm:$0xff] %v7109_v51  ;;  %v5195_v51 = vld [vmem:[%s8703_s5 + $0x190] sm:$0xff] }
 0x291   : > { %8879 = vst [vmem:[#allocation51_spill] sm:$0xff] %v7113_v50 }
 0x292   : > { %v7087_v58 = vpop.f32.mrf.mxu2  ;;  %v2377_v17 = vpop.f32.mrf.mxu3 }
 0x293   : > { %v2722_v60 = vpack.c.bf16 %v2377_v17, %v2377_v17  ;;  %v7095_v18 = vpop.f32.mrf.mxu0  ;;  %v7097_v59 = vpop.f32.mrf.mxu1 }
 0x295   : > { %v3234_v33 = vunpack.c.l.bf16 %v2722_v60  ;;  %v8881_v60 = vld [vmem:[#allocation23_spill] sm:$0xff] }
 0x296   : > { %5018 = vmatmul.msk.bf16.gmra.mxu0 %vm1487_vm6, %v5165_v22  ;;  %5044 = vmatmul.msk.bf16.gmra.mxu1 %vm1487_vm6, %v5191_v34  ;;  %v2649_v0 = vpack.c.bf16 %v8881_v60, %v8881_v60  ;;  %v5848_v22 = vld [vmem:[%s8704_s6 + $0x1f0] sm:$0xff]   ;;  %v2596_v60 = vpack.c.bf16 %v6924_v12, %v6924_v12 }
 0x297   : > { %v7115_v17 = vmul.f32 %v5670_v29, %v3234_v33  ;;  %5074 = vmatmul.msk.bf16.gmra.mxu2 %vm1487_vm6, %v5221_v2  ;;  %5105 = vmatmul.msk.bf16.gmra.mxu3 %vm1487_vm6, %v5252_v43  ;;  %v5525_v62 = vunpack.c.l.bf16 %v5848_v22  ;;  %v5526_v1 = vunpack.c.h.bf16 %v5848_v22  ;;  %v3162_v2 = vunpack.c.l.bf16 %v2650_v38 }
 0x298   : > { %v3161_v29 = vunpack.c.l.bf16 %v2649_v0  ;;  %v2595_v43 = vpack.c.bf16 %v6887_v3, %v6887_v3  ;;  %v5417_v38 = vunpack.c.l.bf16 %v5821_v30  ;;  %v3108_v3 = vunpack.c.l.bf16 %v2596_v60  ;;  %v5253_v60 = vld [vmem:[%s8703_s5 + $0x360] sm:$0xff] }
 0x299   : > { %8880 = vst [vmem:[#allocation52_spill] sm:$0xff] %v7115_v17  ;;  %v7148_v0 = vmul.f32 %v5526_v1, %v3162_v2  ;;  %v5418_v17 = vunpack.c.h.bf16 %v5821_v30  ;;  %v5674_v1 = vunpack.c.h.bf16 %v5885_v23  ;;  %v5222_v30 = vld [vmem:[%s8703_s5 + $0x268] sm:$0xff] }
 0x29a   : > { %v7128_v61 = vpop.f32.mrf.mxu2  ;;  %v2380_v33 = vpop.f32.mrf.mxu3  ;;  %v7146_v50 = vmul.f32 %v5525_v62, %v3161_v29  ;;  %v3107_v22 = vunpack.c.l.bf16 %v2595_v43 }
 0x29b   : > { %v7132_v54 = vpop.f32.mrf.mxu0  ;;  %v7134_v34 = vpop.f32.mrf.mxu1  ;;  %v2723_v28 = vpack.c.bf16 %v2380_v33, %v2380_v33  ;;  %8884 = vst [vmem:[#allocation26_spill] sm:$0xff] %v7148_v0  ;;  %v5192_v33 = vld [vmem:[%s8703_s5 + $0x178] sm:$0xff] }
 0x29c   : > { %8883 = vst [vmem:[#allocation23_spill] sm:$0xff] %v7146_v50  ;;  %v7170_v47 = vmul.f32 %v5417_v38, %v3107_v22  ;;  %v2654_v50 = vpack.c.bf16 %v6877_v19, %v6877_v19 }
 0x29d   : > { %v3235_v62 = vunpack.c.l.bf16 %v2723_v28  ;;  %v7172_v28 = vmul.f32 %v5418_v17, %v3108_v3  ;;  %v5822_v3 = vld [vmem:[%s8704_s6 + $0x120] sm:$0xff]  }
 0x29f   : > { %v7176_v23 = vmul.f32 %v5673_v32, %v3235_v62  ;;  %v2597_v32 = vpack.c.bf16 %v6956_v39, %v6956_v39  ;;  %v5886_v62 = vld [vmem:[%s8704_s6 + $0x320] sm:$0xff]  }
 0x2a0   : > { %v7212_v39 = vld [vmem:[%s8704_s6 + $0x200] sm:$0xff]   ;;  %v5677_v8 = vunpack.c.l.bf16 %v5886_v62  ;;  %v5678_v45 = vunpack.c.h.bf16 %v5886_v62  ;;  %v5851_v62 = vld [vmem:[%s8704_s6 + $0x208] sm:$0xff]  }
 0x2a1   : > { %8885 = vst [vmem:[#allocation53_spill] sm:$0xff] %v7176_v23  ;;  %v5534_v0 = vunpack.c.h.bf16 %v7212_v39 }
 0x2a2   : > { %v7150_v21 = vpop.f32.mrf.mxu2  ;;  %v2382_v12 = vpop.f32.mrf.mxu3 }
 0x2a3   : > { %v2724_v29 = vpack.c.bf16 %v2382_v12, %v2382_v12  ;;  %v7158_v2 = vpop.f32.mrf.mxu0  ;;  %v7160_v43 = vpop.f32.mrf.mxu1 }
 0x2a5   : > { %v3236_v44 = vunpack.c.l.bf16 %v2724_v29 }
 0x2a6   : > { %5019 = vmatmul.msk.bf16.gmra.mxu0 %vm1487_vm6, %v5166_v52  ;;  %5045 = vmatmul.msk.bf16.gmra.mxu1 %vm1487_vm6, %v5192_v33 }
 0x2a7   : > { %v7178_v12 = vmul.f32 %v5674_v1, %v3236_v44  ;;  %5075 = vmatmul.msk.bf16.gmra.mxu2 %vm1487_vm6, %v5222_v30  ;;  %5106 = vmatmul.msk.bf16.gmra.mxu3 %vm1487_vm6, %v5253_v60  ;;  %v2598_v44 = vpack.c.bf16 %v6999_v35, %v6999_v35  ;;  %v2541_v1 = vpack.c.bf16 %v6818_v7, %v6818_v7  ;;  %v7207_v30 = vld [vmem:[%s8704_s6 + $0x40] sm:$0xff]   ;;  %v5421_v35 = vunpack.c.l.bf16 %v5822_v3  ;;  %v5167_v7 = vld [vmem:[%s8703_s5 + $0xb0] sm:$0xff] }
 0x2a8   : > { %v3109_v60 = vunpack.c.l.bf16 %v2597_v32  ;;  %v5309_v4 = vunpack.c.l.bf16 %v7207_v30 }
 0x2a9   : > { %8886 = vst [vmem:[#allocation54_spill] sm:$0xff] %v7178_v12  ;;  %v3110_v29 = vunpack.c.l.bf16 %v2598_v44  ;;  %v5193_v12 = vld [vmem:[%s8703_s5 + $0x180] sm:$0xff]  ;;  %v5223_v44 = vld [vmem:[%s8703_s5 + $0x270] sm:$0xff]  ;;  %v3053_v10 = vunpack.c.l.bf16 %v2541_v1  ;;  %v3165_v1 = vunpack.c.l.bf16 %v2653_v63 }
 0x2aa   : > { %v7184_v27 = vpop.f32.mrf.mxu2  ;;  %v2385_v38 = vpop.f32.mrf.mxu3  ;;  %v7247_v20 = vmul.f32 %v5421_v35, %v3109_v60  ;;  %v2545_v35 = vpack.c.bf16 %v6954_v42, %v6954_v42 }
 0x2ab   : > { %8887 = vst [vmem:[#allocation55_spill] sm:$0xff] %v7184_v27  ;;  %v7188_v52 = vpop.f32.mrf.mxu0  ;;  %v7190_v22 = vpop.f32.mrf.mxu1  ;;  %v2725_v33 = vpack.c.bf16 %v2385_v38, %v2385_v38  ;;  %v5422_v38 = vunpack.c.h.bf16 %v5822_v3  ;;  %v5254_v3 = vld [vmem:[%s8703_s5 + $0x368] sm:$0xff] }
 0x2ad   : > { %v3237_v9 = vunpack.c.l.bf16 %v2725_v33  ;;  %v7239_v33 = vld [vmem:[%s8704_s6 + $0x48] sm:$0xff]   ;;  %v7249_v11 = vmul.f32 %v5422_v38, %v3110_v29  ;;  %v2655_v29 = vpack.c.bf16 %v6920_v16, %v6920_v16  ;;  %v5797_v16 = vld [vmem:[%s8704_s6 + $0x58] sm:$0xff]   ;;  %v7288_v38 = vmul.f32 %v5309_v4, %v3053_v10 }
 0x2ae   : > { %v5313_v19 = vunpack.c.l.bf16 %v7239_v33  ;;  %v3168_v4 = vunpack.c.l.bf16 %v2656_v57 }
 0x2af   : > { %v7255_v55 = vmul.f32 %v5677_v8, %v3237_v9  ;;  %v2547_v8 = vpack.c.bf16 %v7029_v14, %v7029_v14  ;;  %v2542_v9 = vpack.c.bf16 %v6859_v48, %v6859_v48  ;;  %v2548_v14 = vpack.c.bf16 %v7069_v31, %v7069_v31 }
 0x2b0   : > { %v3167_v42 = vunpack.c.l.bf16 %v2655_v29  ;;  %v2544_v31 = vpack.c.bf16 %v6922_v13, %v6922_v13  ;;  %v3057_v29 = vunpack.c.l.bf16 %v2545_v35  ;;  %v2600_v13 = vpack.c.bf16 %v7071_v24, %v7071_v24 }
 0x2b1   : > { %8889 = vst [vmem:[#allocation57_spill] sm:$0xff] %v7255_v55  ;;  %v3059_v55 = vunpack.c.l.bf16 %v2547_v8  ;;  %v7300_v10 = vunpack.c.l.bf16 %v2542_v9  ;;  %v5425_v9 = vunpack.c.l.bf16 %v5823_v40 }
 0x2b2   : > { %v7214_v17 = vpop.f32.mrf.mxu2  ;;  %v2387_v23 = vpop.f32.mrf.mxu3 }
 0x2b3   : > { %8888 = vst [vmem:[#allocation56_spill] sm:$0xff] %v7214_v17  ;;  %v2726_v5 = vpack.c.bf16 %v2387_v23, %v2387_v23  ;;  %v7222_v36 = vpop.f32.mrf.mxu0  ;;  %v7224_v32 = vpop.f32.mrf.mxu1  ;;  %v5533_v23 = vunpack.c.l.bf16 %v7212_v39  ;;  %v5537_v39 = vunpack.c.l.bf16 %v5851_v62  ;;  %v7367_v17 = vld [vmem:[%s8704_s6 + $0x68] sm:$0xff]  }
 0x2b5   : > { %v3238_v53 = vunpack.c.l.bf16 %v2726_v5  ;;  %v7317_v57 = vmul.f32 %v5537_v39, %v3167_v42 }
 0x2b6   : > { %5020 = vmatmul.msk.bf16.gmra.mxu0 %vm1487_vm6, %v5167_v7  ;;  %5046 = vmatmul.msk.bf16.gmra.mxu1 %vm1487_vm6, %v5193_v12  ;;  %v7267_v12 = vld [vmem:[%s8704_s6 + $0x50] sm:$0xff]   ;;  %v3166_v7 = vunpack.c.l.bf16 %v2654_v50  ;;  %v2599_v50 = vpack.c.bf16 %v7031_v25, %v7031_v25  ;;  %v3056_v25 = vunpack.c.l.bf16 %v2544_v31 }
 0x2b7   : > { %v7257_v5 = vmul.f32 %v5678_v45, %v3238_v53  ;;  %5076 = vmatmul.msk.bf16.gmra.mxu2 %vm1487_vm6, %v5223_v44  ;;  %5107 = vmatmul.msk.bf16.gmra.mxu3 %vm1487_vm6, %v5254_v3  ;;  %v5538_v45 = vunpack.c.h.bf16 %v5851_v62  ;;  %v3055_v44 = vunpack.c.l.bf16 %v2543_v49  ;;  %v5317_v3 = vunpack.c.l.bf16 %v7267_v12  ;;  %8894 = vst [vmem:[#allocation62_spill] sm:$0xff] %v7317_v57 }
 0x2b8   : > { %v5321_v53 = vunpack.c.l.bf16 %v5797_v16  ;;  %v2546_v49 = vpack.c.bf16 %v6997_v46, %v6997_v46  ;;  %v7310_v8 = vmul.f32 %v5534_v0, %v3166_v7  ;;  %v5887_v46 = vld [vmem:[%s8704_s6 + $0x328] sm:$0xff]   ;;  %v3111_v24 = vunpack.c.l.bf16 %v2599_v50  ;;  %v5224_v50 = vld [vmem:[%s8703_s5 + $0x278] sm:$0xff] }
 0x2b9   : > { %8890 = vst [vmem:[#allocation58_spill] sm:$0xff] %v7257_v5  ;;  %v7306_v5 = vmul.f32 %v5533_v23, %v3165_v1  ;;  %v7312_v37 = vmul.f32 %v5313_v19, %v3055_v44  ;;  %v5322_v1 = vunpack.c.h.bf16 %v5797_v16  ;;  %v7321_v35 = vmul.f32 %v5538_v45, %v3168_v4  ;;  %v7326_v19 = vld [vmem:[%s8704_s6 + $0x60] sm:$0xff]   ;;  %v5194_v7 = vld [vmem:[%s8703_s5 + $0x188] sm:$0xff] }
 0x2ba   : > { %v7284_v60 = vpop.f32.mrf.mxu2  ;;  %v2390_v48 = vpop.f32.mrf.mxu3  ;;  %8893 = vst [vmem:[#allocation61_spill] sm:$0xff] %v7310_v8  ;;  %v7319_v23 = vmul.f32 %v5321_v53, %v3059_v55  ;;  %v5426_v0 = vunpack.c.h.bf16 %v5823_v40  ;;  %v7333_v39 = vmul.f32 %v5317_v3, %v3057_v29  ;;  %v3112_v55 = vunpack.c.l.bf16 %v2600_v13  ;;  %v5168_v40 = vld [vmem:[%s8703_s5 + $0xb8] sm:$0xff]  ;;  %v5255_v29 = vld [vmem:[%s8703_s5 + $0x370] sm:$0xff] }
 0x2bb   : > { %8891 = vst [vmem:[#allocation59_spill] sm:$0xff] %v7284_v60  ;;  %v7291_v62 = vpop.f32.mrf.mxu0  ;;  %v7293_v63 = vpop.f32.mrf.mxu1  ;;  %v3060_v60 = vunpack.c.l.bf16 %v2548_v14  ;;  %v2727_v56 = vpack.c.bf16 %v2390_v48, %v2390_v48  ;;  %v3058_v14 = vunpack.c.l.bf16 %v2546_v49  ;;  %v7331_v48 = vld [vmem:[%s8704_s6 + $0x130] sm:$0xff]   ;;  %v5681_v53 = vunpack.c.l.bf16 %v5887_v46 }
 0x2bc   : > { %8892 = vst [vmem:[#allocation60_spill] sm:$0xff] %v7306_v5  ;;  %v5682_v4 = vunpack.c.h.bf16 %v5887_v46  ;;  %v5318_v13 = vunpack.c.h.bf16 %v7267_v12  ;;  %v7371_v27 = vmul.f32 %v5426_v0, %v3112_v55  ;;  %v5801_v0 = vld [vmem:[%s8704_s6 + $0x78] sm:$0xff]   ;;  %v5314_v55 = vunpack.c.h.bf16 %v7239_v33 }
 0x2bd   : > { %8895 = vst [vmem:[#allocation63_spill] sm:$0xff] %v7321_v35  ;;  %v7343_v44 = vmul.f32 %v5322_v1, %v3060_v60  ;;  %v3239_v42 = vunpack.c.l.bf16 %v2727_v56  ;;  %v2601_v56 = vpack.c.bf16 %v7097_v59, %v7097_v59  ;;  %v5429_v60 = vunpack.c.l.bf16 %v7331_v48 }
 0x2be   : > { %v7360_v1 = vmul.f32 %v5425_v9, %v3111_v24  ;;  %v5430_v59 = vunpack.c.h.bf16 %v7331_v48  ;;  %v5800_v9 = vld [vmem:[%s8704_s6 + $0x70] sm:$0xff]   ;;  %v5337_v33 = vunpack.c.l.bf16 %v5801_v0 }
 0x2bf   : > { %v7381_v46 = vmul.f32 %v5681_v53, %v3239_v42  ;;  %v2553_v53 = vpack.c.bf16 %v7222_v36, %v7222_v36  ;;  %v2554_v42 = vpack.c.bf16 %v7291_v62, %v7291_v62  ;;  %v2552_v62 = vpack.c.bf16 %v7188_v52, %v7188_v52 }
 0x2c0   : > { %v2550_v36 = vpack.c.bf16 %v7132_v54, %v7132_v54  ;;  %v5888_v54 = vld [vmem:[%s8704_s6 + $0x330] sm:$0xff]  }
 0x2c1   : > { %8897 = vst [vmem:[#allocation65_spill] sm:$0xff] %v7381_v46  ;;  %v3066_v48 = vunpack.c.l.bf16 %v2554_v42  ;;  %v5334_v46 = vunpack.c.h.bf16 %v5800_v9  ;;  %v3064_v42 = vunpack.c.l.bf16 %v2552_v62 }
 0x2c2   : > { %v7335_v16 = vpop.f32.mrf.mxu2  ;;  %v2392_v45 = vpop.f32.mrf.mxu3 }
 0x2c3   : > { %8896 = vst [vmem:[#allocation64_spill] sm:$0xff] %v7335_v16  ;;  %v2728_v31 = vpack.c.bf16 %v2392_v45, %v2392_v45  ;;  %v1960_v3 = vpop.f32.mrf.mxu0  ;;  %v7345_v49 = vpop.f32.mrf.mxu1  ;;  %v2602_v45 = vpack.c.bf16 %v7134_v34, %v7134_v34  ;;  %v7369_v16 = vmul.f32 %v5318_v13, %v3058_v14 }
 0x2c4   : > { %v2555_v24 = vpack.c.bf16 %v1960_v3, %v1960_v3  ;;  %v7398_v3 = vmul.f32 %v5314_v55, %v3056_v25  ;;  %v5338_v25 = vunpack.c.h.bf16 %v5801_v0 }
 0x2c5   : > { %v3240_v12 = vunpack.c.l.bf16 %v2728_v31  ;;  %v3114_v31 = vunpack.c.l.bf16 %v2602_v45 }
 0x2c6   : > { %5021 = vmatmul.msk.bf16.gmra.mxu0 %vm1487_vm6, %v5168_v40  ;;  %5047 = vmatmul.msk.bf16.gmra.mxu1 %vm1487_vm6, %v5194_v7  ;;  %v3113_v40 = vunpack.c.l.bf16 %v2601_v56  ;;  %v5329_v7 = vunpack.c.l.bf16 %v7367_v17  ;;  %v3067_v13 = vunpack.c.l.bf16 %v2555_v24 }
 0x2c7   : > { %v7383_v14 = vmul.f32 %v5682_v4, %v3240_v12  ;;  %5077 = vmatmul.msk.bf16.gmra.mxu2 %vm1487_vm6, %v5224_v50  ;;  %5108 = vmatmul.msk.bf16.gmra.mxu3 %vm1487_vm6, %v5255_v29  ;;  %v5333_v4 = vunpack.c.l.bf16 %v5800_v9  ;;  %v2551_v29 = vpack.c.bf16 %v7158_v2, %v7158_v2  ;;  %v5310_v50 = vunpack.c.h.bf16 %v7207_v30  ;;  %v5857_v30 = vld [vmem:[%s8704_s6 + $0x238] sm:$0xff]  }
 0x2c8   : > { %v3065_v2 = vunpack.c.l.bf16 %v2553_v53  ;;  %v7420_v0 = vmul.f32 %v5429_v60, %v3113_v40  ;;  %v3579_v55 = vmul.f32 %v5337_v33, %v3067_v13  ;;  %v7425_v9 = vmul.f32 %v5430_v59, %v3114_v31 }
 0x2c9   : > { %8898 = vst [vmem:[#allocation66_spill] sm:$0xff] %v7383_v14  ;;  %v2549_v14 = vpack.c.bf16 %v7095_v18, %v7095_v18  ;;  %v7418_v5 = vmul.f32 %v5310_v50, %v7300_v10  ;;  %v3063_v8 = vunpack.c.l.bf16 %v2551_v29  ;;  %v3578_v50 = vmul.f32 %v5334_v46, %v3066_v48 }
 0x2ca   : > { %v2240_v56 = vpop.f32.mrf.mxu2  ;;  %v2395_v12 = vpop.f32.mrf.mxu3  ;;  %v3577_v60 = vmul.f32 %v5333_v4, %v3065_v2  ;;  %v5330_v29 = vunpack.c.h.bf16 %v7367_v17  ;;  %v3062_v13 = vunpack.c.l.bf16 %v2550_v36  ;;  %v5685_v31 = vunpack.c.l.bf16 %v5888_v54 }
 0x2cb   : > { %v1962_v45 = vpop.f32.mrf.mxu0  ;;  %v7408_v34 = vpop.f32.mrf.mxu1  ;;  %v2667_v52 = vpack.c.bf16 %v2240_v56, %v2240_v56  ;;  %v2729_v18 = vpack.c.bf16 %v2395_v12, %v2395_v12  ;;  %v3061_v33 = vunpack.c.l.bf16 %v2549_v14  ;;  %v5561_v56 = vunpack.c.l.bf16 %v5857_v30  ;;  %v5256_v14 = vld [vmem:[%s8703_s5 + $0x378] sm:$0xff] }
 0x2cc   : > { %v2556_v24 = vpack.c.bf16 %v1962_v45, %v1962_v45  ;;  %v3575_v59 = vmul.f32 %v5329_v7, %v3063_v8  ;;  %v5562_v12 = vunpack.c.h.bf16 %v5857_v30  ;;  %v5686_v46 = vunpack.c.h.bf16 %v5888_v54  ;;  %v5225_v8 = vld [vmem:[%s8703_s5 + $0x280] sm:$0xff] }
 0x2cd   : > { %v3179_v45 = vunpack.c.l.bf16 %v2667_v52  ;;  %v3241_v10 = vunpack.c.l.bf16 %v2729_v18  ;;  %v3819_v7 = vpack.c.bf16 %v3578_v50, %v3577_v60  ;;  %v3576_v36 = vmul.f32 %v5330_v29, %v3064_v42 }
 0x2ce   : > { %v3068_v53 = vunpack.c.l.bf16 %v2556_v24  ;;  %v3843_v2 = vpack.c.bf16 %v7425_v9, %v7420_v0  ;;  %v8901_v42 = vunpack.c.l.bf16 %v7326_v19  ;;  %v2661_v0 = vpack.c.bf16 %v7128_v61, %v7128_v61 }
 0x2cf   : > { %v7449_v52 = vmul.f32 %v5561_v56, %v3179_v45  ;;  %v7454_v54 = vmul.f32 %v5685_v31, %v3241_v10  ;;  %v3818_v50 = vpack.c.bf16 %v3576_v36, %v3575_v59  ;;  %v2657_v56 = vpack.c.bf16 %v6993_v41, %v6993_v41  ;;  %v5199_v10 = vld [vmem:[%s8703_s5 + $0x1b0] sm:$0xff] }
 0x2d0   : > { %v3580_v40 = vmul.f32 %v5338_v25, %v3068_v53  ;;  %v3573_v60 = vmul.f32 %v8901_v42, %v3061_v33  ;;  %v2604_v36 = vpack.c.bf16 %v7190_v22, %v7190_v22  ;;  %v5257_v22 = vld [vmem:[%s8703_s5 + $0x380] sm:$0xff]  ;;  %v2662_v9 = vpack.c.bf16 %v7150_v21, %v7150_v21 }
 0x2d1   : > { %8899 = vst [vmem:[#allocation67_spill] sm:$0xff] %v7454_v54 }
 0x2d2   : > { %v2242_v62 = vpop.f32.mrf.mxu2  ;;  %v2397_v24 = vpop.f32.mrf.mxu3  ;;  %v3820_v15 = vpack.c.bf16 %v3580_v40, %v3579_v55  ;;  %v5326_v55 = vunpack.c.h.bf16 %v7326_v19  ;;  %v5852_v19 = vld [vmem:[%s8704_s6 + $0x210] sm:$0xff]  }
 0x2d3   : > { %v2668_v4 = vpack.c.bf16 %v2242_v62, %v2242_v62  ;;  %v2730_v25 = vpack.c.bf16 %v2397_v24, %v2397_v24  ;;  %v7436_v48 = vpop.f32.mrf.mxu0  ;;  %v7438_v17 = vpop.f32.mrf.mxu1  ;;  %v3169_v62 = vunpack.c.l.bf16 %v2657_v56 }
 0x2d4   : > { %4010 = vmatpush.bf16.msrb.mxu1 %v3820_v15  ;;  %v3574_v29 = vmul.f32 %v5326_v55, %v3062_v13 }
 0x2d5   : > { %v3180_v30 = vunpack.c.l.bf16 %v2668_v4  ;;  %v3242_v53 = vunpack.c.l.bf16 %v2730_v25  ;;  %v5889_v25 = vld [vmem:[%s8704_s6 + $0x338] sm:$0xff]  }
 0x2d6   : > { %5048 = vmatmul.msk.bf16.gmra.mxu1 %vm1487_vm6, %v5195_v51  ;;  %v2658_v51 = vpack.c.bf16 %v7021_v6, %v7021_v6  ;;  %v3817_v41 = vpack.c.bf16 %v3574_v29, %v3573_v60  ;;  %v5541_v6 = vunpack.c.l.bf16 %v5852_v19  ;;  %v5689_v42 = vunpack.c.l.bf16 %v5889_v25 }
 0x2d7   : > { %v7456_v40 = vmul.f32 %v5562_v12, %v3180_v30  ;;  %v7458_v15 = vmul.f32 %v5686_v46, %v3242_v53  ;;  %5078 = vmatmul.msk.bf16.gmra.mxu2 %vm1487_vm6, %v5225_v8  ;;  %5109 = vmatmul.msk.bf16.gmra.mxu3 %vm1487_vm6, %v5256_v14  ;;  %v5542_v12 = vunpack.c.h.bf16 %v5852_v19  ;;  %v2603_v14 = vpack.c.bf16 %v7160_v43, %v7160_v43  ;;  %v5196_v53 = vld [vmem:[%s8703_s5 + $0x198] sm:$0xff] }
 0x2d8   : > { %4011 = vmatpush.bf16.msrb.mxu1 %v3819_v7  ;;  %v3170_v24 = vunpack.c.l.bf16 %v2658_v51  ;;  %v7484_v46 = vmul.f32 %v5541_v6, %v3169_v62  ;;  %v5825_v7 = vld [vmem:[%s8704_s6 + $0x138] sm:$0xff]   ;;  %v5690_v29 = vunpack.c.h.bf16 %v5889_v25  ;;  %v5226_v51 = vld [vmem:[%s8703_s5 + $0x288] sm:$0xff]  ;;  %v3116_v62 = vunpack.c.l.bf16 %v2604_v36 }
 0x2d9   : > { %8900 = vst [vmem:[#allocation68_spill] sm:$0xff] %v7458_v15  ;;  %v5433_v19 = vunpack.c.l.bf16 %v5825_v7  ;;  %v3115_v6 = vunpack.c.l.bf16 %v2603_v14  ;;  %v5853_v14 = vld [vmem:[%s8704_s6 + $0x218] sm:$0xff]  }
 0x2da   : > { %v7475_v33 = vpop.f32.mrf.mxu2  ;;  %v2400_v59 = vpop.f32.mrf.mxu3  ;;  %8902 = vst [vmem:[#allocation69_spill] sm:$0xff] %v7484_v46  ;;  %v7486_v8 = vmul.f32 %v5542_v12, %v3170_v24  ;;  %v5828_v24 = vld [vmem:[%s8704_s6 + $0x150] sm:$0xff]  }
 0x2db   : > { %v7477_v13 = vpop.f32.mrf.mxu0  ;;  %v7479_v31 = vpop.f32.mrf.mxu1  ;;  %v2731_v4 = vpack.c.bf16 %v2400_v59, %v2400_v59  ;;  %v5434_v59 = vunpack.c.h.bf16 %v5825_v7  ;;  %v2660_v7 = vpack.c.bf16 %v7087_v58, %v7087_v58  ;;  %v3627_v36 = vmul.f32 %v5433_v19, %v3115_v6 }
 0x2dc   : > { %4012 = vmatpush.bf16.msrb.mxu1 %v3818_v50  ;;  %8903 = vst [vmem:[#allocation70_spill] sm:$0xff] %v7486_v8  ;;  %v2605_v19 = vpack.c.bf16 %v7224_v32, %v7224_v32  ;;  %v5169_v32 = vld [vmem:[%s8703_s5 + $0xc0] sm:$0xff]  ;;  %v2610_v18 = vpack.c.bf16 %v7479_v31, %v7479_v31 }
 0x2dd   : > { %v3243_v60 = vunpack.c.l.bf16 %v2731_v4  ;;  %v3172_v58 = vunpack.c.l.bf16 %v2660_v7  ;;  %5022 = vmatmul.msk.bf16.gmra.mxu0 %vm1487_vm6, %v5169_v32  ;;  %v5854_v32 = vld [vmem:[%s8704_s6 + $0x220] sm:$0xff]  }
 0x2df   : > { %v7516_v4 = vmul.f32 %v5689_v42, %v3243_v60 }
 0x2e0   : > { %4013 = vmatpush.bf16.msrb.mxu1 %v3817_v41  ;;  %v8904_v41 = vpack.c.bf16 %v7343_v44, %v7319_v23  ;;  %v2659_v23 = vpack.c.bf16 %v7065_v26, %v7065_v26  ;;  %v8907_v44 = vpack.c.bf16 %v7369_v16, %v7333_v39  ;;  %v5545_v39 = vunpack.c.l.bf16 %v5853_v14 }
 0x2e1   : > { %8905 = vst [vmem:[#allocation71_spill] sm:$0xff] %v7516_v4  ;;  %v8908_v16 = vpack.c.bf16 %v7398_v3, %v7312_v37  ;;  %v5890_v37 = vld [vmem:[%s8704_s6 + $0x340] sm:$0xff]   ;;  %v8909_v3 = vpack.c.bf16 %v7418_v5, %v7288_v38  ;;  %v5200_v4 = vld [vmem:[%s8703_s5 + $0x1b8] sm:$0xff] }
 0x2e2   : > { %v7495_v55 = vpop.f32.mrf.mxu2  ;;  %v2402_v30 = vpop.f32.mrf.mxu3  ;;  %v5197_v5 = vld [vmem:[%s8703_s5 + $0x1a0] sm:$0xff]  ;;  %v5693_v38 = vunpack.c.l.bf16 %v5890_v37 }
 0x2e3   : > { %v2732_v50 = vpack.c.bf16 %v2402_v30, %v2402_v30  ;;  %v7500_v56 = vpop.f32.mrf.mxu0  ;;  %v7502_v43 = vpop.f32.mrf.mxu1  ;;  %v3628_v30 = vmul.f32 %v5434_v59, %v3116_v62  ;;  %v2606_v59 = vpack.c.bf16 %v7293_v63, %v7293_v63 }
 0x2e4   : > { %4014 = vmatpush.bf16.msrb.mxu1 %v8904_v41  ;;  %v5826_v41 = vld [vmem:[%s8704_s6 + $0x140] sm:$0xff]  }
 0x2e5   : > { %v3244_v12 = vunpack.c.l.bf16 %v2732_v50 }
 0x2e6   : > { %5049 = vmatmul.msk.bf16.gmra.mxu1 %vm1487_vm6, %v5196_v53 }
 0x2e7   : > { %v7518_v25 = vmul.f32 %v5690_v29, %v3244_v12  ;;  %5079 = vmatmul.msk.bf16.gmra.mxu2 %vm1487_vm6, %v5226_v51  ;;  %5110 = vmatmul.msk.bf16.gmra.mxu3 %vm1487_vm6, %v5257_v22  ;;  %v3171_v29 = vunpack.c.l.bf16 %v2659_v23  ;;  %v5546_v51 = vunpack.c.h.bf16 %v5853_v14  ;;  %v3844_v22 = vpack.c.bf16 %v3628_v30, %v3627_v36 }
 0x2e8   : > { %4015 = vmatpush.bf16.msrb.mxu1 %v8907_v44  ;;  %v5437_v12 = vunpack.c.l.bf16 %v5826_v41  ;;  %v3117_v23 = vunpack.c.l.bf16 %v2605_v19  ;;  %v5438_v44 = vunpack.c.h.bf16 %v5826_v41  ;;  %v3118_v14 = vunpack.c.l.bf16 %v2606_v59 }
 0x2e9   : > { %8906 = vst [vmem:[#allocation72_spill] sm:$0xff] %v7518_v25  ;;  %v7559_v62 = vmul.f32 %v5545_v39, %v3171_v29  ;;  %v7561_v63 = vmul.f32 %v5546_v51, %v3172_v58  ;;  %v5694_v39 = vunpack.c.h.bf16 %v5890_v37  ;;  %v5227_v51 = vld [vmem:[%s8703_s5 + $0x290] sm:$0xff]  ;;  %v5258_v58 = vld [vmem:[%s8703_s5 + $0x388] sm:$0xff] }
 0x2ea   : > { %v7534_v42 = vpop.f32.mrf.mxu2  ;;  %v2405_v60 = vpop.f32.mrf.mxu3  ;;  %v7584_v59 = vmul.f32 %v5437_v12, %v3117_v23  ;;  %v7587_v41 = vmul.f32 %v5438_v44, %v3118_v14  ;;  %v5549_v14 = vunpack.c.l.bf16 %v5854_v32 }
 0x2eb   : > { %v7536_v26 = vpop.f32.mrf.mxu0  ;;  %v7538_v50 = vpop.f32.mrf.mxu1  ;;  %v2733_v6 = vpack.c.bf16 %v2405_v60, %v2405_v60  ;;  %8910 = vst [vmem:[#allocation73_spill] sm:$0xff] %v7559_v62 }
 0x2ec   : > { %4016 = vmatpush.bf16.msrb.mxu1 %v8908_v16  ;;  %8911 = vst [vmem:[#allocation74_spill] sm:$0xff] %v7561_v63 }
 0x2ed   : > { %v3245_v30 = vunpack.c.l.bf16 %v2733_v6 }
 0x2ef   : > { %v7589_v6 = vmul.f32 %v5693_v38, %v3245_v30  ;;  %v2607_v38 = vpack.c.bf16 %v7345_v49, %v7345_v49  ;;  %v2608_v30 = vpack.c.bf16 %v7408_v34, %v7408_v34  ;;  %v8918_v49 = vpack.c.bf16 %v7172_v28, %v7170_v47  ;;  %v5228_v28 = vld [vmem:[%s8703_s5 + $0x298] sm:$0xff] }
 0x2f0   : > { %4017 = vmatpush.bf16.msrb.mxu1 %v8909_v3 }
 0x2f1   : > { %8912 = vst [vmem:[#allocation75_spill] sm:$0xff] %v7589_v6 }
 0x2f2   : > { %v7563_v7 = vpop.f32.mrf.mxu2  ;;  %v2407_v36 = vpop.f32.mrf.mxu3 }
 0x2f3   : > { %v2734_v60 = vpack.c.bf16 %v2407_v36, %v2407_v36  ;;  %v7569_v16 = vpop.f32.mrf.mxu0  ;;  %v7571_v29 = vpop.f32.mrf.mxu1  ;;  %v3174_v36 = vunpack.c.l.bf16 %v2662_v9  ;;  %v3120_v9 = vunpack.c.l.bf16 %v2608_v30 }
 0x2f4   : > { %4049 = vmatpush.bf16.msra.mxu1 %v3844_v22 }
 0x2f5   : > { %v3246_v22 = vunpack.c.l.bf16 %v2734_v60  ;;  %v5827_v60 = vld [vmem:[%s8704_s6 + $0x148] sm:$0xff]  }
 0x2f6   : > { %5050 = vmatmul.msk.bf16.gmra.mxu1 %vm1487_vm6, %v5197_v5  ;;  %v8915_v5 = vpack.c.bf16 %v7249_v11, %v7247_v20  ;;  %v5170_v20 = vld [vmem:[%s8703_s5 + $0xc8] sm:$0xff]  ;;  %v5441_v34 = vunpack.c.l.bf16 %v5827_v60 }
 0x2f7   : > { %v7591_v37 = vmul.f32 %v5694_v39, %v3246_v22  ;;  %5080 = vmatmul.msk.bf16.gmra.mxu2 %vm1487_vm6, %v5227_v51  ;;  %5111 = vmatmul.msk.bf16.gmra.mxu3 %vm1487_vm6, %v5258_v58  ;;  %v5891_v51 = vld [vmem:[%s8704_s6 + $0x348] sm:$0xff]   ;;  %v3119_v22 = vunpack.c.l.bf16 %v2607_v38  ;;  %v5259_v38 = vld [vmem:[%s8703_s5 + $0x390] sm:$0xff] }
 0x2f8   : > { %4050 = vmatpush.bf16.msra.mxu1 %v3843_v2  ;;  %v8914_v2 = vpack.c.bf16 %v7371_v27, %v7360_v1  ;;  %v3173_v27 = vunpack.c.l.bf16 %v2661_v0  ;;  %v5550_v1 = vunpack.c.h.bf16 %v5854_v32  ;;  %v5442_v0 = vunpack.c.h.bf16 %v5827_v60  ;;  %5023 = vmatmul.msk.bf16.gmra.mxu0 %vm1487_vm6, %v5170_v20  ;;  %v8919_v60 = vld [vmem:[#allocation50_spill] sm:$0xff] }
 0x2f9   : > { %8913 = vst [vmem:[#allocation76_spill] sm:$0xff] %v7591_v37 }
 0x2fa   : > { %v7607_v12 = vpop.f32.mrf.mxu2  ;;  %v2410_v23 = vpop.f32.mrf.mxu3  ;;  %v7631_v11 = vmul.f32 %v5549_v14, %v3173_v27  ;;  %v7633_v58 = vmul.f32 %v5550_v1, %v3174_v36  ;;  %v5697_v14 = vunpack.c.l.bf16 %v5891_v51  ;;  %v5698_v36 = vunpack.c.h.bf16 %v5891_v51 }
 0x2fb   : > { %v7609_v44 = vpop.f32.mrf.mxu0  ;;  %v7611_v61 = vpop.f32.mrf.mxu1  ;;  %v2735_v39 = vpack.c.bf16 %v2410_v23, %v2410_v23  ;;  %v5198_v23 = vld [vmem:[%s8703_s5 + $0x1a8] sm:$0xff]  ;;  %v7659_v51 = vmul.f32 %v5441_v34, %v3119_v22  ;;  %v8926_v34 = vld [vmem:[#allocation13_spill] sm:$0xff]  ;;  %v8927_v22 = vld [vmem:[#allocation14_spill] sm:$0xff] }
 0x2fc   : > { %4051 = vmatpush.bf16.msra.mxu1 %v8914_v2  ;;  %8916 = vst [vmem:[#allocation77_spill] sm:$0xff] %v7631_v11  ;;  %v8928_v53 = vpack.c.bf16 %v8926_v34, %v8927_v22  ;;  %v8931_v34 = vld [vmem:[#allocation41_spill] sm:$0xff] }
 0x2fd   : > { %8917 = vst [vmem:[#allocation78_spill] sm:$0xff] %v7633_v58  ;;  %v3247_v27 = vunpack.c.l.bf16 %v2735_v39 }
 0x2ff   : > { %v7664_v3 = vmul.f32 %v5697_v14, %v3247_v27 }
 0x300   : > { %4052 = vmatpush.bf16.msra.mxu1 %v8915_v5 }
 0x301   : > { %8922 = vst [vmem:[#allocation50_spill] sm:$0xff] %v7664_v3 }
 0x302   : > { %v7638_v2 = vpop.f32.mrf.mxu2  ;;  %v2412_v32 = vpop.f32.mrf.mxu3 }
 0x303   : > { %v2736_v1 = vpack.c.bf16 %v2412_v32, %v2412_v32  ;;  %v7644_v5 = vpop.f32.mrf.mxu0  ;;  %v7646_v47 = vpop.f32.mrf.mxu1  ;;  %v7662_v32 = vmul.f32 %v5442_v0, %v3120_v9  ;;  %v5855_v9 = vld [vmem:[%s8704_s6 + $0x228] sm:$0xff]   ;;  %v2609_v0 = vpack.c.bf16 %v7438_v17, %v7438_v17  ;;  %v3122_v17 = vunpack.c.l.bf16 %v2610_v18  ;;  %v5260_v18 = vld [vmem:[%s8703_s5 + $0x398] sm:$0xff] }
 0x304   : > { %4053 = vmatpush.bf16.msra.mxu1 %v8918_v49  ;;  %v8920_v49 = vld [vmem:[#allocation49_spill] sm:$0xff] }
 0x305   : > { %v3248_v30 = vunpack.c.l.bf16 %v2736_v1  ;;  %v8921_v20 = vpack.c.bf16 %v8919_v60, %v8920_v49  ;;  %v8924_v1 = vld [vmem:[#allocation55_spill] sm:$0xff]  ;;  %v8925_v49 = vld [vmem:[#allocation56_spill] sm:$0xff] }
 0x306   : > { %5051 = vmatmul.msk.bf16.gmra.mxu1 %vm1487_vm6, %v5198_v23  ;;  %v2663_v60 = vpack.c.bf16 %v8924_v1, %v8924_v1 }
 0x307   : > { %v7666_v45 = vmul.f32 %v5698_v36, %v3248_v30  ;;  %5081 = vmatmul.msk.bf16.gmra.mxu2 %vm1487_vm6, %v5228_v28  ;;  %5112 = vmatmul.msk.bf16.gmra.mxu3 %vm1487_vm6, %v5259_v38  ;;  %v5553_v38 = vunpack.c.l.bf16 %v5855_v9 }
 0x308   : > { %4054 = vmatpush.bf16.msra.mxu1 %v8921_v20  ;;  %v2664_v20 = vpack.c.bf16 %v8925_v49, %v8925_v49  ;;  %v3175_v30 = vunpack.c.l.bf16 %v2663_v60  ;;  %v8930_v49 = vld [vmem:[#allocation42_spill] sm:$0xff]  ;;  %v5892_v60 = vld [vmem:[%s8704_s6 + $0x350] sm:$0xff]  }
 0x309   : > { %8923 = vst [vmem:[#allocation49_spill] sm:$0xff] %v7666_v45  ;;  %v8932_v22 = vpack.c.bf16 %v8930_v49, %v8931_v34  ;;  %v5445_v49 = vunpack.c.l.bf16 %v5828_v24  ;;  %v3121_v34 = vunpack.c.l.bf16 %v2609_v0  ;;  %v5702_v6 = vunpack.c.h.bf16 %v5892_v60 }
 0x30a   : > { %v7682_v23 = vpop.f32.mrf.mxu2  ;;  %v2415_v14 = vpop.f32.mrf.mxu3  ;;  %v3176_v1 = vunpack.c.l.bf16 %v2664_v20  ;;  %v7703_v20 = vmul.f32 %v5553_v38, %v3175_v30  ;;  %v2611_v45 = vpack.c.bf16 %v7502_v43, %v7502_v43 }
 0x30b   : > { %8929 = vst [vmem:[#allocation55_spill] sm:$0xff] %v7682_v23  ;;  %v7684_v27 = vpop.f32.mrf.mxu0  ;;  %v7686_v36 = vpop.f32.mrf.mxu1  ;;  %v2737_v19 = vpack.c.bf16 %v2415_v14, %v2415_v14  ;;  %v5701_v14 = vunpack.c.l.bf16 %v5892_v60  ;;  %v7722_v30 = vmul.f32 %v5445_v49, %v3121_v34  ;;  %v8938_v49 = vld [vmem:[#allocation59_spill] sm:$0xff] }
 0x30c   : > { %4055 = vmatpush.bf16.msra.mxu1 %v8928_v53  ;;  %v5554_v53 = vunpack.c.h.bf16 %v5855_v9  ;;  %8933 = vst [vmem:[#allocation56_spill] sm:$0xff] %v7703_v20  ;;  %v2665_v34 = vpack.c.bf16 %v8938_v49, %v8938_v49  ;;  %v5893_v49 = vld [vmem:[%s8704_s6 + $0x358] sm:$0xff]  }
 0x30d   : > { %v3249_v21 = vunpack.c.l.bf16 %v2737_v19  ;;  %v5706_v23 = vunpack.c.h.bf16 %v5893_v49 }
 0x30e   : > { %v7705_v9 = vmul.f32 %v5554_v53, %v3176_v1  ;;  %v3177_v19 = vunpack.c.l.bf16 %v2665_v34 }
 0x30f   : > { %v7729_v1 = vmul.f32 %v5701_v14, %v3249_v21 }
 0x310   : > { %4056 = vmatpush.bf16.msra.mxu1 %v8932_v22  ;;  %8934 = vst [vmem:[#allocation13_spill] sm:$0xff] %v7705_v9  ;;  %v5446_v22 = vunpack.c.h.bf16 %v5828_v24  ;;  %v5229_v24 = vld [vmem:[%s8703_s5 + $0x2a0] sm:$0xff] }
 0x311   : > { %8936 = vst [vmem:[#allocation42_spill] sm:$0xff] %v7729_v1  ;;  %v2612_v1 = vpack.c.bf16 %v7538_v50, %v7538_v50 }
 0x312   : > { %v7707_v39 = vpop.f32.mrf.mxu2  ;;  %v2417_v31 = vpop.f32.mrf.mxu3  ;;  %v7727_v53 = vmul.f32 %v5446_v22, %v3122_v17  ;;  %v8939_v22 = vld [vmem:[#allocation64_spill] sm:$0xff]  ;;  %v5856_v17 = vld [vmem:[%s8704_s6 + $0x230] sm:$0xff]  }
 0x313   : > { %8935 = vst [vmem:[#allocation14_spill] sm:$0xff] %v7707_v39  ;;  %v2738_v28 = vpack.c.bf16 %v2417_v31, %v2417_v31  ;;  %v7712_v37 = vpop.f32.mrf.mxu0  ;;  %v7714_v38 = vpop.f32.mrf.mxu1  ;;  %v2666_v21 = vpack.c.bf16 %v8939_v22, %v8939_v22  ;;  %v5557_v22 = vunpack.c.l.bf16 %v5856_v17  ;;  %v5558_v3 = vunpack.c.h.bf16 %v5856_v17 }
 0x314   : > { %v3123_v17 = vunpack.c.l.bf16 %v2611_v45  ;;  %v3124_v43 = vunpack.c.l.bf16 %v2612_v1  ;;  %v5230_v45 = vld [vmem:[%s8703_s5 + $0x2a8] sm:$0xff] }
 0x315   : > { %v3250_v0 = vunpack.c.l.bf16 %v2738_v28  ;;  %v7738_v28 = vld [vmem:[%s8702_s4] sm:$0xff] }
 0x316   : > { %5052 = vmatmul.msk.bf16.gmra.mxu1 %vm1487_vm6, %v5199_v10  ;;  %v3949_v10 = vunpack.c.l.b16 %v7738_v28 }
 0x317   : > { %v7731_v60 = vmul.f32 %v5702_v6, %v3250_v0  ;;  %5082 = vmatmul.msk.bf16.gmra.mxu2 %vm1487_vm6, %v5229_v24  ;;  %5113 = vmatmul.msk.bf16.gmra.mxu3 %vm1487_vm6, %v5260_v18  ;;  %v3178_v6 = vunpack.c.l.bf16 %v2666_v21 }
 0x318   : > { %v3965_v24 = vpack.c.b16 %v3949_v10, %v3949_v10  ;;  %v5829_v10 = vld [vmem:[%s8704_s6 + $0x158] sm:$0xff]  }
 0x319   : > { %8937 = vst [vmem:[#allocation41_spill] sm:$0xff] %v7731_v60  ;;  %v7770_v34 = vmul.f32 %v5558_v3, %v3178_v6  ;;  %v5449_v21 = vunpack.c.l.bf16 %v5829_v10  ;;  %v5450_v54 = vunpack.c.h.bf16 %v5829_v10  ;;  %v5261_v3 = vld [vmem:[%s8703_s5 + $0x3a0] sm:$0xff] }
 0x31a   : > { %v7750_v31 = vpop.f32.mrf.mxu2  ;;  %v2420_v14 = vpop.f32.mrf.mxu3  ;;  %4005 = vmatmul.bf16.vlgmr.msra.gmra.mxu0 %v3965_v24  ;;  %v7768_v24 = vmul.f32 %v5557_v22, %v3177_v19 }
 0x31b   : > { %8940 = vst [vmem:[#allocation59_spill] sm:$0xff] %v7750_v31  ;;  %v7752_v18 = vpop.f32.mrf.mxu0  ;;  %v7754_v0 = vpop.f32.mrf.mxu1  ;;  %v2739_v60 = vpack.c.bf16 %v2420_v14, %v2420_v14  ;;  %v5705_v14 = vunpack.c.l.bf16 %v5893_v49  ;;  %v7789_v22 = vmul.f32 %v5449_v21, %v3123_v17 }
 0x31c   : > { %8941 = vst [vmem:[#allocation64_spill] sm:$0xff] %v7768_v24 }
 0x31d   : > { %v3251_v25 = vunpack.c.l.bf16 %v2739_v60  ;;  %v7792_v60 = vmul.f32 %v5450_v54, %v3124_v43  ;;  %v3950_v43 = vunpack.c.h.b16 %v7738_v28 }
 0x31f   : > { %v7794_v49 = vmul.f32 %v5705_v14, %v3251_v25  ;;  %v5830_v25 = vld [vmem:[%s8704_s6 + $0x160] sm:$0xff]  }
 0x321   : > { %8943 = vst [vmem:[#allocation80_spill] sm:$0xff] %v7794_v49 }
 0x322   : > { %v7772_v15 = vpop.f32.mrf.mxu2  ;;  %v2422_v50 = vpop.f32.mrf.mxu3 }
 0x323   : > { %8942 = vst [vmem:[#allocation79_spill] sm:$0xff] %v7772_v15  ;;  %v2740_v39 = vpack.c.bf16 %v2422_v50, %v2422_v50  ;;  %v7777_v31 = vpop.f32.mrf.mxu0  ;;  %v7779_v19 = vpop.f32.mrf.mxu1 }
 0x325   : > { %v3252_v1 = vunpack.c.l.bf16 %v2740_v39  ;;  %v5454_v39 = vunpack.c.h.bf16 %v5830_v25 }
 0x326   : > { %5053 = vmatmul.msk.bf16.gmra.mxu1 %vm1487_vm6, %v5200_v4  ;;  %v2613_v4 = vpack.c.bf16 %v7571_v29, %v7571_v29 }
 0x327   : > { %v7796_v10 = vmul.f32 %v5706_v23, %v3252_v1  ;;  %5083 = vmatmul.msk.bf16.gmra.mxu2 %vm1487_vm6, %v5230_v45  ;;  %5114 = vmatmul.msk.bf16.gmra.mxu3 %vm1487_vm6, %v5261_v3  ;;  %v2614_v23 = vpack.c.bf16 %v7611_v61, %v7611_v61  ;;  %v5894_v45 = vld [vmem:[%s8704_s6 + $0x360] sm:$0xff]   ;;  %v5453_v3 = vunpack.c.l.bf16 %v5830_v25 }
 0x328   : > { %v3125_v1 = vunpack.c.l.bf16 %v2613_v4  ;;  %v5709_v15 = vunpack.c.l.bf16 %v5894_v45  ;;  %v5710_v35 = vunpack.c.h.bf16 %v5894_v45  ;;  %v5262_v4 = vld [vmem:[%s8703_s5 + $0x3a8] sm:$0xff] }
 0x329   : > { %8944 = vst [vmem:[#allocation81_spill] sm:$0xff] %v7796_v10  ;;  %v3126_v54 = vunpack.c.l.bf16 %v2614_v23  ;;  %v3966_v10 = vpack.c.b16 %v3950_v43, %v3950_v43 }
 0x32a   : > { %v7802_v50 = vpop.f32.mrf.mxu2  ;;  %v2425_v6 = vpop.f32.mrf.mxu3  ;;  %v7833_v23 = vmul.f32 %v5453_v3, %v3125_v1  ;;  %v8955_v3 = vld [vmem:[#allocation26_spill] sm:$0xff]  ;;  %v8956_v1 = vld [vmem:[#allocation23_spill] sm:$0xff] }
 0x32b   : > { %8945 = vst [vmem:[#allocation82_spill] sm:$0xff] %v7802_v50  ;;  %v7804_v21 = vpop.f32.mrf.mxu0  ;;  %v7806_v17 = vpop.f32.mrf.mxu1  ;;  %v2741_v14 = vpack.c.bf16 %v2425_v6, %v2425_v6  ;;  %v5231_v6 = vld [vmem:[%s8703_s5 + $0x2b0] sm:$0xff]  ;;  %v7835_v43 = vmul.f32 %v5454_v39, %v3126_v54 }
 0x32d   : > { %v3253_v50 = vunpack.c.l.bf16 %v2741_v14 }
 0x32f   : > { %v7837_v14 = vmul.f32 %v5709_v15, %v3253_v50  ;;  %v2615_v15 = vpack.c.bf16 %v7646_v47, %v7646_v47 }
 0x331   : > { %8948 = vst [vmem:[#allocation85_spill] sm:$0xff] %v7837_v14  ;;  %v5831_v14 = vld [vmem:[%s8704_s6 + $0x168] sm:$0xff]  }
 0x332   : > { %v7821_v49 = vpop.f32.mrf.mxu2  ;;  %v2427_v29 = vpop.f32.mrf.mxu3  ;;  %v5458_v46 = vunpack.c.h.bf16 %v5831_v14 }
 0x333   : > { %8946 = vst [vmem:[#allocation83_spill] sm:$0xff] %v7821_v49  ;;  %v2742_v57 = vpack.c.bf16 %v2427_v29, %v2427_v29  ;;  %v7823_v61 = vpop.f32.mrf.mxu0  ;;  %v7825_v28 = vpop.f32.mrf.mxu1  ;;  %v8950_v29 = vld [vmem:[#allocation33_spill] sm:$0xff]  ;;  %v8951_v49 = vld [vmem:[#allocation31_spill] sm:$0xff] }
 0x334   : > { %8947 = vst [vmem:[#allocation84_spill] sm:$0xff] %v7825_v28  ;;  %v8952_v28 = vpack.c.bf16 %v8950_v29, %v8951_v49 }
 0x335   : > { %v3254_v25 = vunpack.c.l.bf16 %v2742_v57  ;;  %v2669_v57 = vpack.c.bf16 %v7475_v33, %v7475_v33  ;;  %v7864_v33 = vld [vmem:[%s8702_s4 + $0x10] sm:$0xff] }
 0x336   : > { %4018 = vmatmul.bf16.vlgmr.msrb.gmra.mxu1 %v3966_v10  ;;  %v2670_v10 = vpack.c.bf16 %v7495_v55, %v7495_v55  ;;  %v3953_v55 = vunpack.c.l.b16 %v7864_v33 }
 0x337   : > { %v7839_v45 = vmul.f32 %v5710_v35, %v3254_v25  ;;  %5084 = vmatmul.msk.bf16.gmra.mxu2 %vm1487_vm6, %v5231_v6  ;;  %5115 = vmatmul.msk.bf16.gmra.mxu3 %vm1487_vm6, %v5262_v4  ;;  %v5858_v35 = vld [vmem:[%s8704_s6 + $0x240] sm:$0xff]   ;;  %v3181_v4 = vunpack.c.l.bf16 %v2669_v57  ;;  %v8958_v57 = vld [vmem:[#allocation20_spill] sm:$0xff] }
 0x338   : > { %4088 = vmatpush.bf16.msrb.mxu1 %v8952_v28  ;;  %v8957_v28 = vpack.c.bf16 %v8955_v3, %v8956_v1  ;;  %v5565_v6 = vunpack.c.l.bf16 %v5858_v35  ;;  %v5566_v25 = vunpack.c.h.bf16 %v5858_v35  ;;  %v3182_v29 = vunpack.c.l.bf16 %v2670_v10  ;;  %v5895_v3 = vld [vmem:[%s8704_s6 + $0x368] sm:$0xff]   ;;  %v8959_v35 = vld [vmem:[#allocation19_spill] sm:$0xff] }
 0x339   : > { %8949 = vst [vmem:[#allocation86_spill] sm:$0xff] %v7839_v45  ;;  %v2616_v45 = vpack.c.bf16 %v7686_v36, %v7686_v36  ;;  %v8960_v10 = vpack.c.bf16 %v8958_v57, %v8959_v35  ;;  %v5713_v63 = vunpack.c.l.bf16 %v5895_v3  ;;  %v5714_v20 = vunpack.c.h.bf16 %v5895_v3 }
 0x33a   : > { %v7855_v39 = vpop.f32.mrf.mxu2  ;;  %v2430_v50 = vpop.f32.mrf.mxu3  ;;  %v7885_v1 = vmul.f32 %v5565_v6, %v3181_v4  ;;  %v7887_v47 = vmul.f32 %v5566_v25, %v3182_v29  ;;  %v5263_v6 = vld [vmem:[%s8703_s5 + $0x3b0] sm:$0xff]  ;;  %v8965_v4 = vld [vmem:[#allocation46_spill] sm:$0xff] }
 0x33b   : > { %8953 = vst [vmem:[#allocation33_spill] sm:$0xff] %v7855_v39  ;;  %v7857_v54 = vpop.f32.mrf.mxu0  ;;  %v7859_v49 = vpop.f32.mrf.mxu1  ;;  %v2743_v39 = vpack.c.bf16 %v2430_v50, %v2430_v50  ;;  %v3128_v8 = vunpack.c.l.bf16 %v2616_v45  ;;  %v3969_v50 = vpack.c.b16 %v3953_v55, %v3953_v55  ;;  %v8966_v25 = vld [vmem:[#allocation45_spill] sm:$0xff]  ;;  %v8976_v45 = vld [vmem:[#allocation35_spill] sm:$0xff] }
 0x33c   : > { %8954 = vst [vmem:[#allocation31_spill] sm:$0xff] %v7859_v49  ;;  %4089 = vmatpush.bf16.msrb.mxu1 %v8957_v28  ;;  %v5457_v28 = vunpack.c.l.bf16 %v5831_v14  ;;  %v3127_v49 = vunpack.c.l.bf16 %v2615_v15  ;;  %v8967_v15 = vpack.c.bf16 %v8965_v4, %v8966_v25  ;;  %v5808_v29 = vld [vmem:[%s8704_s6 + $0xb0] sm:$0xff]   ;;  %v2567_v4 = vpack.c.bf16 %v7777_v31, %v7777_v31 }
 0x33d   : > { %8961 = vst [vmem:[#allocation26_spill] sm:$0xff] %v7885_v1  ;;  %v3255_v11 = vunpack.c.l.bf16 %v2743_v39  ;;  %v5366_v25 = vunpack.c.h.bf16 %v5808_v29 }
 0x33e   : > { %8962 = vst [vmem:[#allocation23_spill] sm:$0xff] %v7887_v47  ;;  %v7901_v39 = vmul.f32 %v5457_v28, %v3127_v49  ;;  %v8971_v49 = vld [vmem:[#allocation39_spill] sm:$0xff] }
 0x33f   : > { %v7908_v3 = vmul.f32 %v5713_v63, %v3255_v11  ;;  %v2671_v63 = vpack.c.bf16 %v7534_v42, %v7534_v42  ;;  %v2672_v11 = vpack.c.bf16 %v7563_v7, %v7563_v7  ;;  %v5807_v42 = vld [vmem:[%s8704_s6 + $0xa8] sm:$0xff]   ;;  %v2568_v7 = vpack.c.bf16 %v7804_v21, %v7804_v21 }
 0x340   : > { %4090 = vmatpush.bf16.msrb.mxu1 %v8960_v10  ;;  %v5365_v10 = vunpack.c.l.bf16 %v5808_v29  ;;  %v2565_v21 = vpack.c.bf16 %v7712_v37, %v7712_v37  ;;  %v5806_v29 = vld [vmem:[%s8704_s6 + $0xa0] sm:$0xff]   ;;  %v5896_v37 = vld [vmem:[%s8704_s6 + $0x370] sm:$0xff]  }
 0x341   : > { %8968 = vst [vmem:[#allocation46_spill] sm:$0xff] %v7908_v3  ;;  %v3183_v3 = vunpack.c.l.bf16 %v2671_v63 }
 0x342   : > { %v7889_v36 = vpop.f32.mrf.mxu2  ;;  %v2432_v62 = vpop.f32.mrf.mxu3 }
 0x343   : > { %8963 = vst [vmem:[#allocation20_spill] sm:$0xff] %v7889_v36  ;;  %v2744_v58 = vpack.c.bf16 %v2432_v62, %v2432_v62  ;;  %v2000_v9 = vpop.f32.mrf.mxu0  ;;  %v7891_v24 = vpop.f32.mrf.mxu1  ;;  %v7903_v62 = vmul.f32 %v5458_v46, %v3128_v8  ;;  %v2570_v46 = vpack.c.bf16 %v7857_v54, %v7857_v54  ;;  %v8970_v8 = vld [vmem:[#allocation40_spill] sm:$0xff]  ;;  %v3184_v36 = vunpack.c.l.bf16 %v2672_v11 }
 0x344   : > { %8964 = vst [vmem:[#allocation19_spill] sm:$0xff] %v7891_v24  ;;  %4091 = vmatpush.bf16.msrb.mxu1 %v8967_v15  ;;  %v2571_v55 = vpack.c.bf16 %v2000_v9, %v2000_v9  ;;  %v2569_v9 = vpack.c.bf16 %v7823_v61, %v7823_v61  ;;  %v8972_v35 = vpack.c.bf16 %v8970_v8, %v8971_v49  ;;  %v5859_v61 = vld [vmem:[%s8704_s6 + $0x248] sm:$0xff]  }
 0x345   : > { %v3256_v14 = vunpack.c.l.bf16 %v2744_v58  ;;  %v5809_v58 = vld [vmem:[%s8704_s6 + $0xb8] sm:$0xff]   ;;  %v3082_v49 = vunpack.c.l.bf16 %v2570_v46  ;;  %v5569_v47 = vunpack.c.l.bf16 %v5859_v61 }
 0x346   : > { %4057 = vmatmul.bf16.vlgmr.msra.gmra.mxu1 %v3969_v50  ;;  %v5369_v28 = vunpack.c.l.bf16 %v5809_v58  ;;  %v3083_v54 = vunpack.c.l.bf16 %v2571_v55  ;;  %v3081_v8 = vunpack.c.l.bf16 %v2569_v9  ;;  %v5370_v1 = vunpack.c.h.bf16 %v5809_v58 }
 0x347   : > { %v7910_v57 = vmul.f32 %v5714_v20, %v3256_v14  ;;  %5116 = vmatmul.msk.bf16.gmra.mxu3 %vm1487_vm6, %v5263_v6  ;;  %v5361_v55 = vunpack.c.l.bf16 %v5807_v42 }
 0x348   : > { %4092 = vmatpush.bf16.msrb.mxu1 %v8972_v35  ;;  %v8975_v35 = vld [vmem:[#allocation36_spill] sm:$0xff]  ;;  %v3595_v9 = vmul.f32 %v5369_v28, %v3083_v54  ;;  %v3593_v63 = vmul.f32 %v5365_v10, %v3081_v8  ;;  %v7961_v28 = vmul.f32 %v5569_v47, %v3183_v3  ;;  %v2564_v10 = vpack.c.bf16 %v7684_v27, %v7684_v27 }
 0x349   : > { %8969 = vst [vmem:[#allocation45_spill] sm:$0xff] %v7910_v57  ;;  %v8977_v20 = vpack.c.bf16 %v8975_v35, %v8976_v45  ;;  %v5570_v57 = vunpack.c.h.bf16 %v5859_v61  ;;  %v2566_v45 = vpack.c.bf16 %v7752_v18, %v7752_v18  ;;  %v3080_v35 = vunpack.c.l.bf16 %v2568_v7 }
 0x34a   : > { %v7932_v50 = vpop.f32.mrf.mxu2  ;;  %v2435_v6 = vpop.f32.mrf.mxu3  ;;  %v3594_v61 = vmul.f32 %v5366_v25, %v3082_v49  ;;  %8981 = vst [vmem:[#allocation36_spill] sm:$0xff] %v7961_v28  ;;  %v5357_v18 = vunpack.c.l.bf16 %v5806_v29  ;;  %v5717_v47 = vunpack.c.l.bf16 %v5896_v37  ;;  %v8982_v49 = vld [vmem:[#allocation25_spill] sm:$0xff] }
 0x34b   : > { %8973 = vst [vmem:[#allocation40_spill] sm:$0xff] %v7932_v50  ;;  %v2002_v15 = vpop.f32.mrf.mxu0  ;;  %v7941_v14 = vpop.f32.mrf.mxu1  ;;  %v2745_v58 = vpack.c.bf16 %v2435_v6, %v2435_v6  ;;  %v8978_v50 = vld [vmem:[#allocation28_spill] sm:$0xff]  ;;  %v7963_v54 = vmul.f32 %v5570_v57, %v3184_v36  ;;  %v2563_v6 = vpack.c.bf16 %v7644_v5, %v7644_v5  ;;  %v5718_v57 = vunpack.c.h.bf16 %v5896_v37  ;;  %v5264_v5 = vld [vmem:[%s8703_s5 + $0x3b8] sm:$0xff] }
 0x34c   : > { %8974 = vst [vmem:[#allocation39_spill] sm:$0xff] %v7941_v14  ;;  %4093 = vmatpush.bf16.msrb.mxu1 %v8977_v20  ;;  %v2572_v31 = vpack.c.bf16 %v2002_v15, %v2002_v15  ;;  %v3079_v20 = vunpack.c.l.bf16 %v2567_v4  ;;  %v5362_v15 = vunpack.c.h.bf16 %v5807_v42  ;;  %v8979_v14 = vld [vmem:[#allocation27_spill] sm:$0xff]  ;;  %v5358_v4 = vunpack.c.h.bf16 %v5806_v29 }
 0x34d   : > { %v8980_v24 = vpack.c.bf16 %v8978_v50, %v8979_v14  ;;  %v3077_v42 = vunpack.c.l.bf16 %v2565_v21  ;;  %v3257_v36 = vunpack.c.l.bf16 %v2745_v58  ;;  %v3078_v27 = vunpack.c.l.bf16 %v2566_v45  ;;  %v8986_v58 = vld [vmem:[#allocation7_spill] sm:$0xff] }
 0x34e   : > { %v3084_v46 = vunpack.c.l.bf16 %v2572_v31  ;;  %v3591_v14 = vmul.f32 %v5361_v55, %v3079_v20  ;;  %v3592_v8 = vmul.f32 %v5362_v15, %v3080_v35  ;;  %v8983_v31 = vld [vmem:[#allocation24_spill] sm:$0xff]  ;;  %v3827_v29 = vpack.c.bf16 %v3594_v61, %v3593_v63  ;;  %v5804_v20 = vld [vmem:[%s8704_s6 + $0x90] sm:$0xff]  }
 0x34f   : > { %v8984_v21 = vpack.c.bf16 %v8982_v49, %v8983_v31  ;;  %v2562_v55 = vpack.c.bf16 %v7609_v44, %v7609_v44  ;;  %v3075_v15 = vunpack.c.l.bf16 %v2563_v6  ;;  %v3076_v35 = vunpack.c.l.bf16 %v2564_v10 }
 0x350   : > { %v3596_v11 = vmul.f32 %v5370_v1, %v3084_v46  ;;  %4094 = vmatpush.bf16.msrb.mxu1 %v8980_v24  ;;  %v5805_v24 = vld [vmem:[%s8704_s6 + $0x98] sm:$0xff]   ;;  %v8985_v46 = vld [vmem:[#allocation8_spill] sm:$0xff]  ;;  %v7994_v63 = vmul.f32 %v5717_v47, %v3257_v36  ;;  %v2673_v44 = vpack.c.bf16 %v7607_v12, %v7607_v12  ;;  %v2674_v31 = vpack.c.bf16 %v7638_v2, %v7638_v2  ;;  %v8017_v2 = vld [vmem:[%s8704_s6 + $0x80] sm:$0xff]  }
 0x351   : > { %v5353_v45 = vunpack.c.l.bf16 %v5805_v24  ;;  %v5354_v49 = vunpack.c.h.bf16 %v5805_v24  ;;  %v2557_v10 = vpack.c.bf16 %v7436_v48, %v7436_v48  ;;  %v2559_v47 = vpack.c.bf16 %v7500_v56, %v7500_v56  ;;  %v5803_v48 = vld [vmem:[%s8704_s6 + $0x88] sm:$0xff]  }
 0x352   : > { %v7969_v7 = vpop.f32.mrf.mxu2  ;;  %v2437_v1 = vpop.f32.mrf.mxu3  ;;  %v3828_v25 = vpack.c.bf16 %v3596_v11, %v3595_v9  ;;  %v8987_v11 = vpack.c.bf16 %v8985_v46, %v8986_v58  ;;  %v2558_v24 = vpack.c.bf16 %v7477_v13, %v7477_v13  ;;  %v2560_v56 = vpack.c.bf16 %v7536_v26, %v7536_v26 }
 0x353   : > { %v2746_v3 = vpack.c.bf16 %v2437_v1, %v2437_v1  ;;  %v7974_v50 = vpop.f32.mrf.mxu1  ;;  %v2561_v1 = vpack.c.bf16 %v7569_v16, %v7569_v16  ;;  %v3826_v16 = vpack.c.bf16 %v3592_v8, %v3591_v14  ;;  %v3588_v8 = vmul.f32 %v5354_v49, %v3076_v35 }
 0x354   : > { %4095 = vmatpush.bf16.msrb.mxu1 %v8984_v21  ;;  %4023 = vmatpush.bf16.msrb.mxu2 %v3828_v25  ;;  %v3589_v25 = vmul.f32 %v5357_v18, %v3077_v42  ;;  %v5349_v18 = vunpack.c.l.bf16 %v5804_v20  ;;  %v5350_v21 = vunpack.c.h.bf16 %v5804_v20  ;;  %v3186_v13 = vunpack.c.l.bf16 %v2674_v31  ;;  %v5897_v20 = vld [vmem:[%s8704_s6 + $0x378] sm:$0xff]  }
 0x355   : > { %v3258_v9 = vunpack.c.l.bf16 %v2746_v3  ;;  %v3590_v3 = vmul.f32 %v5358_v4, %v3078_v27  ;;  %v5860_v4 = vld [vmem:[%s8704_s6 + $0x250] sm:$0xff]   ;;  %v3073_v36 = vunpack.c.l.bf16 %v2561_v1  ;;  %v3587_v27 = vmul.f32 %v5353_v45, %v3075_v15  ;;  %v5833_v1 = vld [vmem:[%s8704_s6 + $0x178] sm:$0xff]  }
 0x356   : > { %v5574_v46 = vunpack.c.h.bf16 %v5860_v4  ;;  %v5341_v58 = vunpack.c.l.bf16 %v8017_v2  ;;  %v3071_v37 = vunpack.c.l.bf16 %v2559_v47  ;;  %v3069_v6 = vunpack.c.l.bf16 %v2557_v10 }
 0x357   : > { %v7996_v61 = vmul.f32 %v5718_v57, %v3258_v9  ;;  %5117 = vmatmul.msk.bf16.gmra.mxu3 %vm1487_vm6, %v5264_v5  ;;  %v3074_v57 = vunpack.c.l.bf16 %v2562_v55  ;;  %v3825_v14 = vpack.c.bf16 %v3590_v3, %v3589_v25  ;;  %v3185_v9 = vunpack.c.l.bf16 %v2673_v44 }
 0x358   : > { %4127 = vmatpush.bf16.msra.mxu1 %v8987_v11  ;;  %4024 = vmatpush.bf16.msrb.mxu2 %v3827_v29  ;;  %v5573_v29 = vunpack.c.l.bf16 %v5860_v4  ;;  %v5345_v11 = vunpack.c.l.bf16 %v5803_v48  ;;  %v3070_v28 = vunpack.c.l.bf16 %v2558_v24  ;;  %v3072_v26 = vunpack.c.l.bf16 %v2560_v56 }
 0x359   : > { %v3585_v45 = vmul.f32 %v5349_v18, %v3073_v36  ;;  %v3824_v15 = vpack.c.bf16 %v3588_v8, %v3587_v27  ;;  %v3586_v35 = vmul.f32 %v5350_v21, %v3074_v57  ;;  %v5346_v25 = vunpack.c.h.bf16 %v5803_v48 }
 0x35a   : > { %v8012_v42 = vpop.f32.mrf.mxu2  ;;  %v2440_v12 = vpop.f32.mrf.mxu3  ;;  %v8035_v3 = vmul.f32 %v5573_v29, %v3185_v9  ;;  %v2619_v49 = vpack.c.bf16 %v7779_v19, %v7779_v19  ;;  %v2620_v44 = vpack.c.bf16 %v7806_v17, %v7806_v17  ;;  %v3583_v31 = vmul.f32 %v5345_v11, %v3071_v37  ;;  %v5265_v19 = vld [vmem:[%s8703_s5 + $0x3c0] sm:$0xff]  ;;  %v5832_v17 = vld [vmem:[%s8704_s6 + $0x170] sm:$0xff]  }
 0x35b   : > { %v8026_v5 = vpop.f32.mrf.mxu1  ;;  %v2747_v55 = vpack.c.bf16 %v2440_v12, %v2440_v12  ;;  %v2617_v10 = vpack.c.bf16 %v7714_v38, %v7714_v38  ;;  %v5465_v47 = vunpack.c.l.bf16 %v5833_v1  ;;  %v5466_v18 = vunpack.c.h.bf16 %v5833_v1  ;;  %v5866_v9 = vld [vmem:[%s8704_s6 + $0x280] sm:$0xff]  }
 0x35c   : > { %4025 = vmatpush.bf16.msrb.mxu2 %v3826_v16  ;;  %v8037_v16 = vmul.f32 %v5574_v46, %v3186_v13  ;;  %v5721_v24 = vunpack.c.l.bf16 %v5897_v20  ;;  %v5722_v36 = vunpack.c.h.bf16 %v5897_v20  ;;  %v2618_v38 = vpack.c.bf16 %v7754_v0, %v7754_v0 }
 0x35d   : > { %v3259_v48 = vunpack.c.l.bf16 %v2747_v55  ;;  %v3823_v37 = vpack.c.bf16 %v3586_v35, %v3585_v45  ;;  %v3584_v27 = vmul.f32 %v5346_v25, %v3072_v26  ;;  %v3131_v8 = vunpack.c.l.bf16 %v2619_v49  ;;  %v8074_v49 = vld [vmem:[%s8702_s4 + $0x8] sm:$0xff] }
 0x35e   : > { %v3132_v21 = vunpack.c.l.bf16 %v2620_v44  ;;  %v3581_v46 = vmul.f32 %v5341_v58, %v3069_v6  ;;  %v5461_v13 = vunpack.c.l.bf16 %v5832_v17  ;;  %v3129_v0 = vunpack.c.l.bf16 %v2617_v10 }
 0x35f   : > { %v8060_v11 = vmul.f32 %v5721_v24, %v3259_v48  ;;  %v5462_v55 = vunpack.c.h.bf16 %v5832_v17  ;;  %v3822_v26 = vpack.c.bf16 %v3584_v27, %v3583_v31  ;;  %v3643_v20 = vmul.f32 %v5465_v47, %v3131_v8  ;;  %v5898_v24 = vld [vmem:[%s8704_s6 + $0x380] sm:$0xff]   ;;  %v2005_v48 = vpop.f32.mrf.mxu0  ;;  %v5266_v8 = vld [vmem:[%s8703_s5 + $0x3c8] sm:$0xff] }
 0x360   : > { %4026 = vmatpush.bf16.msrb.mxu2 %v3825_v14  ;;  %v5342_v14 = vunpack.c.h.bf16 %v8017_v2  ;;  %v3130_v2 = vunpack.c.l.bf16 %v2618_v38  ;;  %v3641_v31 = vmul.f32 %v5461_v13, %v3129_v0  ;;  %v5725_v17 = vunpack.c.l.bf16 %v5898_v24 }
 0x361   : > { %v5726_v27 = vunpack.c.h.bf16 %v5898_v24  ;;  %v8990_v0 = vpack.c.bf16 %v7903_v62, %v7901_v39  ;;  %v8992_v39 = vpack.c.bf16 %v7792_v60, %v7789_v22  ;;  %v5811_v24 = vld [vmem:[%s8704_s6 + $0xc8] sm:$0xff]   ;;  %v8993_v60 = vpack.c.bf16 %v7727_v53, %v7722_v30 }
 0x362   : > { %v8045_v4 = vpop.f32.mrf.mxu2  ;;  %v2442_v12 = vpop.f32.mrf.mxu3  ;;  %v3582_v45 = vmul.f32 %v5342_v14, %v3070_v28  ;;  %v3951_v28 = vunpack.c.l.b16 %v8074_v49  ;;  %v3642_v10 = vmul.f32 %v5462_v55, %v3130_v2  ;;  %v5378_v53 = vunpack.c.h.bf16 %v5811_v24 }
 0x363   : > { %v2748_v56 = vpack.c.bf16 %v2442_v12, %v2442_v12  ;;  %v8047_v57 = vpop.f32.mrf.mxu1 }
 0x364   : > { %4027 = vmatpush.bf16.msrb.mxu2 %v3824_v15  ;;  %v3644_v15 = vmul.f32 %v5466_v18, %v3132_v21  ;;  %v3821_v44 = vpack.c.bf16 %v3582_v45, %v3581_v46  ;;  %v3967_v12 = vpack.c.b16 %v3951_v28, %v3951_v28 }
 0x365   : > { %v3260_v29 = vunpack.c.l.bf16 %v2748_v56  ;;  %v3851_v56 = vpack.c.bf16 %v3642_v10, %v3641_v31 }
 0x366   : > { %v3852_v47 = vpack.c.bf16 %v3644_v15, %v3643_v20  ;;  %v8991_v20 = vpack.c.bf16 %v7835_v43, %v7833_v23  ;;  %v5267_v23 = vld [vmem:[%s8703_s5 + $0x3d0] sm:$0xff] }
 0x367   : > { %v8062_v1 = vmul.f32 %v5722_v36, %v3260_v29  ;;  %5118 = vmatmul.msk.bf16.gmra.mxu3 %vm1487_vm6, %v5265_v19  ;;  %v2007_v13 = vpop.f32.mrf.mxu0 }
 0x368   : > { %4028 = vmatpush.bf16.msrb.mxu2 %v3823_v37 }
 0x36a   : > { %v8067_v25 = vpop.f32.mrf.mxu2  ;;  %v2445_v6 = vpop.f32.mrf.mxu3 }
 0x36b   : > { %v8069_v58 = vpop.f32.mrf.mxu1  ;;  %v2749_v18 = vpack.c.bf16 %v2445_v6, %v2445_v6  ;;  %v5899_v6 = vld [vmem:[%s8704_s6 + $0x388] sm:$0xff]  }
 0x36c   : > { %4029 = vmatpush.bf16.msrb.mxu2 %v3822_v26  ;;  %v5729_v62 = vunpack.c.l.bf16 %v5899_v6 }
 0x36d   : > { %v3261_v38 = vunpack.c.l.bf16 %v2749_v18  ;;  %v5730_v18 = vunpack.c.h.bf16 %v5899_v6 }
 0x36f   : > { %v8087_v29 = vmul.f32 %v5725_v17, %v3261_v38 }
 0x370   : > { %4030 = vmatpush.bf16.msrb.mxu2 %v3821_v44 }
 0x371   : > { %8988 = vst [vmem:[#allocation35_spill] sm:$0xff] %v8087_v29 }
 0x372   : > { %v8080_v36 = vpop.f32.mrf.mxu2  ;;  %v2447_v19 = vpop.f32.mrf.mxu3 }
 0x373   : > { %v2750_v37 = vpack.c.bf16 %v2447_v19, %v2447_v19  ;;  %v8082_v14 = vpop.f32.mrf.mxu1  ;;  %4031 = vmatmul.bf16.vlgmr.msrb.gmra.mxu2 %v3967_v12  ;;  %v2574_v19 = vpack.c.bf16 %v2007_v13, %v2007_v13 }
 0x374   : > { %4062 = vmatpush.bf16.msra.mxu2 %v3852_v47 }
 0x375   : > { %v3262_v21 = vunpack.c.l.bf16 %v2750_v37  ;;  %v2010_v44 = vpop.f32.mrf.mxu0  ;;  %v5810_v37 = vld [vmem:[%s8704_s6 + $0xc0] sm:$0xff]  }
 0x376   : > { %v2575_v43 = vpack.c.bf16 %v2010_v44, %v2010_v44 }
 0x377   : > { %v8089_v46 = vmul.f32 %v5726_v27, %v3262_v21  ;;  %5119 = vmatmul.msk.bf16.gmra.mxu3 %vm1487_vm6, %v5266_v8  ;;  %v5377_v27 = vunpack.c.l.bf16 %v5811_v24 }
 0x378   : > { %4063 = vmatpush.bf16.msra.mxu2 %v3851_v56  ;;  %v2573_v56 = vpack.c.bf16 %v2005_v48, %v2005_v48  ;;  %v3087_v8 = vunpack.c.l.bf16 %v2575_v43  ;;  %v3954_v48 = vunpack.c.h.b16 %v7864_v33  ;;  %v8998_v43 = vpack.c.bf16 %v7456_v40, %v7449_v52  ;;  %v8999_v40 = vld [vmem:[#allocation64_spill] sm:$0xff] }
 0x379   : > { %8989 = vst [vmem:[#allocation28_spill] sm:$0xff] %v8089_v46  ;;  %v9049_v46 = vld [vmem:[#allocation12_spill] sm:$0xff] }
 0x37a   : > { %v8097_v26 = vpop.f32.mrf.mxu2  ;;  %v2450_v45 = vpop.f32.mrf.mxu3  ;;  %v3085_v6 = vunpack.c.l.bf16 %v2573_v56 }
 0x37b   : > { %v8099_v2 = vpop.f32.mrf.mxu1  ;;  %v2751_v15 = vpack.c.bf16 %v2450_v45, %v2450_v45 }
 0x37c   : > { %4064 = vmatpush.bf16.msra.mxu2 %v8990_v0  ;;  %v8996_v0 = vpack.c.bf16 %v7662_v32, %v7659_v51  ;;  %v3970_v51 = vpack.c.b16 %v3954_v48, %v3954_v48  ;;  %v8997_v32 = vpack.c.bf16 %v7587_v41, %v7584_v59  ;;  %v5900_v59 = vld [vmem:[%s8704_s6 + $0x390] sm:$0xff]  }
 0x37d   : > { %v3263_v10 = vunpack.c.l.bf16 %v2751_v15  ;;  %v2012_v21 = vpop.f32.mrf.mxu0  ;;  %v5373_v15 = vunpack.c.l.bf16 %v5810_v37 }
 0x37e   : > { %v2576_v30 = vpack.c.bf16 %v2012_v21, %v2012_v21  ;;  %v9000_v21 = vpack.c.bf16 %v7770_v34, %v8999_v40 }
 0x37f   : > { %v8123_v17 = vmul.f32 %v5729_v62, %v3263_v10  ;;  %v3086_v62 = vunpack.c.l.bf16 %v2574_v19  ;;  %v3597_v41 = vmul.f32 %v5373_v15, %v3085_v6 }
 0x380   : > { %4065 = vmatpush.bf16.msra.mxu2 %v8991_v20  ;;  %v3088_v10 = vunpack.c.l.bf16 %v2576_v30 }
 0x381   : > { %8994 = vst [vmem:[#allocation27_spill] sm:$0xff] %v8123_v17  ;;  %v9050_v17 = vld [vmem:[#allocation11_spill] sm:$0xff] }
 0x382   : > { %v8110_v28 = vpop.f32.mrf.mxu2  ;;  %v2452_v31 = vpop.f32.mrf.mxu3  ;;  %v3600_v33 = vmul.f32 %v5378_v53, %v3088_v10  ;;  %v5734_v53 = vunpack.c.h.bf16 %v5900_v59 }
 0x383   : > { %v2752_v47 = vpack.c.bf16 %v2452_v31, %v2452_v31  ;;  %v8112_v12 = vpop.f32.mrf.mxu1  ;;  %v3599_v31 = vmul.f32 %v5377_v27, %v3087_v8  ;;  %v5733_v27 = vunpack.c.l.bf16 %v5900_v59  ;;  %v9006_v59 = vld [vmem:[#allocation78_spill] sm:$0xff] }
 0x384   : > { %4066 = vmatpush.bf16.msra.mxu2 %v8992_v39  ;;  %v5374_v39 = vunpack.c.h.bf16 %v5810_v37 }
 0x385   : > { %v3264_v22 = vunpack.c.l.bf16 %v2752_v47  ;;  %v2625_v47 = vpack.c.bf16 %v7974_v50, %v7974_v50  ;;  %v3952_v50 = vunpack.c.h.b16 %v8074_v49  ;;  %v5268_v49 = vld [vmem:[%s8703_s5 + $0x3d8] sm:$0xff] }
 0x387   : > { %v8125_v38 = vmul.f32 %v5730_v18, %v3264_v22  ;;  %5120 = vmatmul.msk.bf16.gmra.mxu3 %vm1487_vm6, %v5267_v23  ;;  %v5836_v18 = vld [vmem:[%s8704_s6 + $0x190] sm:$0xff]   ;;  %v2626_v23 = vpack.c.bf16 %v8026_v5, %v8026_v5  ;;  %v3598_v22 = vmul.f32 %v5374_v39, %v3086_v62  ;;  %v3137_v19 = vunpack.c.l.bf16 %v2625_v47  ;;  %v9002_v62 = vld [vmem:[#allocation56_spill] sm:$0xff] }
 0x388   : > { %4067 = vmatpush.bf16.msra.mxu2 %v8993_v60  ;;  %v3830_v60 = vpack.c.bf16 %v3600_v33, %v3599_v31  ;;  %v5477_v56 = vunpack.c.l.bf16 %v5836_v18  ;;  %v5478_v37 = vunpack.c.h.bf16 %v5836_v18  ;;  %v3968_v15 = vpack.c.b16 %v3952_v50, %v3952_v50  ;;  %v9001_v39 = vld [vmem:[#allocation13_spill] sm:$0xff]  ;;  %v5837_v18 = vld [vmem:[%s8704_s6 + $0x198] sm:$0xff]  }
 0x389   : > { %8995 = vst [vmem:[#allocation25_spill] sm:$0xff] %v8125_v38  ;;  %v3138_v5 = vunpack.c.l.bf16 %v2626_v23  ;;  %v9003_v31 = vpack.c.bf16 %v9001_v39, %v9002_v62  ;;  %v2627_v33 = vpack.c.bf16 %v8047_v57, %v8047_v57  ;;  %v2628_v47 = vpack.c.bf16 %v8069_v58, %v8069_v58  ;;  %v5271_v38 = vld [vmem:[%s8703_s5 + $0x3f0] sm:$0xff] }
 0x38a   : > { %v8137_v45 = vpop.f32.mrf.mxu2  ;;  %v2455_v20 = vpop.f32.mrf.mxu3  ;;  %4042 = vmatpush.bf16.msrb.mxu0 %v3830_v60  ;;  %v8171_v10 = vmul.f32 %v5477_v56, %v3137_v19  ;;  %v5481_v58 = vunpack.c.l.bf16 %v5837_v18  ;;  %v5482_v56 = vunpack.c.h.bf16 %v5837_v18 }
 0x38b   : > { %v8139_v44 = vpop.f32.mrf.mxu1  ;;  %v2753_v24 = vpack.c.bf16 %v2455_v20, %v2455_v20  ;;  %v3829_v20 = vpack.c.bf16 %v3598_v22, %v3597_v41  ;;  %v8173_v34 = vmul.f32 %v5478_v37, %v3138_v5  ;;  %v9007_v41 = vld [vmem:[#allocation77_spill] sm:$0xff]  ;;  %v3139_v50 = vunpack.c.l.bf16 %v2627_v33  ;;  %v9009_v37 = vld [vmem:[#allocation74_spill] sm:$0xff] }
 0x38c   : > { %4068 = vmatpush.bf16.msra.mxu2 %v8996_v0  ;;  %v9008_v22 = vpack.c.bf16 %v9006_v59, %v9007_v41  ;;  %v3140_v19 = vunpack.c.l.bf16 %v2628_v47  ;;  %v9010_v5 = vld [vmem:[#allocation73_spill] sm:$0xff]  ;;  %v5269_v47 = vld [vmem:[%s8703_s5 + $0x3e0] sm:$0xff] }
 0x38d   : > { %v3265_v0 = vunpack.c.l.bf16 %v2753_v24  ;;  %v8199_v40 = vmul.f32 %v5481_v58, %v3139_v50  ;;  %v9015_v41 = vld [vmem:[#allocation63_spill] sm:$0xff] }
 0x38e   : > { %4043 = vmatpush.bf16.msrb.mxu0 %v3829_v20  ;;  %v9013_v20 = vld [vmem:[#allocation69_spill] sm:$0xff] }
 0x390   : > { %4069 = vmatpush.bf16.msra.mxu2 %v8997_v32 }
 0x391   : > { %4044 = vmatmul.bf16.vlgmr.msrb.gmra.mxu0 %v3968_v15 }
 0x392   : > { %v8158_v8 = vpop.f32.mrf.mxu2  ;;  %v2457_v52 = vpop.f32.mrf.mxu3 }
 0x393   : > { %4070 = vmatmul.bf16.vlgmr.msra.gmra.mxu2 %v3970_v51  ;;  %v2754_v30 = vpack.c.bf16 %v2457_v52, %v2457_v52  ;;  %v8163_v48 = vpop.f32.mrf.mxu1  ;;  %v8175_v51 = vmul.f32 %v5733_v27, %v3265_v0  ;;  %v9011_v27 = vpack.c.bf16 %v9009_v37, %v9010_v5  ;;  %v5901_v0 = vld [vmem:[%s8704_s6 + $0x398] sm:$0xff]   ;;  %v5840_v5 = vld [vmem:[%s8704_s6 + $0x1b0] sm:$0xff]  }
 0x394   : > { %4101 = vmatpush.bf16.msrb.mxu2 %v8998_v43  ;;  %v2633_v37 = vpack.c.bf16 %v8163_v48, %v8163_v48  ;;  %v9021_v48 = vld [vmem:[#allocation60_spill] sm:$0xff] }
 0x395   : > { %v3266_v6 = vunpack.c.l.bf16 %v2754_v30  ;;  %9004 = vst [vmem:[#allocation24_spill] sm:$0xff] %v8175_v51 }
 0x397   : > { %v8177_v32 = vmul.f32 %v5734_v53, %v3266_v6  ;;  %5121 = vmatmul.msk.bf16.gmra.mxu3 %vm1487_vm6, %v5268_v49  ;;  %v9012_v49 = vld [vmem:[#allocation70_spill] sm:$0xff]  ;;  %v5737_v6 = vunpack.c.l.bf16 %v5901_v0 }
 0x398   : > { %4102 = vmatpush.bf16.msrb.mxu2 %v9000_v21  ;;  %v8201_v21 = vmul.f32 %v5482_v56, %v3140_v19  ;;  %v9014_v15 = vpack.c.bf16 %v9012_v49, %v9013_v20  ;;  %v5841_v19 = vld [vmem:[%s8704_s6 + $0x1b8] sm:$0xff]  }
 0x399   : > { %9005 = vst [vmem:[#allocation8_spill] sm:$0xff] %v8177_v32  ;;  %v5498_v13 = vunpack.c.h.bf16 %v5841_v19 }
 0x39a   : > { %v8189_v43 = vpop.f32.mrf.mxu2  ;;  %v2460_v24 = vpop.f32.mrf.mxu3 }
 0x39b   : > { %v2157_v60 = vpop.f32.mrf.mxu1  ;;  %v2755_v52 = vpack.c.bf16 %v2460_v24, %v2460_v24 }
 0x39c   : > { %4103 = vmatpush.bf16.msrb.mxu2 %v9003_v31  ;;  %v5738_v31 = vunpack.c.h.bf16 %v5901_v0  ;;  %v5839_v0 = vld [vmem:[%s8704_s6 + $0x1a8] sm:$0xff]  }
 0x39d   : > { %v3267_v39 = vunpack.c.l.bf16 %v2755_v52  ;;  %v5489_v23 = vunpack.c.l.bf16 %v5839_v0 }
 0x39f   : > { %v8219_v50 = vmul.f32 %v5737_v6, %v3267_v39  ;;  %v9020_v6 = vld [vmem:[#allocation61_spill] sm:$0xff] }
 0x3a0   : > { %4104 = vmatpush.bf16.msrb.mxu2 %v9008_v22  ;;  %v9016_v22 = vld [vmem:[#allocation62_spill] sm:$0xff]  ;;  %v9022_v39 = vpack.c.bf16 %v9020_v6, %v9021_v48  ;;  %v2689_v6 = vpack.c.bf16 %v8097_v26, %v8097_v26 }
 0x3a1   : > { %v9017_v58 = vpack.c.bf16 %v9015_v41, %v9016_v22  ;;  %9018 = vst [vmem:[#allocation7_spill] sm:$0xff] %v8219_v50  ;;  %v9024_v41 = vld [vmem:[#allocation37_spill] sm:$0xff]  ;;  %v3145_v22 = vunpack.c.l.bf16 %v2633_v37  ;;  %v2630_v37 = vpack.c.bf16 %v8099_v2, %v8099_v2  ;;  %v5867_v2 = vld [vmem:[%s8704_s6 + $0x288] sm:$0xff]  }
 0x3a2   : > { %v8206_v30 = vpop.f32.mrf.mxu2  ;;  %v2462_v53 = vpop.f32.mrf.mxu3 }
 0x3a3   : > { %v2756_v62 = vpack.c.bf16 %v2462_v53, %v2462_v53  ;;  %v2160_v33 = vpop.f32.mrf.mxu1  ;;  %v5497_v53 = vunpack.c.l.bf16 %v5841_v19 }
 0x3a4   : > { %4105 = vmatpush.bf16.msrb.mxu2 %v9011_v27  ;;  %v2635_v59 = vpack.c.bf16 %v2160_v33, %v2160_v33  ;;  %v2634_v27 = vpack.c.bf16 %v2157_v60, %v2157_v60  ;;  %v2631_v60 = vpack.c.bf16 %v8112_v12, %v8112_v12  ;;  %v5494_v33 = vunpack.c.h.bf16 %v5840_v5  ;;  %v5868_v12 = vld [vmem:[%s8704_s6 + $0x290] sm:$0xff]  }
 0x3a5   : > { %v3268_v24 = vunpack.c.l.bf16 %v2756_v62  ;;  %v2632_v62 = vpack.c.bf16 %v8139_v44, %v8139_v44  ;;  %v2690_v44 = vpack.c.bf16 %v8110_v28, %v8110_v28  ;;  %v5606_v52 = vunpack.c.h.bf16 %v5868_v12 }
 0x3a6   : > { %v3147_v49 = vunpack.c.l.bf16 %v2635_v59  ;;  %v3143_v19 = vunpack.c.l.bf16 %v2631_v60  ;;  %v3201_v60 = vunpack.c.l.bf16 %v2689_v6  ;;  %v8290_v6 = vld [vmem:[%s8704_s6 + $0x180] sm:$0xff]  }
 0x3a7   : > { %v8221_v56 = vmul.f32 %v5738_v31, %v3268_v24  ;;  %5122 = vmatmul.msk.bf16.gmra.mxu3 %vm1487_vm6, %v5269_v47  ;;  %v5493_v31 = vunpack.c.l.bf16 %v5840_v5  ;;  %v9023_v24 = vld [vmem:[#allocation38_spill] sm:$0xff] }
 0x3a8   : > { %4106 = vmatpush.bf16.msrb.mxu2 %v9014_v15  ;;  %v9025_v59 = vpack.c.bf16 %v9023_v24, %v9024_v41  ;;  %v3659_v5 = vmul.f32 %v5497_v53, %v3147_v49  ;;  %v9027_v24 = vld [vmem:[#allocation32_spill] sm:$0xff]  ;;  %v5838_v41 = vld [vmem:[%s8704_s6 + $0x1a0] sm:$0xff]   ;;  %v5605_v49 = vunpack.c.l.bf16 %v5868_v12  ;;  %v9031_v12 = vld [vmem:[#allocation29_spill] sm:$0xff] }
 0x3a9   : > { %9019 = vst [vmem:[#allocation64_spill] sm:$0xff] %v8221_v56  ;;  %v3657_v28 = vmul.f32 %v5493_v31, %v3145_v22  ;;  %v5486_v22 = vunpack.c.h.bf16 %v5838_v41 }
 0x3aa   : > { %v8237_v20 = vpop.f32.mrf.mxu2  ;;  %v8239_v15 = vpop.f32.mrf.mxu3  ;;  %v8304_v18 = vmul.f32 %v5605_v49, %v3201_v60  ;;  %v5597_v60 = vunpack.c.l.bf16 %v5866_v9 }
 0x3ab   : > { %v2162_v47 = vpop.f32.mrf.mxu1 }
 0x3ac   : > { %4107 = vmatpush.bf16.msrb.mxu2 %v9017_v58  ;;  %v3146_v58 = vunpack.c.l.bf16 %v2634_v27  ;;  %v2636_v55 = vpack.c.bf16 %v2162_v47, %v2162_v47  ;;  %v5490_v27 = vunpack.c.h.bf16 %v5839_v0  ;;  %v9026_v47 = vld [vmem:[#allocation34_spill] sm:$0xff]  ;;  %v2688_v0 = vpack.c.bf16 %v8080_v36, %v8080_v36  ;;  %v5270_v36 = vld [vmem:[%s8703_s5 + $0x3e8] sm:$0xff] }
 0x3ad   : > { %v9028_v26 = vpack.c.bf16 %v9026_v47, %v9027_v24  ;;  %v3202_v47 = vunpack.c.l.bf16 %v2690_v44  ;;  %v8295_v44 = vld [vmem:[%s8704_s6 + $0x270] sm:$0xff]  }
 0x3ae   : > { %v3148_v48 = vunpack.c.l.bf16 %v2636_v55  ;;  %v3658_v53 = vmul.f32 %v5494_v33, %v3146_v58  ;;  %v9030_v58 = vld [vmem:[#allocation30_spill] sm:$0xff]  ;;  %v3200_v57 = vunpack.c.l.bf16 %v2688_v0 }
 0x3af   : > { %v8324_v0 = vld [vmem:[%s8704_s6 + $0x278] sm:$0xff]  }
 0x3b0   : > { %4108 = vmatpush.bf16.msrb.mxu2 %v9022_v39  ;;  %v2629_v39 = vpack.c.bf16 %v8082_v14, %v8082_v14  ;;  %v3660_v55 = vmul.f32 %v5498_v13, %v3148_v48  ;;  %v2687_v14 = vpack.c.bf16 %v8067_v25, %v8067_v25  ;;  %v9029_v13 = vld [vmem:[#allocation84_spill] sm:$0xff]  ;;  %v5485_v25 = vunpack.c.l.bf16 %v5838_v41 }
 0x3b1   : > { %v2621_v31 = vpack.c.bf16 %v9029_v13, %v9029_v13  ;;  %v9032_v48 = vpack.c.bf16 %v9030_v58, %v9031_v12  ;;  %v2685_v13 = vpack.c.bf16 %v8012_v42, %v8012_v42  ;;  %v2686_v58 = vpack.c.bf16 %v8045_v4, %v8045_v4  ;;  %v9033_v4 = vld [vmem:[#allocation22_spill] sm:$0xff] }
 0x3b2   : > { %v3860_v24 = vpack.c.bf16 %v3660_v55, %v3659_v5  ;;  %v3141_v33 = vunpack.c.l.bf16 %v2629_v39  ;;  %v3142_v5 = vunpack.c.l.bf16 %v2630_v37  ;;  %v3655_v39 = vmul.f32 %v5489_v23, %v3143_v19  ;;  %v9043_v19 = vld [vmem:[#allocation83_spill] sm:$0xff] }
 0x3b3   : > { %v3859_v55 = vpack.c.bf16 %v3658_v53, %v3657_v28  ;;  %v5601_v12 = vunpack.c.l.bf16 %v5867_v2  ;;  %v3199_v35 = vunpack.c.l.bf16 %v2687_v14  ;;  %v8306_v23 = vmul.f32 %v5606_v52, %v3202_v47  ;;  %v8319_v53 = vld [vmem:[%s8704_s6 + $0x188] sm:$0xff]  }
 0x3b4   : > { %4140 = vmatpush.bf16.msra.mxu2 %v9025_v59  ;;  %v3144_v59 = vunpack.c.l.bf16 %v2632_v62  ;;  %v8277_v62 = vpop.f32.mrf.mxu3  ;;  %4075 = vmatpush.bf16.msra.mxu0 %v3860_v24  ;;  %v5469_v37 = vunpack.c.l.bf16 %v8290_v6  ;;  %v3653_v52 = vmul.f32 %v5485_v25, %v3141_v33  ;;  %v3654_v14 = vmul.f32 %v5486_v22, %v3142_v5  ;;  %v9037_v22 = vld [vmem:[#allocation31_spill] sm:$0xff] }
 0x3b5   : > { %v3197_v47 = vunpack.c.l.bf16 %v2685_v13  ;;  %v5598_v24 = vunpack.c.h.bf16 %v5866_v9  ;;  %v2622_v5 = vpack.c.bf16 %v9037_v22, %v9037_v22 }
 0x3b6   : > { %v3656_v41 = vmul.f32 %v5490_v27, %v3144_v59  ;;  %v9034_v27 = vld [vmem:[#allocation21_spill] sm:$0xff]  ;;  %v3857_v25 = vpack.c.bf16 %v3654_v14, %v3653_v52 }
 0x3b7   : > { %5123 = vmatmul.msk.bf16.gmra.mxu3 %vm1487_vm6, %v5270_v36  ;;  %v9035_v59 = vpack.c.bf16 %v9033_v4, %v9034_v27  ;;  %v3198_v36 = vunpack.c.l.bf16 %v2686_v58  ;;  %v8326_v4 = vmul.f32 %v5601_v12, %v3199_v35  ;;  %v5473_v35 = vunpack.c.l.bf16 %v8319_v53  ;;  %v9042_v58 = vld [vmem:[#allocation39_spill] sm:$0xff]  ;;  %v5872_v52 = vld [vmem:[%s8704_s6 + $0x2b0] sm:$0xff]  }
 0x3b8   : > { %4141 = vmatpush.bf16.msra.mxu2 %v9028_v26  ;;  %v8275_v26 = vpop.f32.mrf.mxu2  ;;  %4076 = vmatpush.bf16.msra.mxu0 %v3859_v55  ;;  %v3858_v49 = vpack.c.bf16 %v3656_v41, %v3655_v39  ;;  %v9038_v39 = vld [vmem:[#allocation19_spill] sm:$0xff]  ;;  %v9039_v41 = vld [vmem:[#allocation18_spill] sm:$0xff]  ;;  %v2624_v12 = vpack.c.bf16 %v9042_v58, %v9042_v58  ;;  %v8358_v58 = vmul.f32 %v5597_v60, %v3197_v47  ;;  %v3134_v14 = vunpack.c.l.bf16 %v2622_v5 }
 0x3b9   : > { %v2623_v9 = vpack.c.bf16 %v9038_v39, %v9038_v39  ;;  %v9046_v60 = vld [vmem:[#allocation15_spill] sm:$0xff]  ;;  %v2684_v39 = vpack.c.bf16 %v7969_v7, %v7969_v7  ;;  %v2694_v7 = vpack.c.bf16 %v8206_v30, %v8206_v30  ;;  %v9052_v30 = vld [vmem:[#allocation20_spill] sm:$0xff] }
 0x3ba   : > { %v3136_v22 = vunpack.c.l.bf16 %v2624_v12  ;;  %v5870_v12 = vld [vmem:[%s8704_s6 + $0x2a0] sm:$0xff]  }
 0x3bc   : > { %4142 = vmatpush.bf16.msra.mxu2 %v9032_v48  ;;  %v5602_v48 = vunpack.c.h.bf16 %v5867_v2  ;;  %v3133_v2 = vunpack.c.l.bf16 %v2621_v31  ;;  %v8330_v28 = vpop.f32.mrf.mxu3  ;;  %v9036_v31 = vld [vmem:[#allocation82_spill] sm:$0xff]  ;;  %4077 = vmatpush.bf16.msra.mxu0 %v3858_v49  ;;  %v3135_v49 = vunpack.c.l.bf16 %v2623_v9 }
 0x3be   : > { %v8328_v27 = vmul.f32 %v5602_v48, %v3200_v57  ;;  %v9040_v57 = vld [vmem:[#allocation17_spill] sm:$0xff]  ;;  %v5474_v48 = vunpack.c.h.bf16 %v8319_v53  ;;  %v8350_v33 = vmul.f32 %v5469_v37, %v3133_v2  ;;  %v8360_v53 = vmul.f32 %v5598_v24, %v3198_v36  ;;  %v9048_v24 = vld [vmem:[#allocation40_spill] sm:$0xff] }
 0x3bf   : > { %v9041_v55 = vpack.c.bf16 %v9039_v41, %v9040_v57  ;;  %v5871_v41 = vld [vmem:[%s8704_s6 + $0x2a8] sm:$0xff]   ;;  %v2695_v2 = vpack.c.bf16 %v8237_v20, %v8237_v20  ;;  %v2683_v36 = vpack.c.bf16 %v9048_v24, %v9048_v24  ;;  %v8381_v20 = vld [vmem:[%s8702_s4 + $0x18] sm:$0xff]  ;;  %v3647_v32 = vmul.f32 %v5473_v35, %v3135_v49 }
 0x3c0   : > { %4143 = vmatpush.bf16.msra.mxu2 %v9035_v59  ;;  %v2315_v59 = vpop.f32.mrf.mxu2  ;;  %v5617_v37 = vunpack.c.l.bf16 %v5871_v41  ;;  %4078 = vmatpush.bf16.msra.mxu0 %v3857_v25  ;;  %v5618_v5 = vunpack.c.h.bf16 %v5871_v41  ;;  %v3648_v56 = vmul.f32 %v5474_v48, %v3136_v22  ;;  %v2692_v35 = vpack.c.bf16 %v8158_v8, %v8158_v8 }
 0x3c1   : > { %v2697_v57 = vpack.c.bf16 %v2315_v59, %v2315_v59  ;;  %v2696_v59 = vpack.c.bf16 %v8275_v26, %v8275_v26  ;;  %v5621_v26 = vunpack.c.l.bf16 %v5872_v52  ;;  %v3195_v50 = vunpack.c.l.bf16 %v2683_v36 }
 0x3c2   : > { %v5614_v22 = vunpack.c.h.bf16 %v5870_v12  ;;  %v3206_v49 = vunpack.c.l.bf16 %v2694_v7  ;;  %v9057_v8 = vunpack.c.h.bf16 %v8290_v6  ;;  %v9060_v7 = vunpack.c.h.bf16 %v8324_v0 }
 0x3c3   : > { %v3209_v9 = vunpack.c.l.bf16 %v2697_v57  ;;  %v3207_v57 = vunpack.c.l.bf16 %v2695_v2  ;;  %v3208_v42 = vunpack.c.l.bf16 %v2696_v59  ;;  %v9053_v2 = vpack.c.bf16 %v8201_v21, %v8199_v40 }
 0x3c4   : > { %4144 = vmatpush.bf16.msra.mxu2 %v9041_v55  ;;  %v9044_v55 = vld [vmem:[#allocation33_spill] sm:$0xff]  ;;  %v8391_v24 = vpop.f32.mrf.mxu3  ;;  %v3196_v59 = vunpack.c.l.bf16 %v2684_v39 }
 0x3c5   : > { %v2681_v13 = vpack.c.bf16 %v9044_v55, %v9044_v55  ;;  %v9045_v55 = vld [vmem:[#allocation16_spill] sm:$0xff]  ;;  %4079 = vmatpush.bf16.msra.mxu0 %v9053_v2  ;;  %v3721_v41 = vmul.f32 %v5621_v26, %v3209_v9  ;;  %v3719_v40 = vmul.f32 %v5617_v37, %v3207_v57  ;;  %v3720_v21 = vmul.f32 %v5618_v5, %v3208_v42 }
 0x3c6   : > { %v9047_v47 = vpack.c.bf16 %v9045_v55, %v9046_v60  ;;  %v3956_v55 = vunpack.c.h.b16 %v8381_v20  ;;  %v2693_v60 = vpack.c.bf16 %v8189_v43, %v8189_v43  ;;  %v9051_v43 = vpack.c.bf16 %v9049_v46, %v9050_v17  ;;  %v5863_v37 = vld [vmem:[%s8704_s6 + $0x268] sm:$0xff]  }
 0x3c7   : > { %v2691_v17 = vpack.c.bf16 %v8137_v45, %v8137_v45  ;;  %5124 = vmatmul.msk.bf16.gmra.mxu3 %vm1487_vm6, %v5271_v38  ;;  %v8420_v45 = vld [vmem:[%s8702_s4 + $0x20] sm:$0xff]  ;;  %v3193_v26 = vunpack.c.l.bf16 %v2681_v13  ;;  %v3646_v9 = vmul.f32 %v9057_v8, %v3134_v14  ;;  %v9058_v42 = vpack.c.bf16 %v8173_v34, %v8171_v10 }
 0x3c8   : > { %4145 = vmatpush.bf16.msra.mxu2 %v9047_v47  ;;  %v2317_v25 = vpop.f32.mrf.mxu2  ;;  %v5622_v47 = vunpack.c.h.bf16 %v5872_v52  ;;  %v3972_v51 = vpack.c.b16 %v3956_v55, %v3956_v55  ;;  %v2682_v52 = vpack.c.bf16 %v9052_v30, %v9052_v30  ;;  %v5869_v55 = vld [vmem:[%s8704_s6 + $0x298] sm:$0xff]   ;;  %v3205_v48 = vunpack.c.l.bf16 %v2693_v60 }
 0x3c9   : > { %v2698_v29 = vpack.c.bf16 %v2317_v25, %v2317_v25  ;;  %v5613_v25 = vunpack.c.l.bf16 %v5870_v12  ;;  %4080 = vmatpush.bf16.msra.mxu0 %v9058_v42  ;;  %v3957_v38 = vunpack.c.l.b16 %v8420_v45  ;;  %v9059_v5 = vunpack.c.l.bf16 %v8324_v0  ;;  %v9061_v0 = vld [vmem:[#allocation59_spill] sm:$0xff] }
 0x3ca   : > { %4096 = vmatmul.bf16.vlgmr.msrb.gmra.mxu1 %v3972_v51  ;;  %v9055_v51 = vld [vmem:[#allocation9_spill] sm:$0xff]  ;;  %v3194_v60 = vunpack.c.l.bf16 %v2682_v52  ;;  %v3708_v13 = vmul.f32 %v9060_v7, %v3196_v59  ;;  %v3203_v14 = vunpack.c.l.bf16 %v2691_v17  ;;  %v5610_v57 = vunpack.c.h.bf16 %v5869_v55  ;;  %v9062_v59 = vld [vmem:[#allocation79_spill] sm:$0xff] }
 0x3cb   : > { %v3210_v46 = vunpack.c.l.bf16 %v2698_v29  ;;  %v9054_v29 = vld [vmem:[#allocation10_spill] sm:$0xff]  ;;  %v3707_v12 = vmul.f32 %v9059_v5, %v3195_v50  ;;  %v3854_v10 = vpack.c.bf16 %v3648_v56, %v3647_v32  ;;  %v3973_v34 = vpack.c.b16 %v3957_v38, %v3957_v38 }
 0x3cc   : > { %4146 = vmatpush.bf16.msra.mxu2 %v9051_v43  ;;  %v9056_v36 = vpack.c.bf16 %v9054_v29, %v9055_v51  ;;  %v8435_v43 = vpop.f32.mrf.mxu3  ;;  %v3204_v30 = vunpack.c.l.bf16 %v2692_v35  ;;  %v3717_v52 = vmul.f32 %v5613_v25, %v3205_v48  ;;  %v3718_v2 = vmul.f32 %v5614_v22, %v3206_v49  ;;  %v9068_v5 = vld [vmem:[#allocation14_spill] sm:$0xff] }
 0x3cd   : > { %v3722_v39 = vmul.f32 %v5622_v47, %v3210_v46  ;;  %v5609_v47 = vunpack.c.l.bf16 %v5869_v55  ;;  %v3890_v46 = vpack.c.bf16 %v3720_v21, %v3719_v40  ;;  %v5585_v29 = vunpack.c.l.bf16 %v5863_v37  ;;  %4081 = vmatpush.bf16.msra.mxu0 %v3854_v10  ;;  %4109 = vmatmul.bf16.vlgmr.msrb.gmra.mxu2 %v3973_v34  ;;  %v5862_v55 = vld [vmem:[%s8704_s6 + $0x260] sm:$0xff]  }
 0x3ce   : > { %v5586_v51 = vunpack.c.h.bf16 %v5863_v37  ;;  %v3955_v50 = vunpack.c.l.b16 %v8381_v20  ;;  %v2678_v17 = vpack.c.bf16 %v9062_v59, %v9062_v59  ;;  %v9063_v32 = vpack.c.bf16 %v9036_v31, %v9036_v31  ;;  %v9067_v37 = vld [vmem:[#allocation55_spill] sm:$0xff]  ;;  %v5905_v59 = vld [vmem:[%s8704_s6 + $0x3b8] sm:$0xff]  }
 0x3cf   : > { %v3891_v6 = vpack.c.bf16 %v3722_v39, %v3721_v41  ;;  %v2677_v41 = vpack.c.bf16 %v9061_v0, %v9061_v0  ;;  %v3884_v25 = vpack.c.bf16 %v3708_v13, %v3707_v12  ;;  %v9064_v35 = vpack.c.bf16 %v9043_v19, %v9043_v19 }
 0x3d0   : > { %4147 = vmatpush.bf16.msra.mxu2 %v9056_v36  ;;  %v3191_v56 = vunpack.c.l.bf16 %v9063_v32  ;;  %v9065_v48 = vunpack.c.l.bf16 %v8295_v44  ;;  %v9066_v49 = vunpack.c.h.bf16 %v8295_v44  ;;  %v3853_v21 = vpack.c.bf16 %v3646_v9, %v8350_v33  ;;  %v5861_v33 = vld [vmem:[%s8704_s6 + $0x258] sm:$0xff]  }
 0x3d1   : > { %4128 = vmatpush.bf16.msra.mxu1 %v3891_v6  ;;  %v3192_v20 = vunpack.c.l.bf16 %v9064_v35  ;;  %v3715_v39 = vmul.f32 %v5609_v47, %v3203_v14  ;;  %v3716_v31 = vmul.f32 %v5610_v57, %v3204_v30  ;;  %v3889_v36 = vpack.c.bf16 %v3718_v2, %v3717_v52  ;;  %v5272_v47 = vld [vmem:[%s8703_s5 + $0x3f8] sm:$0xff] }
 0x3d2   : > { %v3705_v22 = vmul.f32 %v9065_v48, %v3193_v26  ;;  %v3706_v40 = vmul.f32 %v9066_v49, %v3194_v60  ;;  %v3971_v8 = vpack.c.b16 %v3955_v50, %v3955_v50  ;;  %4082 = vmatpush.bf16.msra.mxu0 %v3853_v21  ;;  %v5581_v42 = vunpack.c.l.bf16 %v5862_v55 }
 0x3d3   : > { %v5582_v38 = vunpack.c.h.bf16 %v5862_v55  ;;  %v2675_v19 = vpack.c.bf16 %v9067_v37, %v9067_v37  ;;  %v2676_v26 = vpack.c.bf16 %v9068_v5, %v9068_v5  ;;  %v3189_v12 = vunpack.c.l.bf16 %v2677_v41  ;;  %v5902_v5 = vld [vmem:[%s8704_s6 + $0x3a0] sm:$0xff]  }
 0x3d4   : > { %v3703_v44 = vmul.f32 %v5585_v29, %v3191_v56  ;;  %v2477_v60 = vpop.f32.mrf.mxu3  ;;  %v3190_v9 = vunpack.c.l.bf16 %v2678_v17  ;;  %v3704_v7 = vmul.f32 %v5586_v51, %v3192_v20  ;;  %v3883_v13 = vpack.c.bf16 %v3706_v40, %v3705_v22 }
 0x3d5   : > { %4129 = vmatpush.bf16.msra.mxu1 %v3890_v46  ;;  %v3888_v6 = vpack.c.bf16 %v3716_v31, %v3715_v39  ;;  %4083 = vmatmul.bf16.vlgmr.msra.gmra.mxu0 %v3971_v8  ;;  %v5577_v14 = vunpack.c.l.bf16 %v5861_v33  ;;  %v3187_v57 = vunpack.c.l.bf16 %v2675_v19  ;;  %v5578_v10 = vunpack.c.h.bf16 %v5861_v33 }
 0x3d6   : > { %4114 = vmatpush.bf16.msrb.mxu0 %v3884_v25  ;;  %v3188_v34 = vunpack.c.l.bf16 %v2676_v26  ;;  %v3701_v30 = vmul.f32 %v5581_v42, %v3189_v12  ;;  %v3702_v52 = vmul.f32 %v5582_v38, %v3190_v9  ;;  %v3882_v2 = vpack.c.bf16 %v3704_v7, %v3703_v44  ;;  %v9078_v12 = vld [vmem:[#allocation46_spill] sm:$0xff]  ;;  %v9080_v9 = vld [vmem:[#allocation23_spill] sm:$0xff] }
 0x3d7   : > { %5125 = vmatmul.msk.bf16.gmra.mxu3 %vm1487_vm6, %v5272_v47  ;;  %v3699_v29 = vmul.f32 %v5577_v14, %v3187_v57  ;;  %v9069_v50 = vpack.c.bf16 %v8306_v23, %v8304_v18  ;;  %v9070_v17 = vpack.c.bf16 %v8328_v27, %v8326_v4  ;;  %v2762_v56 = vpack.c.bf16 %v2477_v60, %v2477_v60  ;;  %v5904_v23 = vld [vmem:[%s8704_s6 + $0x3b0] sm:$0xff]   ;;  %v9081_v7 = vld [vmem:[#allocation26_spill] sm:$0xff]  ;;  %v9083_v14 = vld [vmem:[#allocation72_spill] sm:$0xff] }
 0x3d8   : > { %v3700_v51 = vmul.f32 %v5578_v10, %v3188_v34  ;;  %v3881_v0 = vpack.c.bf16 %v3702_v52, %v3701_v30  ;;  %v5753_v25 = vunpack.c.l.bf16 %v5905_v59  ;;  %v2761_v18 = vpack.c.bf16 %v8435_v43, %v8435_v43  ;;  %v9084_v57 = vld [vmem:[#allocation71_spill] sm:$0xff] }
 0x3d9   : > { %4130 = vmatpush.bf16.msra.mxu1 %v3889_v36  ;;  %v5754_v48 = vunpack.c.h.bf16 %v5905_v59  ;;  %v9071_v22 = vpack.c.bf16 %v8360_v53, %v8358_v58  ;;  %v9072_v4 = vpack.c.bf16 %v8062_v1, %v8060_v11  ;;  %v2760_v27 = vpack.c.bf16 %v8391_v24, %v8391_v24  ;;  %v5903_v58 = vld [vmem:[%s8704_s6 + $0x3a8] sm:$0xff]   ;;  %v5906_v52 = vld [vmem:[%s8704_s6 + $0x3c0] sm:$0xff]  }
 0x3da   : > { %4115 = vmatpush.bf16.msrb.mxu0 %v3883_v13  ;;  %v3880_v32 = vpack.c.bf16 %v3700_v51, %v3699_v29  ;;  %v5750_v49 = vunpack.c.h.bf16 %v5904_v23  ;;  %v3274_v43 = vunpack.c.l.bf16 %v2762_v56  ;;  %v9073_v21 = vpack.c.bf16 %v8037_v16, %v8035_v3  ;;  %v9089_v59 = vld [vmem:[#allocation68_spill] sm:$0xff] }
 0x3db   : > { %v5749_v39 = vunpack.c.l.bf16 %v5904_v23  ;;  %v2759_v31 = vpack.c.bf16 %v8330_v28, %v8330_v28  ;;  %v3273_v11 = vunpack.c.l.bf16 %v2761_v18  ;;  %v5746_v36 = vunpack.c.h.bf16 %v5903_v58  ;;  %v9075_v28 = vld [vmem:[#allocation36_spill] sm:$0xff]  ;;  %v9092_v23 = vld [vmem:[#allocation81_spill] sm:$0xff] }
 0x3dc   : > { %v2480_v46 = vpop.f32.mrf.mxu3  ;;  %v9074_v24 = vpack.c.bf16 %v7996_v61, %v7994_v63  ;;  %v2758_v3 = vpack.c.bf16 %v8277_v62, %v8277_v62  ;;  %v3272_v16 = vunpack.c.l.bf16 %v2760_v27  ;;  %v3786_v8 = vmul.f32 %v5750_v49, %v3274_v43  ;;  %v9077_v62 = vld [vmem:[#allocation45_spill] sm:$0xff]  ;;  %v9095_v49 = vld [vmem:[#allocation66_spill] sm:$0xff] }
 0x3dd   : > { %4131 = vmatpush.bf16.msra.mxu1 %v3888_v6  ;;  %v2763_v41 = vpack.c.bf16 %v2480_v46, %v2480_v46  ;;  %v9076_v38 = vpack.c.bf16 %v7963_v54, %v9075_v28  ;;  %v2757_v37 = vpack.c.bf16 %v8239_v15, %v8239_v15  ;;  %v5745_v63 = vunpack.c.l.bf16 %v5903_v58  ;;  %v9087_v46 = vld [vmem:[#allocation85_spill] sm:$0xff] }
 0x3de   : > { %4116 = vmatpush.bf16.msrb.mxu0 %v3882_v2  ;;  %v3271_v61 = vunpack.c.l.bf16 %v2759_v31  ;;  %v3785_v26 = vmul.f32 %v5749_v39, %v3273_v11  ;;  %v9079_v44 = vpack.c.bf16 %v9077_v62, %v9078_v12  ;;  %v5742_v60 = vunpack.c.h.bf16 %v5902_v5  ;;  %v9086_v2 = vld [vmem:[#allocation86_spill] sm:$0xff]  ;;  %v9096_v43 = vld [vmem:[#allocation65_spill] sm:$0xff] }
 0x3df   : > { %v3275_v35 = vunpack.c.l.bf16 %v2763_v41  ;;  %v3270_v33 = vunpack.c.l.bf16 %v2758_v3  ;;  %v3784_v54 = vmul.f32 %v5746_v36, %v3272_v16  ;;  %v9082_v13 = vpack.c.bf16 %v9080_v9, %v9081_v7  ;;  %v9098_v11 = vld [vmem:[#allocation41_spill] sm:$0xff]  ;;  %v5907_v9 = vld [vmem:[%s8704_s6 + $0x3c8] sm:$0xff]  }
 0x3e0   : > { %v3923_v15 = vpack.c.bf16 %v3786_v8, %v3785_v26  ;;  %v5741_v47 = vunpack.c.l.bf16 %v5902_v5  ;;  %v3269_v6 = vunpack.c.l.bf16 %v2757_v37  ;;  %v9085_v10 = vpack.c.bf16 %v9083_v14, %v9084_v57  ;;  %v9101_v8 = vld [vmem:[#allocation58_spill] sm:$0xff]  ;;  %v9105_v37 = vld [vmem:[#allocation7_spill] sm:$0xff]  ;;  %v9107_v5 = vld [vmem:[#allocation49_spill] sm:$0xff] }
 0x3e1   : > { %4132 = vmatpush.bf16.msra.mxu1 %v9069_v50  ;;  %v3787_v1 = vmul.f32 %v5753_v25, %v3275_v35  ;;  %v3783_v34 = vmul.f32 %v5745_v63, %v3271_v61  ;;  %v9088_v29 = vpack.c.bf16 %v9086_v2, %v9087_v46  ;;  %v3782_v51 = vmul.f32 %v5742_v60, %v3270_v33  ;;  %v9093_v35 = vld [vmem:[#allocation80_spill] sm:$0xff]  ;;  %v9108_v63 = vld [vmem:[#allocation50_spill] sm:$0xff]  ;;  %v9111_v62 = vld [vmem:[#allocation53_spill] sm:$0xff] }
 0x3e2   : > { %4117 = vmatpush.bf16.msrb.mxu0 %v3881_v0  ;;  %v3781_v0 = vmul.f32 %v5741_v47, %v3269_v6  ;;  %v5757_v56 = vunpack.c.l.bf16 %v5906_v52  ;;  %v5758_v18 = vunpack.c.h.bf16 %v5906_v52  ;;  %v3958_v31 = vunpack.c.h.b16 %v8420_v45  ;;  %v9110_v26 = vld [vmem:[#allocation54_spill] sm:$0xff]  ;;  %v9113_v60 = vld [vmem:[#allocation8_spill] sm:$0xff]  ;;  %v9120_v14 = vld [vmem:[#allocation51_spill] sm:$0xff] }
 0x3e3   : > { %v3922_v50 = vpack.c.bf16 %v3784_v54, %v3783_v34  ;;  %v9109_v61 = vpack.c.bf16 %v9107_v5, %v9108_v63  ;;  %v9112_v12 = vpack.c.bf16 %v9110_v26, %v9111_v62  ;;  %v9114_v33 = vld [vmem:[#allocation24_spill] sm:$0xff]  ;;  %v5762_v52 = vunpack.c.h.bf16 %v5907_v9  ;;  %v9122_v2 = vld [vmem:[#allocation25_spill] sm:$0xff]  ;;  %v9123_v46 = vld [vmem:[#allocation27_spill] sm:$0xff] }
 0x3e4   : > { %v2482_v55 = vpop.f32.mrf.mxu3  ;;  %v3974_v36 = vpack.c.b16 %v3958_v31, %v3958_v31  ;;  %v9115_v54 = vpack.c.bf16 %v9113_v60, %v9114_v33  ;;  %v9116_v7 = vld [vmem:[#allocation76_spill] sm:$0xff] }
 0x3e5   : > { %4133 = vmatpush.bf16.msra.mxu1 %v9070_v17  ;;  %v2764_v20 = vpack.c.bf16 %v2482_v55, %v2482_v55  ;;  %v9090_v17 = vld [vmem:[#allocation67_spill] sm:$0xff]  ;;  %v9119_v6 = vld [vmem:[#allocation52_spill] sm:$0xff] }
 0x3e6   : > { %4118 = vmatpush.bf16.msrb.mxu0 %v3880_v32  ;;  %v9091_v32 = vpack.c.bf16 %v9089_v59, %v9090_v17  ;;  %v9121_v57 = vpack.c.bf16 %v9119_v6, %v9120_v14  ;;  %v9126_v59 = vld [vmem:[#allocation47_spill] sm:$0xff]  ;;  %v4019_v6 = vpop.f32.mrf.mxu1 }
 0x3e7   : > { %v3276_v40 = vunpack.c.l.bf16 %v2764_v20  ;;  %v9094_v20 = vpack.c.bf16 %v9092_v23, %v9093_v35 }
 0x3e9   : > { %4134 = vmatpush.bf16.msra.mxu1 %v9071_v22  ;;  %v3788_v53 = vmul.f32 %v5754_v48, %v3276_v40  ;;  %v3938_v48 = vld [vmem:[%s8702_s4 + $0x28] sm:$0xff]  ;;  %v9097_v40 = vpack.c.bf16 %v9095_v49, %v9096_v43  ;;  %v9132_v43 = vld [vmem:[#allocation43_spill] sm:$0xff] }
 0x3ea   : > { %4119 = vmatpush.bf16.msrb.mxu0 %v9073_v21  ;;  %v3960_v27 = vunpack.c.h.b16 %v3938_v48  ;;  %v9131_v49 = vld [vmem:[#allocation44_spill] sm:$0xff] }
 0x3eb   : > { %v3924_v42 = vpack.c.bf16 %v3788_v53, %v3787_v1  ;;  %v9099_v1 = vld [vmem:[#allocation42_spill] sm:$0xff] }
 0x3ec   : > { %v2485_v19 = vpop.f32.mrf.mxu3  ;;  %v3976_v58 = vpack.c.b16 %v3960_v27, %v3960_v27  ;;  %v9100_v53 = vpack.c.bf16 %v9098_v11, %v9099_v1  ;;  %v5908_v11 = vld [vmem:[%s8704_s6 + $0x3d0] sm:$0xff]  }
 0x3ed   : > { %4166 = vmatpush.bf16.msrb.mxu1 %v9072_v4  ;;  %4179 = vmatpush.bf16.msrb.mxu2 %v3924_v42  ;;  %v2765_v30 = vpack.c.bf16 %v2485_v19, %v2485_v19  ;;  %v3921_v4 = vpack.c.bf16 %v3782_v51, %v3781_v0  ;;  %v9102_v42 = vld [vmem:[#allocation57_spill] sm:$0xff]  ;;  %v8577_v51 = vld [vmem:[%s8702_s4 + $0x38] sm:$0xff] }
 0x3ee   : > { %4120 = vmatpush.bf16.msrb.mxu0 %v9076_v38  ;;  %4148 = vmatmul.bf16.vlgmr.msra.gmra.mxu2 %v3976_v58  ;;  %v9103_v28 = vpack.c.bf16 %v9101_v8, %v9102_v42  ;;  %v9104_v38 = vld [vmem:[#allocation64_spill] sm:$0xff]  ;;  %v3963_v0 = vunpack.c.l.b16 %v8577_v51 }
 0x3ef   : > { %v3277_v25 = vunpack.c.l.bf16 %v2765_v30  ;;  %v9106_v45 = vpack.c.bf16 %v9104_v38, %v9105_v37 }
 0x3f1   : > { %4167 = vmatpush.bf16.msrb.mxu1 %v9074_v24  ;;  %4180 = vmatpush.bf16.msrb.mxu2 %v3923_v15  ;;  %v8537_v21 = vmul.f32 %v5757_v56, %v3277_v25  ;;  %v3959_v24 = vunpack.c.l.b16 %v3938_v48 }
 0x3f2   : > { %4121 = vmatpush.bf16.msrb.mxu0 %v9082_v13  ;;  %v9117_v13 = vld [vmem:[#allocation75_spill] sm:$0xff] }
 0x3f3   : > { %v3975_v19 = vpack.c.b16 %v3959_v24, %v3959_v24  ;;  %v9118_v15 = vpack.c.bf16 %v9116_v7, %v9117_v13 }
 0x3f4   : > { %v2487_v41 = vpop.f32.mrf.mxu3 }
 0x3f5   : > { %4168 = vmatpush.bf16.msrb.mxu1 %v9079_v44  ;;  %v2766_v55 = vpack.c.bf16 %v2487_v41, %v2487_v41  ;;  %4181 = vmatpush.bf16.msrb.mxu2 %v3922_v50  ;;  %v9125_v41 = vld [vmem:[#allocation48_spill] sm:$0xff] }
 0x3f6   : > { %4153 = vmatpush.bf16.msra.mxu0 %v9085_v10  ;;  %4135 = vmatmul.bf16.vlgmr.msra.gmra.mxu1 %v3975_v19  ;;  %v5761_v10 = vunpack.c.l.bf16 %v5907_v9  ;;  %v9127_v17 = vpack.c.bf16 %v9125_v41, %v9126_v59  ;;  %v5909_v19 = vld [vmem:[%s8704_s6 + $0x3d8] sm:$0xff]   ;;  %v4032_v14 = vpop.f32.mrf.mxu2 }
 0x3f7   : > { %v3278_v22 = vunpack.c.l.bf16 %v2766_v55  ;;  %4122 = vmatmul.bf16.vlgmr.msrb.gmra.mxu0 %v3974_v36  ;;  %v9128_v55 = vld [vmem:[#allocation28_spill] sm:$0xff]  ;;  %v5769_v63 = vunpack.c.l.bf16 %v5909_v19  ;;  %v5770_v62 = vunpack.c.h.bf16 %v5909_v19 }
 0x3f9   : > { %4169 = vmatpush.bf16.msrb.mxu1 %v9088_v29  ;;  %v8539_v39 = vmul.f32 %v5758_v18, %v3278_v22  ;;  %4182 = vmatpush.bf16.msrb.mxu2 %v3921_v4  ;;  %v9124_v29 = vpack.c.bf16 %v9122_v2, %v9123_v46  ;;  %v9129_v18 = vld [vmem:[#allocation35_spill] sm:$0xff] }
 0x3fa   : > { %4154 = vmatpush.bf16.msra.mxu0 %v9091_v32  ;;  %v3939_v32 = vld [vmem:[%s8702_s4 + $0x30] sm:$0xff]  ;;  %v9130_v23 = vpack.c.bf16 %v9128_v55, %v9129_v18 }
 0x3fb   : > { %v3925_v3 = vpack.c.bf16 %v8539_v39, %v8537_v21  ;;  %v3961_v35 = vunpack.c.l.b16 %v3939_v32  ;;  %v3962_v4 = vunpack.c.h.b16 %v3939_v32  ;;  %v5273_v21 = vld [vmem:[%s8701_s3] sm:$0xff]  ;;  %v6065_v39 = vmov 0.0  }
 0x3fc   : > { %v2490_v16 = vpop.f32.mrf.mxu3  ;;  %473 = vst.msk [vmem:[#allocation2] sm:$0xff] %vm472_vm0, %v6065_v39 }
 0x3fd   : > { %4170 = vmatpush.bf16.msrb.mxu1 %v9094_v20  ;;  %4183 = vmatpush.bf16.msrb.mxu2 %v9106_v45  ;;  %v2767_v44 = vpack.c.bf16 %v2490_v16, %v2490_v16  ;;  %v3979_v20 = vpack.c.b16 %v3963_v0, %v3963_v0  ;;  %v3977_v48 = vpack.c.b16 %v3961_v35, %v3961_v35  ;;  %v5766_v16 = vunpack.c.h.bf16 %v5908_v11  ;;  %v5913_v0 = vld [vmem:[%s8704_s6 + $0x3f8] sm:$0xff]  }
 0x3fe   : > { %4155 = vmatpush.bf16.msra.mxu0 %v9097_v40  ;;  %v9133_v40 = vpack.c.bf16 %v9131_v49, %v9132_v43  ;;  %v3978_v31 = vpack.c.b16 %v3962_v4, %v3962_v4 }
 0x3ff   : > { %v3279_v34 = vunpack.c.l.bf16 %v2767_v44 }
 0x401   : > { %4171 = vmatpush.bf16.msrb.mxu1 %v9100_v53  ;;  %4184 = vmatpush.bf16.msrb.mxu2 %v9115_v54  ;;  %v8586_v56 = vmul.f32 %v5761_v10, %v3279_v34  ;;  %v5765_v53 = vunpack.c.l.bf16 %v5908_v11  ;;  %v4021_v34 = vpop.f32.mrf.mxu1  ;;  %v5911_v11 = vld [vmem:[%s8704_s6 + $0x3e8] sm:$0xff]  }
 0x402   : > { %4156 = vmatpush.bf16.msra.mxu0 %v9103_v28 }
 0x404   : > { %v2492_v47 = vpop.f32.mrf.mxu3 }
 0x405   : > { %4172 = vmatpush.bf16.msrb.mxu1 %v9109_v61  ;;  %v2768_v30 = vpack.c.bf16 %v2492_v47, %v2492_v47  ;;  %4185 = vmatpush.bf16.msrb.mxu2 %v9124_v29 }
 0x406   : > { %4157 = vmatpush.bf16.msra.mxu0 %v9112_v12 }
 0x407   : > { %v3280_v50 = vunpack.c.l.bf16 %v2768_v30  ;;  %v4034_v30 = vpop.f32.mrf.mxu2 }
 0x409   : > { %4173 = vmatpush.bf16.msrb.mxu1 %v9118_v15  ;;  %v8588_v25 = vmul.f32 %v5762_v52, %v3280_v50  ;;  %4186 = vmatpush.bf16.msrb.mxu2 %v9130_v23  ;;  %v4006_v15 = vpop.f32.mrf.mxu0  ;;  %v4058_v46 = vpop.f32.mrf.mxu1  ;;  %v5912_v23 = vld [vmem:[%s8704_s6 + $0x3f0] sm:$0xff]  }
 0x40a   : > { %4158 = vmatpush.bf16.msra.mxu0 %v9121_v57  ;;  %v5782_v49 = vunpack.c.h.bf16 %v5912_v23 }
 0x40b   : > { %v3926_v22 = vpack.c.bf16 %v8588_v25, %v8586_v56  ;;  %v5274_v56 = vld [vmem:[%s8701_s3 + $0x8] sm:$0xff] }
 0x40c   : > { %v2495_v27 = vpop.f32.mrf.mxu3  ;;  %4187 = vmatmul.bf16.vlgmr.msrb.gmra.mxu2 %v3979_v20  ;;  %4174 = vmatmul.bf16.vlgmr.msrb.gmra.mxu1 %v3978_v31  ;;  %v5781_v31 = vunpack.c.l.bf16 %v5912_v23 }
 0x40d   : > { %v2769_v58 = vpack.c.bf16 %v2495_v27, %v2495_v27  ;;  %4233 = vmatpush.bf16.msra.mxu1 %v5274_v56 }
 0x40e   : > { %4159 = vmatpush.bf16.msra.mxu0 %v9127_v17  ;;  %v5785_v17 = vunpack.c.l.bf16 %v5913_v0 }
 0x40f   : > { %v3281_v36 = vunpack.c.l.bf16 %v2769_v58 }
 0x411   : > { %v8601_v42 = vmul.f32 %v5765_v53, %v3281_v36  ;;  %v4008_v57 = vpop.f32.mrf.mxu0  ;;  %v4060_v55 = vpop.f32.mrf.mxu1  ;;  %4234 = vmatpush.bf16.msra.mxu1 %v5273_v21 }
 0x412   : > { %4160 = vmatpush.bf16.msra.mxu0 %v9133_v40 }
 0x414   : > { %v2497_v1 = vpop.f32.mrf.mxu3 }
 0x415   : > { %4161 = vmatmul.bf16.vlgmr.msra.gmra.mxu0 %v3977_v48  ;;  %v2770_v24 = vpack.c.bf16 %v2497_v1, %v2497_v1  ;;  %v5786_v48 = vunpack.c.h.bf16 %v5913_v0 }
 0x416   : > { %v4071_v29 = vpop.f32.mrf.mxu2 }
 0x417   : > { %v3282_v8 = vunpack.c.l.bf16 %v2770_v24  ;;  %v5778_v24 = vunpack.c.h.bf16 %v5911_v11 }
 0x419   : > { %v8603_v28 = vmul.f32 %v5766_v16, %v3282_v8  ;;  %v4045_v52 = vpop.f32.mrf.mxu0 }
 0x41b   : > { %v3927_v38 = vpack.c.bf16 %v8603_v28, %v8601_v42 }
 0x41c   : > { %v2500_v37 = vpop.f32.mrf.mxu3 }
 0x41d   : > { %v2771_v45 = vpack.c.bf16 %v2500_v37, %v2500_v37 }
 0x41e   : > { %v4073_v4 = vpop.f32.mrf.mxu2 }
 0x41f   : > { %v3283_v61 = vunpack.c.l.bf16 %v2771_v45 }
 0x421   : > { %v8610_v44 = vmul.f32 %v5769_v63, %v3283_v61  ;;  %v4047_v41 = vpop.f32.mrf.mxu0 }
 0x424   : > { %v2502_v5 = vpop.f32.mrf.mxu3 }
 0x425   : > { %v2772_v26 = vpack.c.bf16 %v2502_v5, %v2502_v5  ;;  %v4020_v5 = vadd.f32 %v4019_v6, %v4006_v15 }
 0x427   : > { %v3284_v12 = vunpack.c.l.bf16 %v2772_v26  ;;  %v5777_v26 = vunpack.c.l.bf16 %v5911_v11 }
 0x429   : > { %v8612_v60 = vmul.f32 %v5770_v62, %v3284_v12 }
 0x42b   : > { %v3928_v33 = vpack.c.bf16 %v8612_v60, %v8610_v44 }
 0x42c   : > { %v2505_v54 = vpop.f32.mrf.mxu3 }
 0x42d   : > { %v2773_v61 = vpack.c.bf16 %v2505_v54, %v2505_v54 }
 0x434   : > { %v2507_v9 = vpop.f32.mrf.mxu3 }
 0x435   : > { %v2774_v8 = vpack.c.bf16 %v2507_v9, %v2507_v9 }
 0x43c   : > { %v2510_v7 = vpop.f32.mrf.mxu3 }
 0x43d   : > { %v2775_v58 = vpack.c.bf16 %v2510_v7, %v2510_v7  ;;  %v5910_v7 = vld [vmem:[%s8704_s6 + $0x3e0] sm:$0xff]  }
 0x43e   : > { %v5774_v57 = vunpack.c.h.bf16 %v5910_v7 }
 0x43f   : > { %v3287_v62 = vunpack.c.l.bf16 %v2775_v58 }
 0x441   : > { %v3799_v15 = vmul.f32 %v5777_v26, %v3287_v62 }
 0x444   : > { %v2512_v13 = vpop.f32.mrf.mxu3 }
 0x445   : > { %v2776_v27 = vpack.c.bf16 %v2512_v13, %v2512_v13  ;;  %v4033_v13 = vadd.f32 %v4032_v14, %v4020_v5  ;;  %v6066_v5 = vmov 32.0  }
 0x446   : > { %5980 = vrcp.f32 %v6066_v5 }
 0x447   : > { %v3288_v37 = vunpack.c.l.bf16 %v2776_v27  ;;  %v4097_v63 = vpop.f32.mrf.mxu1  ;;  %v4046_v30 = vadd.f32 %v4045_v52, %v4033_v13 }
 0x449   : > { %v3800_v34 = vmul.f32 %v5778_v24, %v3288_v37  ;;  %v4059_v54 = vadd.f32 %v4058_v46, %v4046_v30  ;;  %v4207_v24 = vld [vmem:[#allocation2] sm:$0xff] }
 0x44b   : > { %v3930_v41 = vpack.c.bf16 %v3800_v34, %v3799_v15 }
 0x44c   : > { %v2515_v47 = vpop.f32.mrf.mxu3 }
 0x44d   : > { %v2777_v18 = vpack.c.bf16 %v2515_v47, %v2515_v47 }
 0x44f   : > { %v3289_v1 = vunpack.c.l.bf16 %v2777_v18 }
 0x450   : > { %v4110_v47 = vpop.f32.mrf.mxu2 }
 0x451   : > { %v3801_v12 = vmul.f32 %v5781_v31, %v3289_v1 }
 0x452   : > { %v4084_v16 = vpop.f32.mrf.mxu0 }
 0x454   : > { %v2517_v10 = vpop.f32.mrf.mxu3 }
 0x455   : > { %v2778_v59 = vpack.c.bf16 %v2517_v10, %v2517_v10  ;;  %v3286_v10 = vunpack.c.l.bf16 %v2774_v8 }
 0x457   : > { %v3290_v43 = vunpack.c.l.bf16 %v2778_v59  ;;  %v3798_v0 = vmul.f32 %v5774_v57, %v3286_v10  ;;  %v4072_v59 = vadd.f32 %v4071_v29, %v4059_v54 }
 0x458   : > { %v4112_v14 = vpop.f32.mrf.mxu2 }
 0x459   : > { %v3802_v45 = vmul.f32 %v5782_v49, %v3290_v43  ;;  %v4085_v55 = vadd.f32 %v4084_v16, %v4072_v59  ;;  %v3964_v49 = vunpack.c.h.b16 %v8577_v51  ;;  %v5974_v59 = vld [vmem:[%s8706_s8] ss:$0 sm:$0xff] }
 0x45a   : > { %v4086_v6 = vpop.f32.mrf.mxu0 }
 0x45b   : > { %v3931_v9 = vpack.c.bf16 %v3802_v45, %v3801_v12  ;;  %v4098_v23 = vadd.f32 %v4097_v63, %v4085_v55  ;;  %v3980_v31 = vpack.c.b16 %v3964_v49, %v3964_v49  ;;  %v5981_v63 = vpop.eup %5980  ;;  %v5975_v55 = vld [vmem:[%s8707_s9] ss:$0 sm:$0xff] }
 0x45c   : > { %v2520_v2 = vpop.f32.mrf.mxu3  ;;  %vm4254_vm7 = vweird.f32 %v5981_v63 }
 0x45d   : > { %v2779_v50 = vpack.c.bf16 %v2520_v2, %v2520_v2  ;;  %v5773_v2 = vunpack.c.l.bf16 %v5910_v7 }
 0x45f   : > { %v3291_v35 = vunpack.c.l.bf16 %v2779_v50  ;;  %v3285_v50 = vunpack.c.l.bf16 %v2773_v61  ;;  %v4250_v61 = vmul.f32 32.0, %v5981_v63 }
 0x461   : > { %v3803_v53 = vmul.f32 %v5785_v17, %v3291_v35  ;;  %v4099_v17 = vpop.f32.mrf.mxu1  ;;  %v4111_v35 = vadd.f32 %v4110_v47, %v4098_v23  ;;  %v4251_v26 = vsub.f32 1.0, %v4250_v61  ;;  %v5984_v23 = vld [vmem:[%s6188_s22] sm:$0xff] }
 0x463   : > { %v4252_v62 = vmul.f32 %v5981_v63, %v4251_v26 }
 0x464   : > { %v2522_v32 = vpop.f32.mrf.mxu3 }
 0x465   : > { %v2780_v20 = vpack.c.bf16 %v2522_v32, %v2522_v32  ;;  %v3797_v32 = vmul.f32 %v5773_v2, %v3285_v50  ;;  %v4253_v12 = vadd.f32 %v5981_v63, %v4252_v62 }
 0x467   : > { %v3292_v40 = vunpack.c.l.bf16 %v2780_v20  ;;  %v3929_v18 = vpack.c.bf16 %v3798_v0, %v3797_v32  ;;  %v4255_v7 = vsel %vm4254_vm7, %v5981_v63, %v4253_v12 }
 0x469   : > { %v3804_v36 = vmul.f32 %v5786_v48, %v3292_v40 }
 0x46b   : > { %v3932_v19 = vpack.c.bf16 %v3804_v36, %v3803_v53 }
 0x46d   : > { %4192 = vmatpush.bf16.msrb.mxu0 %v3932_v19 }
 0x471   : > { %4193 = vmatpush.bf16.msrb.mxu0 %v3931_v9  ;;  %v4149_v4 = vpop.f32.mrf.mxu2 }
 0x473   : > { %v4136_v48 = vpop.f32.mrf.mxu1 }
 0x474   : > { %v4123_v20 = vpop.f32.mrf.mxu0 }
 0x475   : > { %4194 = vmatpush.bf16.msrb.mxu0 %v3930_v41  ;;  %v4124_v52 = vadd.f32 %v4123_v20, %v4111_v35 }
 0x477   : > { %v4137_v46 = vadd.f32 %v4136_v48, %v4124_v52 }
 0x479   : > { %4195 = vmatpush.bf16.msrb.mxu0 %v3929_v18  ;;  %v4150_v27 = vadd.f32 %v4149_v4, %v4137_v46  ;;  %v4151_v40 = vpop.f32.mrf.mxu2 }
 0x47b   : > { %v4138_v43 = vpop.f32.mrf.mxu1 }
 0x47c   : > { %v4125_v29 = vpop.f32.mrf.mxu0 }
 0x47d   : > { %4196 = vmatpush.bf16.msrb.mxu0 %v3928_v33 }
 0x481   : > { %4197 = vmatpush.bf16.msrb.mxu0 %v3927_v38 }
 0x485   : > { %4198 = vmatpush.bf16.msrb.mxu0 %v3926_v22  ;;  %v9134_v22 = vld [vmem:[#allocation6_spill] sm:$0xff] }
 0x489   : > { %4199 = vmatpush.bf16.msrb.mxu0 %v3925_v3  ;;  %v4175_v60 = vpop.f32.mrf.mxu1 }
 0x48c   : > { %4200 = vmatmul.bf16.vlgmr.msrb.gmra.mxu0 %v3980_v31 }
 0x48f   : > { %v4188_v28 = vpop.f32.mrf.mxu2 }
 0x491   : > { %v4177_v51 = vpop.f32.mrf.mxu1 }
 0x492   : > { %v4162_v44 = vpop.f32.mrf.mxu0 }
 0x493   : > { %v4163_v33 = vadd.f32 %v4162_v44, %v4150_v27 }
 0x495   : > { %v4176_v42 = vadd.f32 %v4175_v60, %v4163_v33 }
 0x497   : > { %v4189_v38 = vadd.f32 %v4188_v28, %v4176_v42  ;;  %v4190_v11 = vpop.f32.mrf.mxu2 }
 0x49a   : > { %v4164_v58 = vpop.f32.mrf.mxu0 }
 0x509   : > { %v4201_v3 = vpop.f32.mrf.mxu0 }
 0x50a   : > { %v4202_v25 = vadd.f32 %v4201_v3, %v4189_v38 }
 0x50c   : > { %v4205_v1 = vmul.f32 %v4202_v25, %v9134_v22 }
 0x50e   : > { %v4206_v53 = vpack.c.bf16 %v4205_v1, %v4205_v1 }
 0x510   : > { %5134 = vmatmul.msk.bf16.vlgmr.msra.gmra.mxu1 %vm472_vm0, %v4206_v53 }
 0x511   : > { %v4203_v36 = vpop.f32.mrf.mxu0 }
 0x58d   : > { %v4236_v16 = vpop.f32.mrf.mxu1 }
 0x58e   : > { %v4240_v8 = vadd.f32 %v4236_v16, %v4207_v24 }
 0x590   : > { %4241 = vst.msk [vmem:[#allocation2] sm:$0xff] %vm472_vm0, %v4240_v8 }
 0x595   : > { %v4238_v37 = vpop.f32.mrf.mxu1 }
 0x597   : > { %v4245_v45 = vld [vmem:[#allocation2] sm:$0xff] }
 0x598   : > { %v4246_v19 = vsel %vm472_vm0, %v4245_v45, 0.0 }
 0x599   : > { %4247 = vadd.xlane.f32.xlu0 %v4246_v19 }
 0x60c   : > { %v4248_v13 = vpop.xlane.xlu0 %4247 }
 0x60d   : > { %v4256_v47 = vmul.f32 %v4255_v7, %v4248_v13 }
 0x60f   : > { %v4257_v57 = vsub.f32 %v4245_v45, %v4256_v47 }
 0x611   : > { %v4258_v10 = vmul.f32 %v4257_v57, %v4257_v57 }
 0x613   : > { %v4259_v34 = vsel %vm472_vm0, %v4258_v10, 0.0 }
 0x614   : > { %4260 = vadd.xlane.f32.xlu0 %v4259_v34 }
 0x687   : > { %v4261_v9 = vpop.xlane.xlu0 %4260 }
 0x688   : > { %v4262_v30 = vmul.f32 %v4261_v9, %v4255_v7 }
 0x68a   : > { %v4263_v2 = vadd.f32 1e-05, %v4262_v30 }
 0x68c   : > { %5982 = vrsqrt.f32 %v4263_v2  ;;  %vm4270_vm9 = vweird.f32 %v4263_v2 }
 0x692   : > { %v5983_v50 = vpop.eup %5982 }
 0x693   : > { %v4265_v15 = vmul.f32 %v5983_v50, %v4263_v2  ;;  %vm4271_vm8 = vweird.f32 %v5983_v50 }
 0x694   : > { %vm4272_vm10 = vmor %vm4270_vm9, %vm4271_vm8 }
 0x695   : > { %v4266_v54 = vmul.f32 %v5983_v50, %v4265_v15 }
 0x697   : > { %v4267_v6 = vmul.f32 0.5, %v4266_v54 }
 0x699   : > { %v4268_v0 = vsub.f32 1.5, %v4267_v6 }
 0x69b   : > { %v4269_v41 = vmul.f32 %v5983_v50, %v4268_v0 }
 0x69d   : > { %v4273_v17 = vsel %vm4272_vm10, %v5983_v50, %v4269_v41 }
 0x69e   : > { %v4274_v32 = vmul.f32 %v4273_v17, %v4257_v57 }
 0x6a0   : > { %v4279_v14 = vmul.f32 %v5974_v59, %v4274_v32 }
 0x6a2   : > { %v4284_v18 = vadd.f32 %v5975_v55, %v4279_v14 }
 0x6a4   : > { %v4286_v35 = vadd.f32 %v5984_v23, %v4284_v18 }
 0x6a6   : > { %4287 = vst.msk [vmem:[%s436_s1] sm:$0xff] %vm472_vm0, %v4286_v35 }
 0x6a7   : > { %6012 = shalt.err (!%p6009_p5)
}
 0x6a8   : > { %5917 = dma.vmem_to_hbm [thread:$0]  (%p6162_p4), %s4302_s2, 128, %s4304_s16, %s4289_s29  }
 0x6a9 PF: > { %p5923_p6 = scmp.ge.s32.totalorder %s6063_s18, 2  ;;  %s4315_s1 = sand.u32 1, %s6043_s13  }
 0x6aa   : > { %s4316_s22 = scalar_lea.sflag [#allocation4], %s4315_s1 }
 0x6ab   : > { %p5920_p7 = pnand %p5923_p6, %p6169_p8 }
 0x6ad   : > { %p5921_p9 = pneg %p5920_p7 }
 0x6af   : > { %6038 = dma.done.wait (%p5921_p9), %s4316_s22, 128  }
 0x6b0   : > { %6040 = vsyncadd (%p5921_p9), %s4316_s22, 4294967168  ;;  %s23_s18 = sadd.s32 1, %s6063_s18   ;;  %s9135_s13 = smov %s6047_s14 }
 0x6b1   : > { %p20_p10 = scmp.ge.s32.totalorder %s23_s18, 4   ;;  %s9136_s14 = smov %s6051_s15 }
 0x6b2   : > { %s9137_s15 = smov %s6175_s26  ;;  %s9138_s16 = smov %s6059_s17 }
 0x6b3   : > { %s9139_s17 = smov %s9141_s21  ;;  %22 = sbr.rel (!%p20_p10) target bundleno = 8 (0x8), region = 118 }
 0x6b8   :  { %4322 = vsyncpa [#allocation4], 1 }
 0x6b9   :  { %4324 = vsyncpa [#allocation4 + $0x1], 1 }

</bundles_post_ra>
